<compile_context>
chip_gen: v7x
topology: tpu7x:2x2x1
jax: 0.10.0
libtpu: 0.0.40
codegen_flags: <defaults>
</compile_context>

<pallas_src>
import functools

import jax
import jax.numpy as jnp
from jax.experimental import pallas as pl
from jax.experimental.pallas import tpu as pltpu

_EPS = 1e-5  # nn.BatchNorm2d default


def _round_up(n, m):
    return ((n + m - 1) // m) * m


# ----------------------------------------------------------------------------
# Fused DoubleConv Pallas kernel: (3x3 conv, pad=1, no bias) + folded BN + ReLU, twice.
# Input is spatially pre-padded and kx-im2col'd: x_ref is (H+2, W, 3*Cin_p).
# ----------------------------------------------------------------------------
def _double_conv_kernel(x_ref, w1_ref, s1_ref, t1_ref, w2_ref, s2_ref, t2_ref,
                        o_ref, hcol_ref):
    Hp, W, K1 = x_ref.shape          # Hp = H + 2, K1 = 3 * Cin_p (kx folded into K)
    H = Hp - 2
    cmid = w1_ref.shape[-1]
    cout = w2_ref.shape[-1]
    K2 = hcol_ref.shape[-1]          # 3 * cmid

    # ---- conv1: 3 MXU matmuls, K = 3*Cin_p; ky shift = outer-dim slice (free) ----
    acc = jnp.dot(x_ref[pl.ds(0, H), :, :].reshape(H * W, K1), w1_ref[0],
                  preferred_element_type=jnp.float32)
    for ky in (1, 2):
        win = x_ref[pl.ds(ky, H), :, :].reshape(H * W, K1)
        acc += jnp.dot(win, w1_ref[ky], preferred_element_type=jnp.float32)
    h1 = jnp.maximum(acc * s1_ref[...] + t1_ref[...], 0.0)        # folded BN1 + ReLU
    h1 = h1.reshape(H, W, cmid).astype(hcol_ref.dtype)

    # ---- build conv2's kx-im2col staging buffer (border strips zeroed only) ----
    zdt = hcol_ref.dtype
    hcol_ref[pl.ds(0, 1), :, :] = jnp.zeros((1, W, K2), zdt)       # top pad row
    hcol_ref[pl.ds(Hp - 1, 1), :, :] = jnp.zeros((1, W, K2), zdt)  # bottom pad row
    # kx = 1 tap: full-width, sublane-aligned store.
    hcol_ref[pl.ds(1, H), :, pl.ds(cmid, cmid)] = h1
    # kx = 0 tap: dest cols 1..W-1 <- h1 cols 0..W-2; col 0 is the left zero pad.
    hcol_ref[pl.ds(1, H), pl.ds(0, 1), pl.ds(0, cmid)] = jnp.zeros((H, 1, cmid), zdt)
    hcol_ref[pl.ds(1, H), pl.ds(1, W - 1), pl.ds(0, cmid)] = h1[:, :W - 1, :]
    # kx = 2 tap: dest cols 0..W-2 <- h1 cols 1..W-1; col W-1 is the right zero pad.
    hcol_ref[pl.ds(1, H), pl.ds(W - 1, 1), pl.ds(2 * cmid, cmid)] = (
        jnp.zeros((H, 1, cmid), zdt))
    hcol_ref[pl.ds(1, H), pl.ds(0, W - 1), pl.ds(2 * cmid, cmid)] = h1[:, 1:, :]

    # ---- conv2: 3 MXU matmuls, K = 3*Cmid_p ----
    acc2 = jnp.dot(hcol_ref[pl.ds(0, H), :, :].reshape(H * W, K2), w2_ref[0],
                   preferred_element_type=jnp.float32)
    for ky in (1, 2):
        win = hcol_ref[pl.ds(ky, H), :, :].reshape(H * W, K2)
        acc2 += jnp.dot(win, w2_ref[ky], preferred_element_type=jnp.float32)
    h2 = jnp.maximum(acc2 * s2_ref[...] + t2_ref[...], 0.0)        # folded BN2 + ReLU
    o_ref[...] = h2.reshape(H, W, cout).astype(o_ref.dtype)        # lane-dense store


def _double_conv_pallas(xcol, w1, s1, t1, w2, s2, t2, *, out_dtype):
    """xcol: (N, H+2, W, 3*Cin_p); w*: (3, 3*C_p, Cout_p); s*/t*: (1, Cout_p)."""
    N, Hp, W, K1 = xcol.shape
    H = Hp - 2
    cmid = w1.shape[-1]
    cout = w2.shape[-1]
    compute_dtype = xcol.dtype
    itemsize = jnp.dtype(compute_dtype).itemsize

    flops = 2 * N * H * W * (3 * K1 * cmid + 9 * cmid * cout)
    bytes_accessed = int(
        sum(int(a.size) * a.dtype.itemsize for a in (xcol, w1, s1, t1, w2, s2, t2))
        + N * H * W * cout * jnp.dtype(out_dtype).itemsize)

    # VMEM budget from buffer arithmetic: double-buffered input/output blocks,
    # (conservatively double-buffered) resident weights, BN vectors, staging scratch.
    block_bytes = (2 * Hp * W * K1 * itemsize
                   + 2 * H * W * cout * jnp.dtype(out_dtype).itemsize
                   + 2 * (3 * K1 * cmid + 9 * cmid * cout) * itemsize
                   + 2 * 2 * (cmid + cout) * 4
                   + Hp * W * 3 * cmid * itemsize)
    vmem_limit = int(min(56 * 1024 * 1024, max(4 * block_bytes, 16 * 1024 * 1024)))

    return pl.pallas_call(
        _double_conv_kernel,
        out_shape=jax.ShapeDtypeStruct((N, H, W, cout), out_dtype),
        grid_spec=pltpu.PrefetchScalarGridSpec(
            num_scalar_prefetch=0,
            grid=(N,),
            in_specs=[
                pl.BlockSpec((None, Hp, W, K1), lambda n: (n, 0, 0, 0)),
                pl.BlockSpec((3, K1, cmid), lambda n: (0, 0, 0)),    # resident weights
                pl.BlockSpec((1, cmid), lambda n: (0, 0)),
                pl.BlockSpec((1, cmid), lambda n: (0, 0)),
                pl.BlockSpec((3, 3 * cmid, cout), lambda n: (0, 0, 0)),
                pl.BlockSpec((1, cout), lambda n: (0, 0)),
                pl.BlockSpec((1, cout), lambda n: (0, 0)),
            ],
            out_specs=pl.BlockSpec((None, H, W, cout), lambda n: (n, 0, 0, 0)),
            scratch_shapes=[
                pltpu.VMEM((Hp, W, 3 * cmid), compute_dtype),  # conv2 kx-im2col staging
            ],
        ),
        compiler_params=pltpu.CompilerParams(
            dimension_semantics=("parallel",),         # pipeline + 2-TC shard on v7x
            vmem_limit_bytes=vmem_limit,
        ),
        cost_estimate=pl.CostEstimate(flops=flops, transcendentals=0,
                                      bytes_accessed=bytes_accessed),
    )(xcol, w1, s1, t1, w2, s2, t2)


# ----------------------------------------------------------------------------
# Wrapper: upsample + pad + concat (JAX), layout prep, then fused DoubleConv (Pallas)
# ----------------------------------------------------------------------------
def _interp_matrix_1d(n_in, n_out):
    """(n_out, n_in) linear-interpolation matrix, align_corners=True."""
    if n_in == 1:
        return jnp.ones((n_out, n_in), jnp.float32)
    src = jnp.arange(n_out, dtype=jnp.float32) * ((n_in - 1) / (n_out - 1))
    lo = jnp.clip(jnp.floor(src).astype(jnp.int32), 0, n_in - 2)
    frac = src - lo.astype(jnp.float32)
    return (jax.nn.one_hot(lo, n_in, dtype=jnp.float32) * (1.0 - frac)[:, None]
            + jax.nn.one_hot(lo + 1, n_in, dtype=jnp.float32) * frac[:, None])


def _bilinear_upsample_2x(x):
    """(N, C, H, W) -> (N, C, 2H, 2W); matches F.interpolate(bilinear, align_corners=True)."""
    _, _, h, w = x.shape
    ah = _interp_matrix_1d(h, 2 * h)
    aw = _interp_matrix_1d(w, 2 * w)
    return jnp.einsum("nchw,Hh,Ww->ncHW", x, ah, aw,
                      precision=jax.lax.Precision.HIGHEST)


def _upsample_pad_concat(x, skip):
    x_up = _bilinear_upsample_2x(x)
    diff_y = skip.shape[2] - x_up.shape[2]
    diff_x = skip.shape[3] - x_up.shape[3]
    x_up = jnp.pad(x_up, ((0, 0), (0, 0),
                          (diff_y // 2, diff_y - diff_y // 2),
                          (diff_x // 2, diff_x - diff_x // 2)))
    return jnp.concatenate([skip, x_up], axis=1)   # (N, C_skip + C_x, H, W)


@functools.partial(jax.jit, static_argnames=("compute_dtype",))
def up_forward(x, skip, params, compute_dtype=jnp.bfloat16):
    """Up.forward(x, skip).  x: (N, C_x, h, w), skip: (N, C_skip, 2h, 2w). NCHW, f32."""
    xin = _upsample_pad_concat(x, skip)            # (N, Cin, H, W)
    N, cin, H, W = xin.shape
    cmid = params["w1"].shape[0]
    cout = params["w2"].shape[0]
    cin_p, cmid_p, cout_p = (_round_up(c, 128) for c in (cin, cmid, cout))

    # NCHW -> NHWC; zero-pad +1 spatial halo on each side and channels to 128 lanes.
    x_nhwc = jnp.transpose(xin, (0, 2, 3, 1))
    x_pad = jnp.pad(x_nhwc, ((0, 0), (1, 1), (1, 1), (0, cin_p - cin)))
    # im2col over kx only: (N, H+2, W, 3*Cin_p); ky stays a free outer-dim shift in-kernel.
    xcol = jnp.concatenate([x_pad[:, :, kx:kx + W, :] for kx in range(3)], axis=-1)
    xcol = xcol.astype(compute_dtype)

    def prep_w(w, ci_p, co_p):
        # PyTorch OIHW -> (ky, kx, Cin, Cout) -> (3, 3*Cin_p, Cout_p), compute dtype.
        co, ci = w.shape[0], w.shape[1]
        w = jnp.transpose(w, (2, 3, 1, 0))
        w = jnp.pad(w, ((0, 0), (0, 0), (0, ci_p - ci), (0, co_p - co)))
        return w.reshape(3, 3 * ci_p, co_p).astype(compute_dtype)

    def fold_bn(gamma, beta, mean, var, c_p):
        # Eval-mode BN folded to y = conv * s + t  (kept in f32; padded channels -> 0).
        s = gamma / jnp.sqrt(var + _EPS)
        t = beta - mean * s
        s = jnp.pad(s, (0, c_p - s.shape[0])).reshape(1, c_p).astype(jnp.float32)
        t = jnp.pad(t, (0, c_p - t.shape[0])).reshape(1, c_p).astype(jnp.float32)
        return s, t

    w1 = prep_w(params["w1"], cin_p, cmid_p)
    w2 = prep_w(params["w2"], cmid_p, cout_p)
    s1, t1 = fold_bn(params["g1"], params["beta1"], params["m1"], params["v1"], cmid_p)
    s2, t2 = fold_bn(params["g2"], params["beta2"], params["m2"], params["v2"], cout_p)

    out_nhwc = _double_conv_pallas(xcol, w1, s1, t1, w2, s2, t2,
                                   out_dtype=compute_dtype)    # compute-dtype writeback
    out = jnp.transpose(out_nhwc[..., :cout], (0, 3, 1, 2))    # NCHW, un-pad channels
    return out.astype(jnp.float32)


# ----------------------------------------------------------------------------
# Pure-JAX reference (matches PyTorch eval-mode forward)
# ----------------------------------------------------------------------------
def up_reference(x, skip, params):
    h = _upsample_pad_concat(x, skip)

    def conv_bn_relu(h, w, g, b, m, v):
        y = jax.lax.conv_general_dilated(
            h, w, window_strides=(1, 1), padding=((1, 1), (1, 1)),
            dimension_numbers=("NCHW", "OIHW", "NCHW"),
            precision=jax.lax.Precision.HIGHEST)
        y = ((y - m[None, :, None, None]) / jnp.sqrt(v[None, :, None, None] + _EPS)
             * g[None, :, None, None] + b[None, :, None, None])
        return jnp.maximum(y, 0.0)

    h = conv_bn_relu(h, params["w1"], params["g1"], params["beta1"],
                     params["m1"], params["v1"])
    h = conv_bn_relu(h, params["w2"], params["g2"], params["beta2"],
                     params["m2"], params["v2"])
    return h


# ----------------------------------------------------------------------------
# Parameter init (PyTorch-style Conv2d bounds, non-trivial BN running stats)
# ----------------------------------------------------------------------------
def init_up_params(key, in_channels, out_channels):
    ks = jax.random.split(key, 10)
    bw1 = 1.0 / (in_channels * 9) ** 0.5
    bw2 = 1.0 / (out_channels * 9) ** 0.5
    return dict(
        w1=jax.random.uniform(ks[0], (out_channels, in_channels, 3, 3),
                              jnp.float32, -bw1, bw1),
        g1=jax.random.uniform(ks[1], (out_channels,), jnp.float32, 0.8, 1.2),
        beta1=0.05 * jax.random.normal(ks[2], (out_channels,), jnp.float32),
        m1=0.05 * jax.random.normal(ks[3], (out_channels,), jnp.float32),
        v1=jax.random.uniform(ks[4], (out_channels,), jnp.float32, 0.8, 1.2),
        w2=jax.random.uniform(ks[5], (out_channels, out_channels, 3, 3),
                              jnp.float32, -bw2, bw2),
        g2=jax.random.uniform(ks[6], (out_channels,), jnp.float32, 0.8, 1.2),
        beta2=0.05 * jax.random.normal(ks[7], (out_channels,), jnp.float32),
        m2=0.05 * jax.random.normal(ks[8], (out_channels,), jnp.float32),
        v2=jax.random.uniform(ks[9], (out_channels,), jnp.float32, 0.8, 1.2),
    )


if __name__ == "__main__":
    # Up(in_channels=8, out_channels=4, bilinear=True):
    #   x: (N, 4, 8, 8) is upsampled to 16x16, concatenated with skip (N, 4, 16, 16).
    N, c_x, h, w = 2, 4, 8, 8
    c_skip, out_channels = 4, 4

    key = jax.random.PRNGKey(0)
    kx, ks, kp = jax.random.split(key, 3)
    x = jax.random.normal(kx, (N, c_x, h, w), jnp.float32)
    skip = jax.random.normal(ks, (N, c_skip, 2 * h, 2 * w), jnp.float32)
    params = init_up_params(kp, c_skip + c_x, out_channels)

    ref = jax.block_until_ready(up_reference(x, skip, params))

    # bf16 matmul operands + bf16 writeback, f32 accumulation (fast path).
    out_bf16 = jax.block_until_ready(up_forward(x, skip, params,
                                                compute_dtype=jnp.bfloat16))
    # f32 operands (exactness check).
    out_f32 = jax.block_until_ready(up_forward(x, skip, params,
                                               compute_dtype=jnp.float32))

    assert out_bf16.shape == ref.shape == (N, out_channels, 2 * h, 2 * w)
    err_bf16 = float(jnp.max(jnp.abs(out_bf16 - ref)))
    err_f32 = float(jnp.max(jnp.abs(out_f32 - ref)))
    assert err_bf16 < 1e-1, f"bf16 path max abs err {err_bf16}"
    assert err_f32 < 2e-2, f"f32 path max abs err {err_f32}"

    print("KERNEL_OK")
</pallas_src>

<mosaic_0001>
module attributes {stable_mosaic.version = 11 : i64} {
  func.func @_double_conv_kernel(%arg0: i32, %arg1: memref<1x18x16x384xbf16, #tpu.memory_space<vmem>>, %arg2: memref<3x384x128xbf16, #tpu.memory_space<vmem>>, %arg3: memref<1x128xf32, #tpu.memory_space<vmem>>, %arg4: memref<1x128xf32, #tpu.memory_space<vmem>>, %arg5: memref<3x384x128xbf16, #tpu.memory_space<vmem>>, %arg6: memref<1x128xf32, #tpu.memory_space<vmem>>, %arg7: memref<1x128xf32, #tpu.memory_space<vmem>>, %arg8: memref<1x16x16x128xbf16, #tpu.memory_space<vmem>>, %arg9: memref<18x16x384xbf16, #tpu.memory_space<vmem>>) attributes {dimension_semantics = [#tpu.dimension_semantics<parallel>], iteration_bounds = array<i64: 2>, scalar_prefetch = 0 : i64, scratch_operands = 1 : i64, tpu.core_type = #tpu.core_type<tc>, window_params = [{transform_indices = @transform_0, window_bounds = array<i64: 1, 18, 16, 384>}, {pipeline_mode = #tpu.pipeline_mode<synchronous>, transform_indices = @transform_1, window_bounds = array<i64: 3, 384, 128>}, {pipeline_mode = #tpu.pipeline_mode<synchronous>, transform_indices = @transform_2, window_bounds = array<i64: 1, 128>}, {pipeline_mode = #tpu.pipeline_mode<synchronous>, transform_indices = @transform_3, window_bounds = array<i64: 1, 128>}, {pipeline_mode = #tpu.pipeline_mode<synchronous>, transform_indices = @transform_4, window_bounds = array<i64: 3, 384, 128>}, {pipeline_mode = #tpu.pipeline_mode<synchronous>, transform_indices = @transform_5, window_bounds = array<i64: 1, 128>}, {pipeline_mode = #tpu.pipeline_mode<synchronous>, transform_indices = @transform_6, window_bounds = array<i64: 1, 128>}, {transform_indices = @transform_7, window_bounds = array<i64: 1, 16, 16, 128>}]} {
    %c0 = arith.constant 0 : index
    %c0_0 = arith.constant 0 : index
    %c0_1 = arith.constant 0 : index
    %c0_2 = arith.constant 0 : index
    %0 = vector.load %arg1[%c0, %c0_0, %c0_1, %c0_2] : memref<1x18x16x384xbf16, #tpu.memory_space<vmem>>, vector<1x16x16x384xbf16>
    %1 = vector.shape_cast %0 : vector<1x16x16x384xbf16> to vector<16x16x384xbf16>
    %2 = vector.shape_cast %1 : vector<16x16x384xbf16> to vector<256x384xbf16>
    %c0_3 = arith.constant 0 : index
    %c0_4 = arith.constant 0 : index
    %c0_5 = arith.constant 0 : index
    %3 = vector.load %arg2[%c0_3, %c0_4, %c0_5] : memref<3x384x128xbf16, #tpu.memory_space<vmem>>, vector<1x384x128xbf16>
    %4 = vector.shape_cast %3 : vector<1x384x128xbf16> to vector<384x128xbf16>
    %cst = arith.constant dense<0.000000e+00> : vector<256x128xf32>
    %5 = tpu.matmul %2, %4, %cst {dimension_numbers = #tpu.dot_dimension_numbers<[1], [0], [0], [1], [0, 0, 1, 1], [], []>} : vector<256x384xbf16>, vector<384x128xbf16>, vector<256x128xf32> -> vector<256x128xf32>
    %c0_6 = arith.constant 0 : index
    %c1 = arith.constant 1 : index
    %c0_7 = arith.constant 0 : index
    %c0_8 = arith.constant 0 : index
    %6 = vector.load %arg1[%c0_6, %c1, %c0_7, %c0_8] : memref<1x18x16x384xbf16, #tpu.memory_space<vmem>>, vector<1x16x16x384xbf16>
    %7 = vector.shape_cast %6 : vector<1x16x16x384xbf16> to vector<16x16x384xbf16>
    %8 = vector.shape_cast %7 : vector<16x16x384xbf16> to vector<256x384xbf16>
    %c1_9 = arith.constant 1 : index
    %c0_10 = arith.constant 0 : index
    %c0_11 = arith.constant 0 : index
    %9 = vector.load %arg2[%c1_9, %c0_10, %c0_11] : memref<3x384x128xbf16, #tpu.memory_space<vmem>>, vector<1x384x128xbf16>
    %10 = vector.shape_cast %9 : vector<1x384x128xbf16> to vector<384x128xbf16>
    %cst_12 = arith.constant dense<0.000000e+00> : vector<256x128xf32>
    %11 = tpu.matmul %8, %10, %cst_12 {dimension_numbers = #tpu.dot_dimension_numbers<[1], [0], [0], [1], [0, 0, 1, 1], [], []>} : vector<256x384xbf16>, vector<384x128xbf16>, vector<256x128xf32> -> vector<256x128xf32>
    %12 = arith.addf %5, %11 : vector<256x128xf32>
    %c0_13 = arith.constant 0 : index
    %c2 = arith.constant 2 : index
    %c0_14 = arith.constant 0 : index
    %c0_15 = arith.constant 0 : index
    %13 = vector.load %arg1[%c0_13, %c2, %c0_14, %c0_15] : memref<1x18x16x384xbf16, #tpu.memory_space<vmem>>, vector<1x16x16x384xbf16>
    %14 = vector.shape_cast %13 : vector<1x16x16x384xbf16> to vector<16x16x384xbf16>
    %15 = vector.shape_cast %14 : vector<16x16x384xbf16> to vector<256x384xbf16>
    %c2_16 = arith.constant 2 : index
    %c0_17 = arith.constant 0 : index
    %c0_18 = arith.constant 0 : index
    %16 = vector.load %arg2[%c2_16, %c0_17, %c0_18] : memref<3x384x128xbf16, #tpu.memory_space<vmem>>, vector<1x384x128xbf16>
    %17 = vector.shape_cast %16 : vector<1x384x128xbf16> to vector<384x128xbf16>
    %cst_19 = arith.constant dense<0.000000e+00> : vector<256x128xf32>
    %18 = tpu.matmul %15, %17, %cst_19 {dimension_numbers = #tpu.dot_dimension_numbers<[1], [0], [0], [1], [0, 0, 1, 1], [], []>} : vector<256x384xbf16>, vector<384x128xbf16>, vector<256x128xf32> -> vector<256x128xf32>
    %19 = arith.addf %12, %18 : vector<256x128xf32>
    %c0_20 = arith.constant 0 : index
    %c0_21 = arith.constant 0 : index
    %20 = vector.load %arg3[%c0_20, %c0_21] : memref<1x128xf32, #tpu.memory_space<vmem>>, vector<1x128xf32>
    %21 = vector.broadcast %20 : vector<1x128xf32> to vector<256x128xf32>
    %22 = arith.mulf %19, %21 : vector<256x128xf32>
    %c0_22 = arith.constant 0 : index
    %c0_23 = arith.constant 0 : index
    %23 = vector.load %arg4[%c0_22, %c0_23] : memref<1x128xf32, #tpu.memory_space<vmem>>, vector<1x128xf32>
    %24 = vector.broadcast %23 : vector<1x128xf32> to vector<256x128xf32>
    %25 = arith.addf %22, %24 : vector<256x128xf32>
    %cst_24 = arith.constant 0.000000e+00 : f32
    %26 = vector.broadcast %cst_24 : f32 to vector<256x128xf32>
    %27 = arith.maximumf %25, %26 : vector<256x128xf32>
    %28 = vector.shape_cast %27 : vector<256x128xf32> to vector<16x16x128xf32>
    %29 = arith.truncf %28 : vector<16x16x128xf32> to vector<16x16x128xbf16>
    %cst_25 = arith.constant 0.000000e+00 : bf16
    %30 = vector.broadcast %cst_25 : bf16 to vector<1x16x384xbf16>
    %c0_26 = arith.constant 0 : index
    %c0_27 = arith.constant 0 : index
    %c0_28 = arith.constant 0 : index
    %31 = vector.load %arg9[%c0_26, %c0_27, %c0_28] : memref<18x16x384xbf16, #tpu.memory_space<vmem>>, vector<1x16x384xbf16>
    tpu.vector_store %arg9[%c0_26, %c0_27, %c0_28], %30 {strides = array<i32>} : memref<18x16x384xbf16, #tpu.memory_space<vmem>>, vector<1x16x384xbf16>,
    %cst_29 = arith.constant 0.000000e+00 : bf16
    %32 = vector.broadcast %cst_29 : bf16 to vector<1x16x384xbf16>
    %c17 = arith.constant 17 : index
    %c0_30 = arith.constant 0 : index
    %c0_31 = arith.constant 0 : index
    %33 = vector.load %arg9[%c17, %c0_30, %c0_31] : memref<18x16x384xbf16, #tpu.memory_space<vmem>>, vector<1x16x384xbf16>
    tpu.vector_store %arg9[%c17, %c0_30, %c0_31], %32 {strides = array<i32>} : memref<18x16x384xbf16, #tpu.memory_space<vmem>>, vector<1x16x384xbf16>,
    %c1_32 = arith.constant 1 : index
    %c0_33 = arith.constant 0 : index
    %c128 = arith.constant 128 : index
    %34 = vector.load %arg9[%c1_32, %c0_33, %c128] : memref<18x16x384xbf16, #tpu.memory_space<vmem>>, vector<16x16x128xbf16>
    tpu.vector_store %arg9[%c1_32, %c0_33, %c128], %29 {strides = array<i32>} : memref<18x16x384xbf16, #tpu.memory_space<vmem>>, vector<16x16x128xbf16>,
    %cst_34 = arith.constant 0.000000e+00 : bf16
    %35 = vector.broadcast %cst_34 : bf16 to vector<16x1x128xbf16>
    %c1_35 = arith.constant 1 : index
    %c0_36 = arith.constant 0 : index
    %c0_37 = arith.constant 0 : index
    %36 = vector.load %arg9[%c1_35, %c0_36, %c0_37] : memref<18x16x384xbf16, #tpu.memory_space<vmem>>, vector<16x1x128xbf16>
    tpu.vector_store %arg9[%c1_35, %c0_36, %c0_37], %35 {strides = array<i32>} : memref<18x16x384xbf16, #tpu.memory_space<vmem>>, vector<16x1x128xbf16>,
    %37 = vector.extract_strided_slice %29 {offsets = [0, 0, 0], sizes = [16, 15, 128], strides = [1, 1, 1]} : vector<16x16x128xbf16> to vector<16x15x128xbf16>
    %c1_38 = arith.constant 1 : index
    %c1_39 = arith.constant 1 : index
    %c0_40 = arith.constant 0 : index
    %38 = vector.load %arg9[%c1_38, %c1_39, %c0_40] : memref<18x16x384xbf16, #tpu.memory_space<vmem>>, vector<16x15x128xbf16>
    tpu.vector_store %arg9[%c1_38, %c1_39, %c0_40], %37 {strides = array<i32>} : memref<18x16x384xbf16, #tpu.memory_space<vmem>>, vector<16x15x128xbf16>,
    %cst_41 = arith.constant 0.000000e+00 : bf16
    %39 = vector.broadcast %cst_41 : bf16 to vector<16x1x128xbf16>
    %c1_42 = arith.constant 1 : index
    %c15 = arith.constant 15 : index
    %c256 = arith.constant 256 : index
    %40 = vector.load %arg9[%c1_42, %c15, %c256] : memref<18x16x384xbf16, #tpu.memory_space<vmem>>, vector<16x1x128xbf16>
    tpu.vector_store %arg9[%c1_42, %c15, %c256], %39 {strides = array<i32>} : memref<18x16x384xbf16, #tpu.memory_space<vmem>>, vector<16x1x128xbf16>,
    %41 = vector.extract_strided_slice %29 {offsets = [0, 1, 0], sizes = [16, 15, 128], strides = [1, 1, 1]} : vector<16x16x128xbf16> to vector<16x15x128xbf16>
    %c1_43 = arith.constant 1 : index
    %c0_44 = arith.constant 0 : index
    %c256_45 = arith.constant 256 : index
    %42 = vector.load %arg9[%c1_43, %c0_44, %c256_45] : memref<18x16x384xbf16, #tpu.memory_space<vmem>>, vector<16x15x128xbf16>
    tpu.vector_store %arg9[%c1_43, %c0_44, %c256_45], %41 {strides = array<i32>} : memref<18x16x384xbf16, #tpu.memory_space<vmem>>, vector<16x15x128xbf16>,
    %c0_46 = arith.constant 0 : index
    %c0_47 = arith.constant 0 : index
    %c0_48 = arith.constant 0 : index
    %43 = vector.load %arg9[%c0_46, %c0_47, %c0_48] : memref<18x16x384xbf16, #tpu.memory_space<vmem>>, vector<16x16x384xbf16>
    %44 = vector.shape_cast %43 : vector<16x16x384xbf16> to vector<256x384xbf16>
    %c0_49 = arith.constant 0 : index
    %c0_50 = arith.constant 0 : index
    %c0_51 = arith.constant 0 : index
    %45 = vector.load %arg5[%c0_49, %c0_50, %c0_51] : memref<3x384x128xbf16, #tpu.memory_space<vmem>>, vector<1x384x128xbf16>
    %46 = vector.shape_cast %45 : vector<1x384x128xbf16> to vector<384x128xbf16>
    %cst_52 = arith.constant dense<0.000000e+00> : vector<256x128xf32>
    %47 = tpu.matmul %44, %46, %cst_52 {dimension_numbers = #tpu.dot_dimension_numbers<[1], [0], [0], [1], [0, 0, 1, 1], [], []>} : vector<256x384xbf16>, vector<384x128xbf16>, vector<256x128xf32> -> vector<256x128xf32>
    %c1_53 = arith.constant 1 : index
    %c0_54 = arith.constant 0 : index
    %c0_55 = arith.constant 0 : index
    %48 = vector.load %arg9[%c1_53, %c0_54, %c0_55] : memref<18x16x384xbf16, #tpu.memory_space<vmem>>, vector<16x16x384xbf16>
    %49 = vector.shape_cast %48 : vector<16x16x384xbf16> to vector<256x384xbf16>
    %c1_56 = arith.constant 1 : index
    %c0_57 = arith.constant 0 : index
    %c0_58 = arith.constant 0 : index
    %50 = vector.load %arg5[%c1_56, %c0_57, %c0_58] : memref<3x384x128xbf16, #tpu.memory_space<vmem>>, vector<1x384x128xbf16>
    %51 = vector.shape_cast %50 : vector<1x384x128xbf16> to vector<384x128xbf16>
    %cst_59 = arith.constant dense<0.000000e+00> : vector<256x128xf32>
    %52 = tpu.matmul %49, %51, %cst_59 {dimension_numbers = #tpu.dot_dimension_numbers<[1], [0], [0], [1], [0, 0, 1, 1], [], []>} : vector<256x384xbf16>, vector<384x128xbf16>, vector<256x128xf32> -> vector<256x128xf32>
    %53 = arith.addf %47, %52 : vector<256x128xf32>
    %c2_60 = arith.constant 2 : index
    %c0_61 = arith.constant 0 : index
    %c0_62 = arith.constant 0 : index
    %54 = vector.load %arg9[%c2_60, %c0_61, %c0_62] : memref<18x16x384xbf16, #tpu.memory_space<vmem>>, vector<16x16x384xbf16>
    %55 = vector.shape_cast %54 : vector<16x16x384xbf16> to vector<256x384xbf16>
    %c2_63 = arith.constant 2 : index
    %c0_64 = arith.constant 0 : index
    %c0_65 = arith.constant 0 : index
    %56 = vector.load %arg5[%c2_63, %c0_64, %c0_65] : memref<3x384x128xbf16, #tpu.memory_space<vmem>>, vector<1x384x128xbf16>
    %57 = vector.shape_cast %56 : vector<1x384x128xbf16> to vector<384x128xbf16>
    %cst_66 = arith.constant dense<0.000000e+00> : vector<256x128xf32>
    %58 = tpu.matmul %55, %57, %cst_66 {dimension_numbers = #tpu.dot_dimension_numbers<[1], [0], [0], [1], [0, 0, 1, 1], [], []>} : vector<256x384xbf16>, vector<384x128xbf16>, vector<256x128xf32> -> vector<256x128xf32>
    %59 = arith.addf %53, %58 : vector<256x128xf32>
    %c0_67 = arith.constant 0 : index
    %c0_68 = arith.constant 0 : index
    %60 = vector.load %arg6[%c0_67, %c0_68] : memref<1x128xf32, #tpu.memory_space<vmem>>, vector<1x128xf32>
    %61 = vector.broadcast %60 : vector<1x128xf32> to vector<256x128xf32>
    %62 = arith.mulf %59, %61 : vector<256x128xf32>
    %c0_69 = arith.constant 0 : index
    %c0_70 = arith.constant 0 : index
    %63 = vector.load %arg7[%c0_69, %c0_70] : memref<1x128xf32, #tpu.memory_space<vmem>>, vector<1x128xf32>
    %64 = vector.broadcast %63 : vector<1x128xf32> to vector<256x128xf32>
    %65 = arith.addf %62, %64 : vector<256x128xf32>
    %cst_71 = arith.constant 0.000000e+00 : f32
    %66 = vector.broadcast %cst_71 : f32 to vector<256x128xf32>
    %67 = arith.maximumf %65, %66 : vector<256x128xf32>
    %68 = vector.shape_cast %67 : vector<256x128xf32> to vector<16x16x128xf32>
    %69 = arith.truncf %68 : vector<16x16x128xf32> to vector<16x16x128xbf16>
    %c0_72 = arith.constant 0 : index
    %c0_73 = arith.constant 0 : index
    %c0_74 = arith.constant 0 : index
    %c0_75 = arith.constant 0 : index
    %70 = vector.load %arg8[%c0_72, %c0_73, %c0_74, %c0_75] : memref<1x16x16x128xbf16, #tpu.memory_space<vmem>>, vector<1x16x16x128xbf16>
    %71 = vector.shape_cast %70 : vector<1x16x16x128xbf16> to vector<16x16x128xbf16>
    %72 = vector.shape_cast %69 : vector<16x16x128xbf16> to vector<1x16x16x128xbf16>
    tpu.vector_store %arg8[%c0_72, %c0_73, %c0_74, %c0_75], %72 {strides = array<i32>} : memref<1x16x16x128xbf16, #tpu.memory_space<vmem>>, vector<1x16x16x128xbf16>,
    return
  }
  func.func @transform_0(%arg0: i32) -> (i32, i32, i32, i32) {
    %c0_i32 = arith.constant 0 : i32
    %c0_i32_0 = arith.constant 0 : i32
    %c0_i32_1 = arith.constant 0 : i32
    %c0_i32_2 = arith.constant 0 : i32
    return %arg0, %c0_i32, %c0_i32_0, %c0_i32_1 : i32, i32, i32, i32
  }
  func.func @transform_1(%arg0: i32) -> (i32, i32, i32) {
    %c0_i32 = arith.constant 0 : i32
    %c0_i32_0 = arith.constant 0 : i32
    %c0_i32_1 = arith.constant 0 : i32
    %c0_i32_2 = arith.constant 0 : i32
    return %c0_i32, %c0_i32_0, %c0_i32_1 : i32, i32, i32
  }
  func.func @transform_2(%arg0: i32) -> (i32, i32) {
    %c0_i32 = arith.constant 0 : i32
    %c0_i32_0 = arith.constant 0 : i32
    %c0_i32_1 = arith.constant 0 : i32
    return %c0_i32, %c0_i32_0 : i32, i32
  }
  func.func @transform_3(%arg0: i32) -> (i32, i32) {
    %c0_i32 = arith.constant 0 : i32
    %c0_i32_0 = arith.constant 0 : i32
    %c0_i32_1 = arith.constant 0 : i32
    return %c0_i32, %c0_i32_0 : i32, i32
  }
  func.func @transform_4(%arg0: i32) -> (i32, i32, i32) {
    %c0_i32 = arith.constant 0 : i32
    %c0_i32_0 = arith.constant 0 : i32
    %c0_i32_1 = arith.constant 0 : i32
    %c0_i32_2 = arith.constant 0 : i32
    return %c0_i32, %c0_i32_0, %c0_i32_1 : i32, i32, i32
  }
  func.func @transform_5(%arg0: i32) -> (i32, i32) {
    %c0_i32 = arith.constant 0 : i32
    %c0_i32_0 = arith.constant 0 : i32
    %c0_i32_1 = arith.constant 0 : i32
    return %c0_i32, %c0_i32_0 : i32, i32
  }
  func.func @transform_6(%arg0: i32) -> (i32, i32) {
    %c0_i32 = arith.constant 0 : i32
    %c0_i32_0 = arith.constant 0 : i32
    %c0_i32_1 = arith.constant 0 : i32
    return %c0_i32, %c0_i32_0 : i32, i32
  }
  func.func @transform_7(%arg0: i32) -> (i32, i32, i32, i32) {
    %c0_i32 = arith.constant 0 : i32
    %c0_i32_0 = arith.constant 0 : i32
    %c0_i32_1 = arith.constant 0 : i32
    %c0_i32_2 = arith.constant 0 : i32
    return %arg0, %c0_i32, %c0_i32_0, %c0_i32_1 : i32, i32, i32, i32
  }
}

</mosaic_0001>

<bundles_post_ra>
// kernel: up_forward.1
= control target key start
LH: loop header
LB: loop body
LE: loop exit
PB: predicated region body
PF: predicated region fallthrough
CT: control target
= control target key end

     0   :  { %s7923_s24 = smov 0   ;;  %s9709_s0 = inlined_call_operand.vmem [shape: bf16[2,18,16,384], index: 0, kind: input, shape index: {}]   ;;  %s9710_s1 = inlined_call_operand.vmem [shape: bf16[3,384,128], index: 1, kind: input, shape index: {}]   ;;  %s9711_s2 = inlined_call_operand.vmem [shape: f32[1,128], index: 2, kind: input, shape index: {}]   ;;  %s9712_s3 = inlined_call_operand.vmem [shape: f32[1,128], index: 3, kind: input, shape index: {}]   ;;  %s9713_s4 = inlined_call_operand.vmem [shape: bf16[3,384,128], index: 4, kind: input, shape index: {}]   ;;  %s9714_s5 = inlined_call_operand.vmem [shape: f32[1,128], index: 5, kind: input, shape index: {}]   ;;  %s9715_s6 = inlined_call_operand.vmem [shape: f32[1,128], index: 6, kind: input, shape index: {}]   ;;  %s9716_s7 = inlined_call_operand.vmem [shape: bf16[2,16,16,128], index: 7, kind: output, shape index: {}]  }
   0x1 LB: > { %s5393_s25 = sadd.s32 4294967295, %s7880_s24   ;;  %p5397_p0 = scmp.ge.s32.totalorder %s7880_s24, 1  ;;  %s7880_s24 = sphi %s7923_s24, %s17_s24  }
   0x2   : > { %p237_p1 = scmp.lt.s32.totalorder %s7880_s24, 3 }
   0x4   : > { %p238_p2 = pnand %p5397_p0, %p237_p1 }
   0x6   : > { %241 = sbr.rel (%p238_p2) target bundleno = 1076 (0x434), region = 48 }
   0xd   : > { %v7609_v0 = vld [vmem:[%s9710_s1 + $0x100] sm:$0xff]   ;;  %v7613_v4 = vld [vmem:[%s9710_s1 + $0x108] sm:$0xff]   ;;  %v7617_v8 = vld [vmem:[%s9710_s1 + $0x110] sm:$0xff]   ;;  %p269_p3 = scmp.lt.s32.totalorder %s5393_s25, 1  ;;  %vm2968_vm0 = vcmask 1040384   ;;  %vm3198_vm2 = vcmask 1047559  }
   0xe   : > { %v7610_v1 = vld [vmem:[%s9710_s1 + $0xc0] sm:$0xff]   ;;  %6175 = vmatprep.subr.bf16.mxu0 %v7609_v0  ;;  %v7614_v5 = vld [vmem:[%s9710_s1 + $0xc8] sm:$0xff]   ;;  %v7618_v9 = vld [vmem:[%s9710_s1 + $0xd0] sm:$0xff]   ;;  %vm2969_vm1 = vsmask.f32 256  ;;  %vm3147_vm6 = vcmask 1047552  }
   0xf   : > { %v7611_v2 = vld [vmem:[%s9710_s1 + $0x40] sm:$0xff]   ;;  %6176 = vmatpush3.bf16.msra.mxu0 %v7610_v1  ;;  %v7615_v6 = vld [vmem:[%s9710_s1 + $0x48] sm:$0xff]   ;;  %v7619_v10 = vld [vmem:[%s9710_s1 + $0x50] sm:$0xff]   ;;  %s9758_s25 = smov (!%p269_p3, %s5393_s25), 1  ;;  %vm3199_vm3 = vsmask.f32 7966 }
  0x10   : > { %v7612_v3 = vld [vmem:[%s9710_s1] sm:$0xff]   ;;  %6311 = vmatprep.subr.bf16.mxu1 %v7611_v2  ;;  %6177 = vmatprep.subr.bf16.mxu0 %v7613_v4  ;;  %v7616_v7 = vld [vmem:[%s9710_s1 + $0x8] sm:$0xff]   ;;  %v7620_v11 = vld [vmem:[%s9710_s1 + $0x10] sm:$0xff]   ;;  %s7599_s13 = smul.u32 432, %s9758_s25  ;;  %vm3148_vm7 = vsmask.f32 7938 }
  0x11   : > { %6312 = vmatpush3.bf16.msra.mxu1 %v7612_v3  ;;  %v7621_v12 = vld [vmem:[%s9710_s1 + $0x118] sm:$0xff]   ;;  %v7625_v16 = vld [vmem:[%s9710_s1 + $0x120] sm:$0xff]   ;;  %v7629_v20 = vld [vmem:[%s9710_s1 + $0x128] sm:$0xff]   ;;  %vm3297_vm8 = vsmask.f32 7424  ;;  %s6047_s18 = sshll.u32 %s9758_s25, 7 }
  0x12   : > { %6313 = vmatprep.subr.bf16.mxu1 %v7615_v6  ;;  %v7622_v13 = vld [vmem:[%s9710_s1 + $0xd8] sm:$0xff]   ;;  %v7626_v17 = vld [vmem:[%s9710_s1 + $0xe0] sm:$0xff]   ;;  %v7630_v21 = vld [vmem:[%s9710_s1 + $0xe8] sm:$0xff]   ;;  %s8031_s26 = scalar_lea.vmem %s9709_s0, %s7599_s13  ;;  %s9605_s21 = scalar_lea.vmem %s9716_s7, %s6047_s18 }
  0x13   : > { %6178 = vmatpush3.bf16.msra.mxu0 %v7614_v5  ;;  %v7623_v14 = vld [vmem:[%s9710_s1 + $0x58] sm:$0xff]   ;;  %v7627_v18 = vld [vmem:[%s9710_s1 + $0x60] sm:$0xff]   ;;  %v7631_v22 = vld [vmem:[%s9710_s1 + $0x68] sm:$0xff]  }
  0x14   : > { %6179 = vmatprep.subr.bf16.mxu0 %v7617_v8  ;;  %v7624_v15 = vld [vmem:[%s9710_s1 + $0x18] sm:$0xff]   ;;  %v7628_v19 = vld [vmem:[%s9710_s1 + $0x20] sm:$0xff]   ;;  %v7632_v23 = vld [vmem:[%s9710_s1 + $0x28] sm:$0xff]  }
  0x15   : > { %6314 = vmatpush3.bf16.msra.mxu1 %v7616_v7  ;;  %v7633_v24 = vld [vmem:[%s9710_s1 + $0x130] sm:$0xff]   ;;  %v7637_v28 = vld [vmem:[%s9710_s1 + $0x138] sm:$0xff]   ;;  %v7644_v34 = vld [vmem:[%s9710_s1 + $0x140] sm:$0xff]  }
  0x16   : > { %6315 = vmatprep.subr.bf16.mxu1 %v7619_v10  ;;  %v7634_v25 = vld [vmem:[%s9710_s1 + $0xf0] sm:$0xff]   ;;  %v7638_v29 = vld [vmem:[%s9710_s1 + $0xf8] sm:$0xff]   ;;  %v7645_v35 = vld [vmem:[%s8031_s26] ss:$12 sps:$4 sm:$0xff]  }
  0x17   : > { %6180 = vmatpush3.bf16.msra.mxu0 %v7618_v9  ;;  %v7635_v26 = vld [vmem:[%s9710_s1 + $0x70] sm:$0xff]   ;;  %v7639_v30 = vld [vmem:[%s9710_s1 + $0x78] sm:$0xff]   ;;  %v7654_v38 = vld [vmem:[%s9710_s1 + $0x148] sm:$0xff]  }
  0x18   : > { %6181 = vmatprep.subr.bf16.mxu0 %v7621_v12  ;;  %v7636_v27 = vld [vmem:[%s9710_s1 + $0x30] sm:$0xff]   ;;  %v7640_v31 = vld [vmem:[%s9710_s1 + $0x38] sm:$0xff]   ;;  %v7675_v45 = vld [vmem:[%s9710_s1 + $0x160] sm:$0xff]  }
  0x19   : > { %6316 = vmatpush3.bf16.msra.mxu1 %v7620_v11  ;;  %v7641_v32 = vld [vmem:[%s8031_s26 + $0x18] ss:$12 sps:$4 sm:$0xff]   ;;  %v7643_v33 = vld [vmem:[%s8031_s26 + $0x1c] ss:$12 sps:$4 sm:$0xff]   ;;  %v7648_v37 = vld [vmem:[%s8031_s26 + $0x34] ss:$12 sps:$4 sm:$0xff]  }
  0x1a   : > { %6317 = vmatprep.subr.bf16.mxu1 %v7623_v14  ;;  %938 = vmatprep.mubr.bf16.mxu0 %v7643_v33  ;;  %v7647_v36 = vld [vmem:[%s8031_s26 + $0x4] ss:$12 sps:$4 sm:$0xff]   ;;  %v7651_v40 = vld [vmem:[%s8031_s26 + $0x4c] ss:$12 sps:$4 sm:$0xff]   ;;  %v7653_v43 = vld [vmem:[%s8031_s26 + $0x48] ss:$12 sps:$4 sm:$0xff]  }
  0x1b   : > { %6182 = vmatpush3.bf16.msra.mxu0 %v7622_v13  ;;  %1660 = vmatprep.mubr.bf16.mxu1 %v7647_v36  ;;  %v7650_v39 = vld [vmem:[%s8031_s26 + $0x30] ss:$12 sps:$4 sm:$0xff]   ;;  %v7676_v46 = vld [vmem:[%s9710_s1 + $0x80] sm:$0xff]   ;;  %v7683_v47 = vld [vmem:[%s9710_s1 + $0x168] sm:$0xff]  }
  0x1c   : > { %6183 = vmatprep.subr.bf16.mxu0 %v7625_v16  ;;  %v7661_v41 = vld [vmem:[%s9710_s1 + $0x150] sm:$0xff]   ;;  %v7668_v42 = vld [vmem:[%s9710_s1 + $0x158] sm:$0xff]   ;;  %v7684_v48 = vld [vmem:[%s9710_s1 + $0x88] sm:$0xff]  }
  0x1d   : > { %6318 = vmatpush3.bf16.msra.mxu1 %v7624_v15  ;;  %v7655_v44 = vld [vmem:[%s8031_s26 + $0x64] ss:$12 sps:$4 sm:$0xff]   ;;  %v7657_v49 = vld [vmem:[%s8031_s26 + $0x60] ss:$12 sps:$4 sm:$0xff]   ;;  %v7658_v50 = vld [vmem:[%s8031_s26 + $0x7c] ss:$12 sps:$4 sm:$0xff]  }
  0x1e   : > { %6319 = vmatprep.subr.bf16.mxu1 %v7627_v18  ;;  %v7691_v51 = vld [vmem:[%s9710_s1 + $0x170] sm:$0xff]   ;;  %v7696_v53 = vld [vmem:[%s9710_s1 + $0x98] sm:$0xff]   ;;  %v7701_v57 = vld [vmem:[%s9710_s1 + $0xa0] sm:$0xff]  }
  0x1f   : > { %6184 = vmatpush3.bf16.msra.mxu0 %v7626_v17  ;;  %v7692_v52 = vld [vmem:[%s9710_s1 + $0x90] sm:$0xff]   ;;  %v7660_v54 = vld [vmem:[%s8031_s26 + $0x78] ss:$12 sps:$4 sm:$0xff]   ;;  %v7702_v58 = vld [vmem:[%s9710_s1 + $0xa8] sm:$0xff]  }
  0x20   : > { %6185 = vmatprep.subr.bf16.mxu0 %v7629_v20  ;;  %v7662_v55 = vld [vmem:[%s8031_s26 + $0x94] ss:$12 sps:$4 sm:$0xff]   ;;  %v7700_v56 = vld [vmem:[%s9710_s1 + $0x178] sm:$0xff]   ;;  %v7669_v1 = vld [vmem:[%s8031_s26 + $0xc4] ss:$12 sps:$4 sm:$0xff]  }
  0x21   : > { %6320 = vmatpush3.bf16.msra.mxu1 %v7628_v19  ;;  %v7664_v59 = vld [vmem:[%s8031_s26 + $0x90] ss:$12 sps:$4 sm:$0xff]   ;;  %v7665_v60 = vld [vmem:[%s8031_s26 + $0xac] ss:$12 sps:$4 sm:$0xff]   ;;  %v7711_v62 = vld [vmem:[%s9710_s1 + $0x1c0] sm:$0xff]  }
  0x22   : > { %6321 = vmatprep.subr.bf16.mxu1 %v7631_v22  ;;  %v7706_v61 = vld [vmem:[%s9710_s1 + $0xb0] sm:$0xff]   ;;  %v7707_v63 = vld [vmem:[%s9710_s1 + $0xb8] sm:$0xff]   ;;  %v8108_v2 = vld [vmem:[%s8031_s26 + $0xc0] ss:$12 sps:$4 sm:$0xff]  }
  0x23   : > { %6186 = vmatpush3.bf16.msra.mxu0 %v7630_v21  ;;  %v7667_v0 = vld [vmem:[%s8031_s26 + $0xa8] ss:$12 sps:$4 sm:$0xff]   ;;  %v8116_v4 = vld [vmem:[%s8031_s26 + $0xd8] ss:$12 sps:$4 sm:$0xff]   ;;  %v8132_v7 = vld [vmem:[%s8031_s26 + $0xf0] ss:$12 sps:$4 sm:$0xff]  }
  0x24   : > { %6187 = vmatprep.subr.bf16.mxu0 %v7633_v24  ;;  %v8111_v3 = vld [vmem:[%s8031_s26 + $0xdc] ss:$12 sps:$4 sm:$0xff]   ;;  %v8119_v5 = vld [vmem:[%s8031_s26 + $0xf4] ss:$12 sps:$4 sm:$0xff]   ;;  %v8135_v8 = vld [vmem:[%s8031_s26 + $0x10c] ss:$12 sps:$4 sm:$0xff]  }
  0x25   : > { %6322 = vmatpush3.bf16.msra.mxu1 %v7632_v23  ;;  %v8126_v6 = vld [vmem:[%s9710_s1 + $0x200] sm:$0xff]   ;;  %v8142_v9 = vld [vmem:[%s8031_s26 + $0x108] ss:$12 sps:$4 sm:$0xff]   ;;  %v8171_v15 = vld [vmem:[%s8031_s26 + $0x150] ss:$12 sps:$4 sm:$0xff]  }
  0x26   : > { %6323 = vmatprep.subr.bf16.mxu1 %v7635_v26  ;;  %v8145_v10 = vld [vmem:[%s8031_s26 + $0x124] ss:$12 sps:$4 sm:$0xff]   ;;  %v8152_v11 = vld [vmem:[%s8031_s26 + $0x120] ss:$12 sps:$4 sm:$0xff]   ;;  %v8155_v12 = vld [vmem:[%s8031_s26 + $0x13c] ss:$12 sps:$4 sm:$0xff]  }
  0x27   : > { %6188 = vmatpush3.bf16.msra.mxu0 %v7634_v25  ;;  %v8162_v13 = vld [vmem:[%s8031_s26 + $0x138] ss:$12 sps:$4 sm:$0xff]   ;;  %v8165_v14 = vld [vmem:[%s8031_s26 + $0x154] ss:$12 sps:$4 sm:$0xff]   ;;  %v7714_v24 = vld [vmem:[%s8031_s26 + $0x50] ss:$12 sps:$4 sm:$0xff]  }
  0x28   : > { %6189 = vmatprep.subr.bf16.mxu0 %v7637_v28  ;;  %v8175_v16 = vld [vmem:[%s8031_s26 + $0x16c] ss:$12 sps:$4 sm:$0xff]   ;;  %v7699_v17 = vld [vmem:[%s8031_s26 + $0x168] ss:$12 sps:$4 sm:$0xff]   ;;  %v7703_v18 = vld [vmem:[%s8031_s26 + $0x184] ss:$12 sps:$4 sm:$0xff]  }
  0x29   : > { %6324 = vmatpush3.bf16.msra.mxu1 %v7636_v27  ;;  %v7705_v19 = vld [vmem:[%s8031_s26 + $0x180] ss:$12 sps:$4 sm:$0xff]   ;;  %v7710_v21 = vld [vmem:[%s8031_s26 + $0x8] ss:$12 sps:$4 sm:$0xff]   ;;  %v7709_v22 = vld [vmem:[%s8031_s26 + $0x38] ss:$12 sps:$4 sm:$0xff]  }
  0x2a   : > { %6325 = vmatprep.subr.bf16.mxu1 %v7639_v30  ;;  %v7708_v20 = vld [vmem:[%s8031_s26 + $0x20] ss:$12 sps:$4 sm:$0xff]   ;;  %v7716_v27 = vld [vmem:[%s8031_s26 + $0x38] ss:$12 sps:$4 sm:$0xff]   ;;  %v7723_v30 = vld [vmem:[%s9710_s1 + $0x1d0] sm:$0xff]  }
  0x2b   : > { %6190 = vmatpush3.bf16.msra.mxu0 %v7638_v29  ;;  %v7713_v23 = vld [vmem:[%s9710_s1 + $0x180] sm:$0xff]   ;;  %v7717_v26 = vld [vmem:[%s9710_s1 + $0x1c8] sm:$0xff]   ;;  %v7729_v36 = vld [vmem:[%s9710_s1 + $0x1d8] sm:$0xff]  }
  0x2c   : > { %6991 = vmatprep.subr.bf16.mxu0 %v7644_v34  ;;  %v7712_v25 = vld [vmem:[%s8031_s26 + $0x20] ss:$12 sps:$4 sm:$0xff]   ;;  %vm8456_vm4 = vmand %vm2968_vm0, %vm2969_vm1 }
  0x2d   : > { %6326 = vmatpush3.bf16.msra.mxu1 %v7640_v31  ;;  %v7739_v28 = vld [vmem:[%s9710_s1 + $0x208] sm:$0xff]   ;;  %vm8462_vm5 = vmand %vm3198_vm2, %vm3199_vm3 }
  0x2e   : > { %939 = vmatmul.mubr.bf16.vlgmr.msra.gmra.mrb[0].mxu0 %v7641_v32  ;;  %7039 = vmatprep.subr.bf16.mxu1 %v7676_v46  ;;  %v7719_v29 = vld [vmem:[%s9710_s1 + $0x188] sm:$0xff]   ;;  %vm8773_vm9 = vmand %vm3147_vm6, %vm3148_vm7 }
  0x2f   : > { %6992 = vmatpush3.bf16.msra.mxu0 %v7644_v34  ;;  %946 = vmatprep.mubr.bf16.mxu0 %v7648_v37  ;;  %v7715_v31 = vld [vmem:[%s8031_s26 + $0x68] ss:$12 sps:$4 sm:$0xff]   ;;  %vm8782_vm10 = vmand %vm3147_vm6, %vm3297_vm8 }
  0x30   : > { %1661 = vmatmul.mubr.bf16.vlgmr.msra.gmra.mrb[0].mxu1 %v7645_v35  ;;  %6993 = vmatprep.subr.bf16.mxu0 %v7654_v38  ;;  %v7725_v34 = vld [vmem:[%s9710_s1 + $0x190] sm:$0xff]  }
  0x31   : > { %1668 = vmatprep.mubr.bf16.mxu1 %v7643_v33  ;;  %7040 = vmatpush3.bf16.msra.mxu1 %v7676_v46  ;;  %v7720_v33 = vld [vmem:[%s8031_s26 + $0x80] ss:$12 sps:$4 sm:$0xff]   ;;  %v7718_v35 = vld [vmem:[%s8031_s26 + $0x50] ss:$12 sps:$4 sm:$0xff]  }
  0x32   : > { %7041 = vmatprep.subr.bf16.mxu1 %v7684_v48  ;;  %v7743_v46 = vld [vmem:[%s9710_s1 + $0x1e8] sm:$0xff]  }
  0x33   : > { %6994 = vmatpush3.bf16.msra.mxu0 %v7654_v38  ;;  %v7747_v38 = vld [vmem:[%s9710_s1 + $0x218] sm:$0xff]  }
  0x34   : > { %6995 = vmatprep.subr.bf16.mxu0 %v7661_v41 }
  0x35   : > { %7042 = vmatpush3.bf16.msra.mxu1 %v7684_v48  ;;  %v7755_v48 = vld [vmem:[%s9710_s1 + $0x228] sm:$0xff]  }
  0x36   : > { %947 = vmatmul.mubr.bf16.gmra.mrb[4].mxu0 %v7650_v39  ;;  %7043 = vmatprep.subr.bf16.mxu1 %v7692_v52 }
  0x37   : > { %954 = vmatprep.mubr.bf16.mxu0 %v7651_v40  ;;  %6996 = vmatpush3.bf16.msra.mxu0 %v7661_v41  ;;  %v7721_v41 = vld [vmem:[%s8031_s26 + $0x98] ss:$12 sps:$4 sm:$0xff]  }
  0x38   : > { %1669 = vmatmul.mubr.bf16.gmra.mrb[4].mxu1 %v7641_v32  ;;  %6997 = vmatprep.subr.bf16.mxu0 %v7668_v42  ;;  %v7746_v32 = vld [vmem:[%s9710_s1 + $0x210] sm:$0xff]  }
  0x39   : > { %1676 = vmatprep.mubr.bf16.mxu1 %v7648_v37  ;;  %7044 = vmatpush3.bf16.msra.mxu1 %v7692_v52  ;;  %v7722_v37 = vld [vmem:[%s8031_s26 + $0x68] ss:$12 sps:$4 sm:$0xff]  }
  0x3a   : > { %7045 = vmatprep.subr.bf16.mxu1 %v7696_v53  ;;  %v7762_v52 = vld [vmem:[%s9710_s1 + $0x230] sm:$0xff]  }
  0x3b   : > { %6998 = vmatpush3.bf16.msra.mxu0 %v7668_v42  ;;  %v7754_v42 = vld [vmem:[%s9710_s1 + $0x220] sm:$0xff]  }
  0x3c   : > { %6999 = vmatprep.subr.bf16.mxu0 %v7675_v45 }
  0x3d   : > { %7046 = vmatpush3.bf16.msra.mxu1 %v7696_v53  ;;  %v7732_v53 = vld [vmem:[%s8031_s26 + $0xe0] ss:$12 sps:$4 sm:$0xff]  }
  0x3e   : > { %955 = vmatmul.mubr.bf16.gmra.mrb[8].mxu0 %v7653_v43  ;;  %7047 = vmatprep.subr.bf16.mxu1 %v7701_v57 }
  0x3f   : > { %962 = vmatprep.mubr.bf16.mxu0 %v7655_v44  ;;  %7000 = vmatpush3.bf16.msra.mxu0 %v7675_v45  ;;  %v7724_v45 = vld [vmem:[%s8031_s26 + $0x80] ss:$12 sps:$4 sm:$0xff]  }
  0x40   : > { %1677 = vmatmul.mubr.bf16.gmra.mrb[8].mxu1 %v7650_v39  ;;  %7001 = vmatprep.subr.bf16.mxu0 %v7683_v47  ;;  %v7731_v39 = vld [vmem:[%s9710_s1 + $0x198] sm:$0xff]  }
  0x41   : > { %1684 = vmatprep.mubr.bf16.mxu1 %v7651_v40  ;;  %7048 = vmatpush3.bf16.msra.mxu1 %v7701_v57  ;;  %v7735_v40 = vld [vmem:[%s9710_s1 + $0x1e0] sm:$0xff]   ;;  %v7734_v57 = vld [vmem:[%s8031_s26 + $0xc8] ss:$12 sps:$4 sm:$0xff]  }
  0x42   : > { %7049 = vmatprep.subr.bf16.mxu1 %v7702_v58 }
  0x43   : > { %7002 = vmatpush3.bf16.msra.mxu0 %v7683_v47  ;;  %v7728_v47 = vld [vmem:[%s8031_s26 + $0x98] ss:$12 sps:$4 sm:$0xff]  }
  0x44   : > { %7003 = vmatprep.subr.bf16.mxu0 %v7691_v51 }
  0x45   : > { %7050 = vmatpush3.bf16.msra.mxu1 %v7702_v58  ;;  %v7763_v58 = vld [vmem:[%s9710_s1 + $0x238] sm:$0xff]  }
  0x46   : > { %963 = vmatmul.mubr.bf16.gmra.mrb[12].mxu0 %v7657_v49  ;;  %7051 = vmatprep.subr.bf16.mxu1 %v7706_v61 }
  0x47   : > { %970 = vmatprep.mubr.bf16.mxu0 %v7658_v50  ;;  %7004 = vmatpush3.bf16.msra.mxu0 %v7691_v51  ;;  %v7727_v51 = vld [vmem:[%s8031_s26 + $0xc8] ss:$12 sps:$4 sm:$0xff]  }
  0x48   : > { %1685 = vmatmul.mubr.bf16.gmra.mrb[12].mxu1 %v7653_v43  ;;  %7005 = vmatprep.subr.bf16.mxu0 %v7700_v56  ;;  %v7726_v43 = vld [vmem:[%s8031_s26 + $0xb0] ss:$12 sps:$4 sm:$0xff]  }
  0x49   : > { %1692 = vmatprep.mubr.bf16.mxu1 %v7655_v44  ;;  %7052 = vmatpush3.bf16.msra.mxu1 %v7706_v61  ;;  %v7737_v44 = vld [vmem:[%s9710_s1 + $0x1a0] sm:$0xff]   ;;  %v7740_v61 = vld [vmem:[%s8031_s26 + $0x110] ss:$12 sps:$4 sm:$0xff]  }
  0x4a   : > { %7053 = vmatprep.subr.bf16.mxu1 %v7707_v63 }
  0x4b   : > { %7006 = vmatpush3.bf16.msra.mxu0 %v7700_v56  ;;  %v7759_v56 = vld [vmem:[%s9710_s1 + $0x1f8] sm:$0xff]  }
  0x4c   : > { %6447 = vmatprep.subr.bf16.mxu0 %v7711_v62  ;;  %v7736_v62 = vld [vmem:[%s8031_s26 + $0xe0] ss:$12 sps:$4 sm:$0xff]  }
  0x4d   : > { %7054 = vmatpush3.bf16.msra.mxu1 %v7707_v63  ;;  %v7742_v63 = vld [vmem:[%s8031_s26 + $0xf8] ss:$12 sps:$4 sm:$0xff]  }
  0x4e   : > { %971 = vmatmul.mubr.bf16.gmra.mrb[16].mxu0 %v7660_v54  ;;  %7087 = vmatprep.subr.bf16.mxu1 %v8126_v6 }
  0x4f   : > { %978 = vmatprep.mubr.bf16.mxu0 %v7662_v55 }
  0x50   : > { %1693 = vmatmul.mubr.bf16.gmra.mrb[16].mxu1 %v7657_v49  ;;  %v7745_v49 = vld [vmem:[%s9710_s1 + $0x1a8] sm:$0xff]  }
  0x51   : > { %1700 = vmatprep.mubr.bf16.mxu1 %v7658_v50  ;;  %v7751_v50 = vld [vmem:[%s9710_s1 + $0x1f0] sm:$0xff]  }
  0x56   : > { %979 = vmatmul.mubr.bf16.gmra.mrb[20].mxu0 %v7664_v59 }
  0x57   : > { %986 = vmatprep.mubr.bf16.mxu0 %v7665_v60 }
  0x58   : > { %1701 = vmatmul.mubr.bf16.gmra.mrb[20].mxu1 %v7660_v54  ;;  %v7753_v54 = vld [vmem:[%s9710_s1 + $0x1b0] sm:$0xff]  }
  0x59   : > { %1708 = vmatprep.mubr.bf16.mxu1 %v7662_v55  ;;  %v7730_v55 = vld [vmem:[%s8031_s26 + $0xb0] ss:$12 sps:$4 sm:$0xff]  }
  0x5e   : > { %987 = vmatmul.mubr.bf16.gmra.mrb[24].mxu0 %v7667_v0 }
  0x5f   : > { %994 = vmatprep.mubr.bf16.mxu0 %v7669_v1 }
  0x60   : > { %1709 = vmatmul.mubr.bf16.gmra.mrb[24].mxu1 %v7664_v59  ;;  %v7761_v59 = vld [vmem:[%s9710_s1 + $0x1b8] sm:$0xff]  }
  0x61   : > { %1716 = vmatprep.mubr.bf16.mxu1 %v7665_v60  ;;  %v7733_v60 = vld [vmem:[%s8031_s26 + $0xf8] ss:$12 sps:$4 sm:$0xff]  }
  0x66   : > { %995 = vmatmul.mubr.bf16.gmra.mrb[28].mxu0 %v8108_v2 }
  0x67   : > { %1002 = vmatprep.mubr.bf16.mxu0 %v8111_v3 }
  0x68   : > { %1717 = vmatmul.mubr.bf16.gmra.mrb[28].mxu1 %v7667_v0  ;;  %v7741_v0 = vld [vmem:[%s8031_s26 + $0x128] ss:$12 sps:$4 sm:$0xff]  }
  0x69   : > { %1724 = vmatprep.mubr.bf16.mxu1 %v7669_v1  ;;  %v7748_v1 = vld [vmem:[%s8031_s26 + $0x140] ss:$12 sps:$4 sm:$0xff]  }
  0x6e   : > { %1003 = vmatmul.mubr.bf16.gmra.mrb[32].mxu0 %v8116_v4 }
  0x6f   : > { %1010 = vmatprep.mubr.bf16.mxu0 %v8119_v5 }
  0x70   : > { %1725 = vmatmul.mubr.bf16.gmra.mrb[32].mxu1 %v8108_v2 }
  0x71   : > { %1732 = vmatprep.mubr.bf16.mxu1 %v8111_v3 }
  0x76   : > { %1011 = vmatmul.mubr.bf16.gmra.mrb[36].mxu0 %v8132_v7 }
  0x77   : > { %1018 = vmatprep.mubr.bf16.mxu0 %v8135_v8 }
  0x78   : > { %1733 = vmatmul.mubr.bf16.gmra.mrb[36].mxu1 %v8116_v4 }
  0x79   : > { %1740 = vmatprep.mubr.bf16.mxu1 %v8119_v5 }
  0x7e   : > { %1019 = vmatmul.mubr.bf16.gmra.mrb[40].mxu0 %v8142_v9 }
  0x7f   : > { %1026 = vmatprep.mubr.bf16.mxu0 %v8145_v10 }
  0x80   : > { %1741 = vmatmul.mubr.bf16.gmra.mrb[40].mxu1 %v8132_v7 }
  0x81   : > { %1748 = vmatprep.mubr.bf16.mxu1 %v8135_v8 }
  0x86   : > { %1027 = vmatmul.mubr.bf16.gmra.mrb[44].mxu0 %v8152_v11 }
  0x87   : > { %1034 = vmatprep.mubr.bf16.mxu0 %v8155_v12 }
  0x88   : > { %1749 = vmatmul.mubr.bf16.gmra.mrb[44].mxu1 %v8142_v9 }
  0x89   : > { %1756 = vmatprep.mubr.bf16.mxu1 %v8145_v10 }
  0x8e   : > { %1035 = vmatmul.mubr.bf16.gmra.mrb[48].mxu0 %v8162_v13 }
  0x8f   : > { %1042 = vmatprep.mubr.bf16.mxu0 %v8165_v14 }
  0x90   : > { %1757 = vmatmul.mubr.bf16.gmra.mrb[48].mxu1 %v8152_v11 }
  0x91   : > { %1764 = vmatprep.mubr.bf16.mxu1 %v8155_v12 }
  0x96   : > { %1043 = vmatmul.mubr.bf16.gmra.mrb[52].mxu0 %v8171_v15 }
  0x97   : > { %1050 = vmatprep.mubr.bf16.mxu0 %v8175_v16 }
  0x98   : > { %1765 = vmatmul.mubr.bf16.gmra.mrb[52].mxu1 %v8162_v13 }
  0x99   : > { %1772 = vmatprep.mubr.bf16.mxu1 %v8165_v14 }
  0x9e   : > { %1051 = vmatmul.mubr.bf16.gmra.mrb[56].mxu0 %v7699_v17 }
  0x9f   : > { %1058 = vmatprep.mubr.bf16.mxu0 %v7703_v18  ;;  %v7749_v18 = vld [vmem:[%s8031_s26 + $0x158] ss:$12 sps:$4 sm:$0xff]  }
  0xa0   : > { %1773 = vmatmul.mubr.bf16.gmra.mrb[56].mxu1 %v8171_v15 }
  0xa1   : > { %1780 = vmatprep.mubr.bf16.mxu1 %v8175_v16 }
  0xa6   : > { %1059 = vmatmul.mubr.bf16.gmra.mrb[60].mxu0 %v7705_v19  ;;  %v7756_v19 = vld [vmem:[%s8031_s26 + $0x170] ss:$12 sps:$4 sm:$0xff]  }
  0xa7   : > { %7007 = vmatprep.mubr.bf16.mxu0 %v7708_v20  ;;  %v7752_v20 = vld [vmem:[%s8031_s26 + $0x140] ss:$12 sps:$4 sm:$0xff]  }
  0xa8   : > { %1781 = vmatmul.mubr.bf16.gmra.mrb[60].mxu1 %v7699_v17  ;;  %v7750_v17 = vld [vmem:[%s8031_s26 + $0x128] ss:$12 sps:$4 sm:$0xff]  }
  0xa9   : > { %7055 = vmatprep.mubr.bf16.mxu1 %v7710_v21  ;;  %v7758_v21 = vld [vmem:[%s8031_s26 + $0x158] ss:$12 sps:$4 sm:$0xff]  }
  0xae   : > { %7008 = vmatmul.mubr.bf16.vlgmr.msra.gmra.mrb[64].mxu0 %v7709_v22  ;;  %v7757_v22 = vld [vmem:[%s8031_s26 + $0x188] ss:$12 sps:$4 sm:$0xff]  }
  0xaf   : > { %6448 = vmatpush3.bf16.msra.mxu0 %v7713_v23  ;;  %7011 = vmatprep.mubr.bf16.mxu0 %v7714_v24  ;;  %v7760_v23 = vld [vmem:[%s8031_s26 + $0x170] ss:$12 sps:$4 sm:$0xff]   ;;  %v7764_v24 = vld [vmem:[%s8031_s26 + $0x38] ss:$12 sps:$4 sm:$0xff]  }
  0xb0   : > { %7056 = vmatmul.mubr.bf16.vlgmr.msra.gmra.mrb[64].mxu1 %v7712_v25  ;;  %6449 = vmatprep.subr.bf16.mxu0 %v7717_v26  ;;  %v7855_v25 = vld [vmem:[%s8031_s26 + $0x34] ss:$12 sps:$4 sm:$0xff]   ;;  %v7765_v26 = vld [vmem:[%s8031_s26 + $0x50] ss:$12 sps:$4 sm:$0xff]  }
  0xb1   : > { %7059 = vmatprep.mubr.bf16.mxu1 %v7716_v27  ;;  %7088 = vmatpush3.bf16.msra.mxu1 %v8126_v6  ;;  %v7744_v6 = vld [vmem:[%s8031_s26 + $0x110] ss:$12 sps:$4 sm:$0xff]   ;;  %v7766_v27 = vld [vmem:[%s8031_s26 + $0x68] ss:$12 sps:$4 sm:$0xff]  }
  0xb2   : > { %7089 = vmatprep.subr.bf16.mxu1 %v7739_v28 }
  0xb3   : > { %6450 = vmatpush3.bf16.msra.mxu0 %v7719_v29  ;;  %v7857_v29 = vld [vmem:[%s8031_s26 + $0x4c] ss:$12 sps:$4 sm:$0xff]  }
  0xb4   : > { %6451 = vmatprep.subr.bf16.mxu0 %v7723_v30  ;;  %v7767_v30 = vld [vmem:[%s8031_s26 + $0x80] ss:$12 sps:$4 sm:$0xff]  }
  0xb5   : > { %7090 = vmatpush3.bf16.msra.mxu1 %v7739_v28  ;;  %v7856_v28 = vld [vmem:[%s8031_s26 + $0x30] ss:$12 sps:$4 sm:$0xff]  }
  0xb6   : > { %7012 = vmatmul.mubr.bf16.gmra.mrb[68].mxu0 %v7715_v31  ;;  %7091 = vmatprep.subr.bf16.mxu1 %v7746_v32  ;;  %v7768_v31 = vld [vmem:[%s8031_s26 + $0x98] ss:$12 sps:$4 sm:$0xff]  }
  0xb7   : > { %7015 = vmatprep.mubr.bf16.mxu0 %v7720_v33  ;;  %6452 = vmatpush3.bf16.msra.mxu0 %v7725_v34  ;;  %v7859_v33 = vld [vmem:[%s8031_s26 + $0x64] ss:$12 sps:$4 sm:$0xff]  }
  0xb8   : > { %7060 = vmatmul.mubr.bf16.gmra.mrb[68].mxu1 %v7718_v35  ;;  %6453 = vmatprep.subr.bf16.mxu0 %v7729_v36  ;;  %v7769_v34 = vld [vmem:[%s8031_s26 + $0xb0] ss:$12 sps:$4 sm:$0xff]   ;;  %v7770_v35 = vld [vmem:[%s8031_s26 + $0xc8] ss:$12 sps:$4 sm:$0xff]   ;;  %v7860_v36 = vld [vmem:[%s8031_s26 + $0x60] ss:$12 sps:$4 sm:$0xff]  }
  0xb9   : > { %7063 = vmatprep.mubr.bf16.mxu1 %v7722_v37  ;;  %7092 = vmatpush3.bf16.msra.mxu1 %v7746_v32  ;;  %v7858_v32 = vld [vmem:[%s8031_s26 + $0x48] ss:$12 sps:$4 sm:$0xff]  }
  0xba   : > { %7093 = vmatprep.subr.bf16.mxu1 %v7747_v38  ;;  %v7861_v37 = vld [vmem:[%s8031_s26 + $0x7c] ss:$12 sps:$4 sm:$0xff]  }
  0xbb   : > { %6454 = vmatpush3.bf16.msra.mxu0 %v7731_v39 }
  0xbc   : > { %6455 = vmatprep.subr.bf16.mxu0 %v7735_v40 }
  0xbd   : > { %7094 = vmatpush3.bf16.msra.mxu1 %v7747_v38 }
  0xbe   : > { %7016 = vmatmul.mubr.bf16.gmra.mrb[72].mxu0 %v7721_v41  ;;  %7095 = vmatprep.subr.bf16.mxu1 %v7754_v42 }
  0xbf   : > { %7019 = vmatprep.mubr.bf16.mxu0 %v7726_v43  ;;  %6456 = vmatpush3.bf16.msra.mxu0 %v7737_v44  ;;  %v7771_v44 = vld [vmem:[%s8031_s26 + $0xe0] ss:$12 sps:$4 sm:$0xff]  }
  0xc0   : > { %7064 = vmatmul.mubr.bf16.gmra.mrb[72].mxu1 %v7724_v45  ;;  %6457 = vmatprep.subr.bf16.mxu0 %v7743_v46  ;;  %v7772_v46 = vld [vmem:[%s8031_s26 + $0xf8] ss:$12 sps:$4 sm:$0xff]  }
  0xc1   : > { %7067 = vmatprep.mubr.bf16.mxu1 %v7728_v47  ;;  %7096 = vmatpush3.bf16.msra.mxu1 %v7754_v42 }
  0xc2   : > { %7097 = vmatprep.subr.bf16.mxu1 %v7755_v48 }
  0xc3   : > { %6458 = vmatpush3.bf16.msra.mxu0 %v7745_v49 }
  0xc4   : > { %6459 = vmatprep.subr.bf16.mxu0 %v7751_v50  ;;  %v7862_v50 = vld [vmem:[%s8031_s26 + $0x78] ss:$12 sps:$4 sm:$0xff]  }
  0xc5   : > { %7098 = vmatpush3.bf16.msra.mxu1 %v7755_v48 }
  0xc6   : > { %7020 = vmatmul.mubr.bf16.gmra.mrb[76].mxu0 %v7727_v51  ;;  %7099 = vmatprep.subr.bf16.mxu1 %v7762_v52 }
  0xc7   : > { %7023 = vmatprep.mubr.bf16.mxu0 %v7732_v53  ;;  %6460 = vmatpush3.bf16.msra.mxu0 %v7753_v54 }
  0xc8   : > { %7068 = vmatmul.mubr.bf16.gmra.mrb[76].mxu1 %v7730_v55  ;;  %6461 = vmatprep.subr.bf16.mxu0 %v7759_v56 }
  0xc9   : > { %7071 = vmatprep.mubr.bf16.mxu1 %v7734_v57  ;;  %7100 = vmatpush3.bf16.msra.mxu1 %v7762_v52  ;;  %v7863_v52 = vld [vmem:[%s8031_s26 + $0x94] ss:$12 sps:$4 sm:$0xff]  }
  0xca   : > { %7101 = vmatprep.subr.bf16.mxu1 %v7763_v58 }
  0xcb   : > { %6462 = vmatpush3.bf16.msra.mxu0 %v7761_v59 }
  0xcd   : > { %7102 = vmatpush3.bf16.msra.mxu1 %v7763_v58 }
  0xce   : > { %7024 = vmatmul.mubr.bf16.gmra.mrb[80].mxu0 %v7733_v60  ;;  %v7773_v60 = vld [vmem:[%s8031_s26 + $0x110] ss:$12 sps:$4 sm:$0xff]  }
  0xcf   : > { %7027 = vmatprep.mubr.bf16.mxu0 %v7740_v61 }
  0xd0   : > { %7072 = vmatmul.mubr.bf16.gmra.mrb[80].mxu1 %v7736_v62  ;;  %v7774_v62 = vld [vmem:[%s8031_s26 + $0x128] ss:$12 sps:$4 sm:$0xff]  }
  0xd1   : > { %7075 = vmatprep.mubr.bf16.mxu1 %v7742_v63 }
  0xd6   : > { %7028 = vmatmul.mubr.bf16.gmra.mrb[84].mxu0 %v7741_v0 }
  0xd7   : > { %7031 = vmatprep.mubr.bf16.mxu0 %v7748_v1 }
  0xd8   : > { %7076 = vmatmul.mubr.bf16.gmra.mrb[84].mxu1 %v7744_v6  ;;  %v7864_v6 = vld [vmem:[%s8031_s26 + $0x90] ss:$12 sps:$4 sm:$0xff]  }
  0xd9   : > { %7079 = vmatprep.mubr.bf16.mxu1 %v7750_v17 }
  0xde   : > { %7032 = vmatmul.mubr.bf16.gmra.mrb[88].mxu0 %v7749_v18  ;;  %v7865_v18 = vld [vmem:[%s8031_s26 + $0xac] ss:$12 sps:$4 sm:$0xff]  }
  0xdf   : > { %7035 = vmatprep.mubr.bf16.mxu0 %v7756_v19 }
  0xe0   : > { %7080 = vmatmul.mubr.bf16.gmra.mrb[88].mxu1 %v7752_v20 }
  0xe1   : > { %7083 = vmatprep.mubr.bf16.mxu1 %v7758_v21 }
  0xe6   : > { %7036 = vmatmul.mubr.bf16.gmra.mrb[92].mxu0 %v7757_v22 }
  0xe7   : > { %2496 = vmatprep.mubr.bf16.mxu0 %v7855_v25 }
  0xe8   : > { %7084 = vmatmul.mubr.bf16.gmra.mrb[92].mxu1 %v7760_v23 }
  0xe9   : > { %7103 = vmatprep.mubr.bf16.mxu1 %v7764_v24 }
  0xee   : > { %2497 = vmatmul.mubr.bf16.vlgmr.msra.gmra.mrb[96].mxu0 %v7856_v28  ;;  %v7776_v28 = vld [vmem:[%s8031_s26 + $0x158] ss:$12 sps:$4 sm:$0xff]  }
  0xef   : > { %2504 = vmatprep.mubr.bf16.mxu0 %v7857_v29 }
  0xf0   : > { %7104 = vmatmul.mubr.bf16.vlgmr.msra.gmra.mrb[64].mxu1 %v7765_v26  ;;  %v7775_v26 = vld [vmem:[%s8031_s26 + $0x140] ss:$12 sps:$4 sm:$0xff]  }
  0xf1   : > { %7107 = vmatprep.mubr.bf16.mxu1 %v7766_v27 }
  0xf6   : > { %2505 = vmatmul.mubr.bf16.gmra.mrb[100].mxu0 %v7858_v32  ;;  %v7866_v32 = vld [vmem:[%s8031_s26 + $0xa8] ss:$12 sps:$4 sm:$0xff]  }
  0xf7   : > { %2512 = vmatprep.mubr.bf16.mxu0 %v7859_v33 }
  0xf8   : > { %7108 = vmatmul.mubr.bf16.gmra.mrb[68].mxu1 %v7767_v30 }
  0xf9   : > { %7111 = vmatprep.mubr.bf16.mxu1 %v7768_v31 }
  0xfe   : > { %2513 = vmatmul.mubr.bf16.gmra.mrb[104].mxu0 %v7860_v36 }
  0xff   : > { %2520 = vmatprep.mubr.bf16.mxu0 %v7861_v37 }
 0x100   : > { %7112 = vmatmul.mubr.bf16.gmra.mrb[72].mxu1 %v7769_v34  ;;  %v7867_v34 = vld [vmem:[%s8031_s26 + $0xc4] ss:$12 sps:$4 sm:$0xff]  }
 0x101   : > { %v6191_v38 = vpop.f32.mrb[0].mxu0  ;;  %7115 = vmatprep.mubr.bf16.mxu1 %v7770_v35 }
 0x102   : > { %v6192_v39 = vpop.f32.mrb[1].mxu0 }
 0x103   : > { %v6194_v40 = vpop.f32.mrb[2].mxu0  ;;  %v6327_v41 = vpop.f32.mrb[0].mxu1  ;;  %v8299_v42 = vadd.f32 %v6192_v39, %v6191_v38 }
 0x104   : > { %v6195_v43 = vpop.f32.mrb[3].mxu0  ;;  %v6328_v45 = vpop.f32.mrb[1].mxu1 }
 0x105   : > { %v8303_v47 = vadd.f32 %v6328_v45, %v6327_v41  ;;  %v6330_v48 = vpop.f32.mrb[2].mxu1  ;;  %v8305_v49 = vadd.f32 %v6195_v43, %v6194_v40  ;;  %v7777_v43 = vld [vmem:[%s8031_s26 + $0x170] ss:$12 sps:$4 sm:$0xff]   ;;  %v7778_v45 = vld [vmem:[%s8031_s26 + $0x188] ss:$12 sps:$4 sm:$0xff]  }
 0x106   : > { %2521 = vmatmul.mubr.bf16.gmra.mrb[108].mxu0 %v7862_v50  ;;  %v6331_v51 = vpop.f32.mrb[3].mxu1 }
 0x107   : > { %2528 = vmatprep.mubr.bf16.mxu0 %v7863_v52  ;;  %v8309_v53 = vadd.f32 %v6331_v51, %v6330_v48 }
 0x108   : > { %7116 = vmatmul.mubr.bf16.gmra.mrb[76].mxu1 %v7771_v44 }
 0x109   : > { %v6197_v54 = vpop.f32.mrb[4].mxu0  ;;  %7119 = vmatprep.mubr.bf16.mxu1 %v7772_v46 }
 0x10a   : > { %v6198_v55 = vpop.f32.mrb[5].mxu0 }
 0x10b   : > { %v6200_v56 = vpop.f32.mrb[6].mxu0  ;;  %v6333_v57 = vpop.f32.mrb[4].mxu1  ;;  %v8311_v58 = vadd.f32 %v6198_v55, %v6197_v54 }
 0x10c   : > { %v6201_v59 = vpop.f32.mrb[7].mxu0  ;;  %v6334_v61 = vpop.f32.mrb[5].mxu1 }
 0x10d   : > { %v8315_v63 = vadd.f32 %v6334_v61, %v6333_v57  ;;  %v6336_v0 = vpop.f32.mrb[6].mxu1  ;;  %v8317_v1 = vadd.f32 %v6201_v59, %v6200_v56  ;;  %v7779_v61 = vld [vmem:[%s8031_s26 + $0x1a0] ss:$12 sps:$4 sm:$0xff]  }
 0x10e   : > { %2529 = vmatmul.mubr.bf16.gmra.mrb[112].mxu0 %v7864_v6  ;;  %v6337_v17 = vpop.f32.mrb[7].mxu1 }
 0x10f   : > { %2536 = vmatprep.mubr.bf16.mxu0 %v7865_v18  ;;  %v8321_v19 = vadd.f32 %v6337_v17, %v6336_v0 }
 0x110   : > { %7120 = vmatmul.mubr.bf16.gmra.mrb[80].mxu1 %v7773_v60 }
 0x111   : > { %v6203_v20 = vpop.f32.mrb[8].mxu0  ;;  %7123 = vmatprep.mubr.bf16.mxu1 %v7774_v62 }
 0x112   : > { %v6204_v21 = vpop.f32.mrb[9].mxu0 }
 0x113   : > { %v6206_v22 = vpop.f32.mrb[10].mxu0  ;;  %v6339_v23 = vpop.f32.mrb[8].mxu1  ;;  %v8323_v24 = vadd.f32 %v6204_v21, %v6203_v20 }
 0x114   : > { %v6207_v25 = vpop.f32.mrb[11].mxu0  ;;  %v6340_v27 = vpop.f32.mrb[9].mxu1 }
 0x115   : > { %v8327_v29 = vadd.f32 %v6340_v27, %v6339_v23  ;;  %v6342_v30 = vpop.f32.mrb[10].mxu1  ;;  %v8329_v31 = vadd.f32 %v6207_v25, %v6206_v22 }
 0x116   : > { %2537 = vmatmul.mubr.bf16.gmra.mrb[116].mxu0 %v7866_v32  ;;  %v6343_v33 = vpop.f32.mrb[11].mxu1 }
 0x117   : > { %2544 = vmatprep.mubr.bf16.mxu0 %v7867_v34  ;;  %v8333_v35 = vadd.f32 %v6343_v33, %v6342_v30 }
 0x118   : > { %7124 = vmatmul.mubr.bf16.gmra.mrb[84].mxu1 %v7775_v26 }
 0x119   : > { %v6209_v36 = vpop.f32.mrb[12].mxu0  ;;  %7127 = vmatprep.mubr.bf16.mxu1 %v7776_v28 }
 0x11a   : > { %v6210_v37 = vpop.f32.mrb[13].mxu0 }
 0x11b   : > { %v6212_v38 = vpop.f32.mrb[14].mxu0  ;;  %v6345_v39 = vpop.f32.mrb[12].mxu1  ;;  %v8335_v40 = vadd.f32 %v6210_v37, %v6209_v36 }
 0x11c   : > { %v6213_v41 = vpop.f32.mrb[15].mxu0  ;;  %v6346_v44 = vpop.f32.mrb[13].mxu1 }
 0x11d   : > { %v8339_v46 = vadd.f32 %v6346_v44, %v6345_v39  ;;  %v6348_v48 = vpop.f32.mrb[14].mxu1  ;;  %v8341_v50 = vadd.f32 %v6213_v41, %v6212_v38 }
 0x11e   : > { %2545 = vmatmul.mubr.bf16.gmra.mrb[120].mxu0 %v8108_v2  ;;  %v6349_v51 = vpop.f32.mrb[15].mxu1 }
 0x11f   : > { %2552 = vmatprep.mubr.bf16.mxu0 %v8111_v3  ;;  %v8345_v52 = vadd.f32 %v6349_v51, %v6348_v48  ;;  %v7783_v51 = vld [vmem:[%s9713_s4 + $0x100] sm:$0xff]  }
 0x120   : > { %7128 = vmatmul.mubr.bf16.gmra.mrb[88].mxu1 %v7777_v43  ;;  %6583 = vmatprep.subr.bf16.mxu0 %v7783_v51 }
 0x121   : > { %v6215_v54 = vpop.f32.mrb[16].mxu0  ;;  %7131 = vmatprep.mubr.bf16.mxu1 %v7778_v45 }
 0x122   : > { %v6216_v55 = vpop.f32.mrb[17].mxu0 }
 0x123   : > { %v6218_v56 = vpop.f32.mrb[18].mxu0  ;;  %v6351_v57 = vpop.f32.mrb[16].mxu1  ;;  %v8347_v59 = vadd.f32 %v6216_v55, %v6215_v54 }
 0x124   : > { %v6219_v60 = vpop.f32.mrb[19].mxu0  ;;  %v6352_v62 = vpop.f32.mrb[17].mxu1 }
 0x125   : > { %v8350_v0 = vadd.f32 %v6352_v62, %v6351_v57  ;;  %v6354_v6 = vpop.f32.mrb[18].mxu1  ;;  %v8352_v2 = vadd.f32 %v6219_v60, %v6218_v56  ;;  %v7784_v57 = vld [vmem:[%s9713_s4 + $0xc0] sm:$0xff]  }
 0x126   : > { %2553 = vmatmul.mubr.bf16.gmra.mrb[124].mxu0 %v8116_v4  ;;  %v6355_v3 = vpop.f32.mrb[19].mxu1 }
 0x127   : > { %2560 = vmatprep.mubr.bf16.mxu0 %v8119_v5  ;;  %v8356_v17 = vadd.f32 %v6355_v3, %v6354_v6  ;;  %6584 = vmatpush3.bf16.msra.mxu0 %v7784_v57  ;;  %v7785_v3 = vld [vmem:[%s9713_s4 + $0x108] sm:$0xff]  }
 0x128   : > { %7132 = vmatmul.mubr.bf16.gmra.mrb[92].mxu1 %v7779_v61  ;;  %6585 = vmatprep.subr.bf16.mxu0 %v7785_v3 }
 0x129   : > { %v6221_v18 = vpop.f32.mrb[20].mxu0 }
 0x12a   : > { %v6222_v20 = vpop.f32.mrb[21].mxu0 }
 0x12b   : > { %v6224_v21 = vpop.f32.mrb[22].mxu0  ;;  %v6357_v22 = vpop.f32.mrb[20].mxu1  ;;  %v8358_v23 = vadd.f32 %v6222_v20, %v6221_v18  ;;  %v7786_v20 = vld [vmem:[%s9713_s4 + $0xc8] sm:$0xff]  }
 0x12c   : > { %v6225_v25 = vpop.f32.mrb[23].mxu0  ;;  %v6358_v26 = vpop.f32.mrb[21].mxu1  ;;  %6586 = vmatpush3.bf16.msra.mxu0 %v7786_v20 }
 0x12d   : > { %v8360_v27 = vadd.f32 %v6358_v26, %v6357_v22  ;;  %v6360_v28 = vpop.f32.mrb[22].mxu1  ;;  %v8362_v30 = vadd.f32 %v6225_v25, %v6224_v21  ;;  %v7788_v25 = vld [vmem:[%s9713_s4 + $0x140] sm:$0xff]  }
 0x12e   : > { %2561 = vmatmul.mubr.bf16.gmra.mrb[128].mxu0 %v8132_v7  ;;  %v6361_v4 = vpop.f32.mrb[23].mxu1  ;;  %7135 = vmatprep.subr.bf16.mxu1 %v7788_v25 }
 0x12f   : > { %2568 = vmatprep.mubr.bf16.mxu0 %v8135_v8  ;;  %v8366_v5 = vadd.f32 %v6361_v4, %v6360_v28  ;;  %v7789_v4 = vld [vmem:[%s9713_s4 + $0xd0] sm:$0xff]   ;;  %7136 = vmatpush3.bf16.msra.mxu1 %v7788_v25  ;;  %v7797_v25 = vld [vmem:[%s9713_s4 + $0x158] sm:$0xff]  }
 0x131   : > { %v6227_v32 = vpop.f32.mrb[24].mxu0 }
 0x132   : > { %v6228_v33 = vpop.f32.mrb[25].mxu0 }
 0x133   : > { %v6230_v34 = vpop.f32.mrb[26].mxu0  ;;  %v6363_v36 = vpop.f32.mrb[24].mxu1  ;;  %v8368_v37 = vadd.f32 %v6228_v33, %v6227_v32 }
 0x134   : > { %v6231_v38 = vpop.f32.mrb[27].mxu0  ;;  %v6364_v39 = vpop.f32.mrb[25].mxu1 }
 0x135   : > { %v8370_v41 = vadd.f32 %v6364_v39, %v6363_v36  ;;  %v6366_v43 = vpop.f32.mrb[26].mxu1  ;;  %v8372_v44 = vadd.f32 %v6231_v38, %v6230_v34 }
 0x136   : > { %2569 = vmatmul.mubr.bf16.gmra.mrb[132].mxu0 %v8142_v9  ;;  %v6367_v7 = vpop.f32.mrb[27].mxu1 }
 0x137   : > { %2576 = vmatprep.mubr.bf16.mxu0 %v8145_v10  ;;  %v8376_v8 = vadd.f32 %v6367_v7, %v6366_v43  ;;  %v7790_v43 = vld [vmem:[%s9713_s4 + $0x118] sm:$0xff]   ;;  %v7791_v7 = vld [vmem:[%s9713_s4 + $0x148] sm:$0xff]  }
 0x138   : > { %7137 = vmatprep.subr.bf16.mxu1 %v7791_v7 }
 0x139   : > { %v6233_v45 = vpop.f32.mrb[28].mxu0  ;;  %7138 = vmatpush3.bf16.msra.mxu1 %v7791_v7  ;;  %v7800_v7 = vld [vmem:[%s9713_s4 + $0x160] sm:$0xff]  }
 0x13a   : > { %v6234_v48 = vpop.f32.mrb[29].mxu0 }
 0x13b   : > { %v6236_v54 = vpop.f32.mrb[30].mxu0  ;;  %v6369_v55 = vpop.f32.mrb[28].mxu1  ;;  %v8381_v56 = vadd.f32 %v6234_v48, %v6233_v45  ;;  %v7792_v48 = vld [vmem:[%s9713_s4 + $0xd8] sm:$0xff]  }
 0x13c   : > { %v6237_v9 = vpop.f32.mrb[31].mxu0  ;;  %v6370_v60 = vpop.f32.mrb[29].mxu1 }
 0x13d   : > { %v8386_v10 = vadd.f32 %v6370_v60, %v6369_v55  ;;  %v6372_v61 = vpop.f32.mrb[30].mxu1  ;;  %v8388_v62 = vadd.f32 %v6237_v9, %v6236_v54  ;;  %v7793_v54 = vld [vmem:[%s9713_s4 + $0x120] sm:$0xff]  }
 0x13e   : > { %2577 = vmatmul.mubr.bf16.gmra.mrb[136].mxu0 %v8152_v11  ;;  %v6373_v6 = vpop.f32.mrb[31].mxu1  ;;  %v7787_v11 = vld [vmem:[%s9713_s4 + $0x110] sm:$0xff]   ;;  %v7795_v60 = vld [vmem:[%s9713_s4 + $0xe0] sm:$0xff]  }
 0x13f   : > { %2584 = vmatprep.mubr.bf16.mxu0 %v8155_v12  ;;  %v8395_v18 = vadd.f32 %v6373_v6, %v6372_v61  ;;  %6587 = vmatprep.subr.bf16.mxu0 %v7787_v11  ;;  %v7796_v11 = vld [vmem:[%s9713_s4 + $0x128] sm:$0xff]  }
 0x140   : > { %6588 = vmatpush3.bf16.msra.mxu0 %v7789_v4 }
 0x141   : > { %v6239_v21 = vpop.f32.mrb[32].mxu0  ;;  %6589 = vmatprep.subr.bf16.mxu0 %v7790_v43  ;;  %v7799_v43 = vld [vmem:[%s9713_s4 + $0x130] sm:$0xff]  }
 0x142   : > { %v6240_v22 = vpop.f32.mrb[33].mxu0 }
 0x143   : > { %v8406_v26 = vadd.f32 %v6240_v22, %v6239_v21  ;;  %v6242_v12 = vpop.f32.mrb[34].mxu0  ;;  %v6375_v28 = vpop.f32.mrb[32].mxu1 }
 0x144   : > { %v6243_v32 = vpop.f32.mrb[35].mxu0  ;;  %v6376_v33 = vpop.f32.mrb[33].mxu1  ;;  %6590 = vmatpush3.bf16.msra.mxu0 %v7792_v48 }
 0x145   : > { %v8411_v34 = vadd.f32 %v6243_v32, %v6242_v12  ;;  %v8413_v36 = vadd.f32 %v6376_v33, %v6375_v28  ;;  %v6378_v38 = vpop.f32.mrb[34].mxu1  ;;  %6591 = vmatprep.subr.bf16.mxu0 %v7793_v54  ;;  %v7798_v28 = vld [vmem:[%s9713_s4 + $0xe8] sm:$0xff]   ;;  %v2971_v32 = vld [vmem:[#allocation2 + $0x18] sm:$0x1] }
 0x146   : > { %2585 = vmatmul.mubr.bf16.gmra.mrb[140].mxu0 %v8162_v13  ;;  %v6379_v39 = vpop.f32.mrb[35].mxu1  ;;  %v3201_v33 = vld [vmem:[#allocation2 + $0x28] sm:$0x80] }
 0x147   : > { %2592 = vmatprep.mubr.bf16.mxu0 %v8165_v14  ;;  %v8423_v45 = vadd.f32 %v6379_v39, %v6378_v38  ;;  %v7794_v14 = vld [vmem:[%s9713_s4 + $0x150] sm:$0xff]   ;;  %v2972_v38 = vsel %vm8456_vm4, 0, %v2971_v32  ;;  %v3202_v54 = vsel %vm8462_vm5, 0, %v3201_v33  ;;  %v7804_v32 = vld [vmem:[%s9713_s4 + $0xf8] sm:$0xff]  }
 0x148   : > { %7139 = vmatprep.subr.bf16.mxu1 %v7794_v14  ;;  %6592 = vmatpush3.bf16.msra.mxu0 %v7795_v60  ;;  %2973 = vst [vmem:[#allocation2 + $0x18] sm:$0x1] %v2972_v38  ;;  %3203 = vst [vmem:[#allocation2 + $0x28] sm:$0x80] %v3202_v54  ;;  %v7780_v54 = vld [vmem:[%s8031_s26 + $0x19c] ss:$12 sps:$4 sm:$0xff]  }
 0x149   : > { %v6245_v13 = vpop.f32.mrb[36].mxu0  ;;  %7140 = vmatpush3.bf16.msra.mxu1 %v7794_v14  ;;  %6593 = vmatprep.subr.bf16.mxu0 %v7796_v11  ;;  %v7801_v14 = vld [vmem:[%s9713_s4 + $0xf0] sm:$0xff]   ;;  %v7802_v11 = vld [vmem:[%s9713_s4 + $0x138] sm:$0xff]  }
 0x14a   : > { %v6246_v51 = vpop.f32.mrb[37].mxu0  ;;  %7141 = vmatprep.subr.bf16.mxu1 %v7797_v25 }
 0x14b   : > { %v8434_v55 = vadd.f32 %v6246_v51, %v6245_v13  ;;  %v6248_v57 = vpop.f32.mrb[38].mxu0  ;;  %v6381_v9 = vpop.f32.mrb[36].mxu1 }
 0x14c   : > { %v6249_v61 = vpop.f32.mrb[39].mxu0  ;;  %v6382_v6 = vpop.f32.mrb[37].mxu1  ;;  %6594 = vmatpush3.bf16.msra.mxu0 %v7798_v28  ;;  %v7869_v28 = vld [vmem:[%s8031_s26 + $0x184] ss:$12 sps:$4 sm:$0xff]  }
 0x14d   : > { %v8439_v3 = vadd.f32 %v6249_v61, %v6248_v57  ;;  %v8441_v20 = vadd.f32 %v6382_v6, %v6381_v9  ;;  %v6384_v21 = vpop.f32.mrb[38].mxu1  ;;  %7142 = vmatpush3.bf16.msra.mxu1 %v7797_v25  ;;  %6595 = vmatprep.subr.bf16.mxu0 %v7799_v43  ;;  %v7803_v25 = vld [vmem:[%s9713_s4 + $0x168] sm:$0xff]  }
 0x14e   : > { %2593 = vmatmul.mubr.bf16.gmra.mrb[144].mxu0 %v8171_v15  ;;  %v6385_v22 = vpop.f32.mrb[39].mxu1  ;;  %7143 = vmatprep.subr.bf16.mxu1 %v7800_v7 }
 0x14f   : > { %2600 = vmatprep.mubr.bf16.mxu0 %v8175_v16  ;;  %v8451_v12 = vadd.f32 %v6385_v22, %v6384_v21  ;;  %v7868_v21 = vld [vmem:[%s8031_s26 + $0x168] ss:$12 sps:$4 sm:$0xff]  }
 0x150   : > { %6596 = vmatpush3.bf16.msra.mxu0 %v7801_v14 }
 0x151   : > { %v6251_v15 = vpop.f32.mrb[40].mxu0  ;;  %7144 = vmatpush3.bf16.msra.mxu1 %v7800_v7  ;;  %6597 = vmatprep.subr.bf16.mxu0 %v7802_v11  ;;  %v3204_v7 = vld [vmem:[#allocation2 + $0x40] sm:$0x80] }
 0x152   : > { %v6252_v16 = vpop.f32.mrb[41].mxu0  ;;  %7145 = vmatprep.subr.bf16.mxu1 %v7803_v25 }
 0x153   : > { %v8472_v48 = vadd.f32 %v6252_v16, %v6251_v15  ;;  %v6254_v13 = vpop.f32.mrb[42].mxu0  ;;  %v6387_v51 = vpop.f32.mrb[40].mxu1  ;;  %v2974_v16 = vld [vmem:[#allocation2 + $0x30] sm:$0x1] }
 0x154   : > { %v6255_v57 = vpop.f32.mrb[43].mxu0  ;;  %v6388_v9 = vpop.f32.mrb[41].mxu1  ;;  %6598 = vmatpush3.bf16.msra.mxu0 %v7804_v32  ;;  %v2975_v43 = vsel %vm8456_vm4, 0, %v2974_v16 }
 0x155   : > { %v8479_v60 = vadd.f32 %v6255_v57, %v6254_v13  ;;  %v8481_v61 = vadd.f32 %v6388_v9, %v6387_v51  ;;  %v6390_v6 = vpop.f32.mrb[42].mxu1  ;;  %7146 = vmatpush3.bf16.msra.mxu1 %v7803_v25  ;;  %2976 = vst [vmem:[#allocation2 + $0x30] sm:$0x1] %v2975_v43  ;;  %v3205_v57 = vsel %vm8462_vm5, 0, %v3204_v7  ;;  %v7805_v9 = vld [vmem:[%s9713_s4 + $0x170] sm:$0xff]  }
 0x156   : > { %2601 = vmatmul.mubr.bf16.gmra.mrb[148].mxu0 %v7868_v21  ;;  %v6391_v22 = vpop.f32.mrb[43].mxu1  ;;  %3206 = vst [vmem:[#allocation2 + $0x40] sm:$0x80] %v3205_v57  ;;  %7147 = vmatprep.subr.bf16.mxu1 %v7805_v9  ;;  %v2977_v43 = vld [vmem:[#allocation2 + $0x48] sm:$0x1] }
 0x157   : > { %9721 = vst [vmem:[#allocation3_spill] sm:$0xff] %v8479_v60  ;;  %9722 = vst [vmem:[#allocation4_spill] sm:$0xff] %v8481_v61  ;;  %2608 = vmatprep.mubr.bf16.mxu0 %v7869_v28  ;;  %v8491_v15 = vadd.f32 %v6391_v22, %v6390_v6  ;;  %v7870_v28 = vld [vmem:[%s8031_s26 + $0x180] ss:$12 sps:$4 sm:$0xff]   ;;  %v3207_v7 = vld [vmem:[#allocation2 + $0x58] sm:$0x80] }
 0x158   : > { %v2978_v57 = vsel %vm8456_vm4, 0, %v2977_v43 }
 0x159   : > { %9723 = vst [vmem:[#allocation5_spill] sm:$0xff] %v8491_v15  ;;  %v6257_v33 = vpop.f32.mrb[44].mxu0  ;;  %7148 = vmatpush3.bf16.msra.mxu1 %v7805_v9  ;;  %2979 = vst [vmem:[#allocation2 + $0x48] sm:$0x1] %v2978_v57 }
 0x15a   : > { %v6258_v38 = vpop.f32.mrb[45].mxu0 }
 0x15b   : > { %v8498_v13 = vadd.f32 %v6258_v38, %v6257_v33  ;;  %v6260_v51 = vpop.f32.mrb[46].mxu0  ;;  %v6393_v14 = vpop.f32.mrb[44].mxu1  ;;  %v7806_v33 = vld [vmem:[%s9713_s4 + $0x178] sm:$0xff]  }
 0x15c   : > { %v6261_v6 = vpop.f32.mrb[47].mxu0  ;;  %v6394_v21 = vpop.f32.mrb[45].mxu1  ;;  %7149 = vmatprep.subr.bf16.mxu1 %v7806_v33 }
 0x15d   : > { %v8506_v22 = vadd.f32 %v6261_v6, %v6260_v51  ;;  %v8508_v11 = vadd.f32 %v6394_v21, %v6393_v14  ;;  %v6396_v25 = vpop.f32.mrb[46].mxu1  ;;  %v7782_v14 = vld [vmem:[%s8031_s26 + $0x198] ss:$12 sps:$4 sm:$0xff]   ;;  %v3208_v6 = vsel %vm8462_vm5, 0, %v3207_v7  ;;  %7150 = vmatpush3.bf16.msra.mxu1 %v7806_v33  ;;  %v2980_v7 = vld [vmem:[#allocation2 + $0x60] sm:$0x1] }
 0x15e   : > { %2609 = vmatmul.mubr.bf16.gmra.mrb[152].mxu0 %v7870_v28  ;;  %v6397_v32 = vpop.f32.mrb[47].mxu1  ;;  %3209 = vst [vmem:[#allocation2 + $0x58] sm:$0x80] %v3208_v6  ;;  %v3210_v33 = vld [vmem:[#allocation2 + $0x70] sm:$0x80] }
 0x15f   : > { %2616 = vmatprep.mubr.bf16.mxu0 %v7780_v54  ;;  %v8514_v16 = vadd.f32 %v6397_v32, %v6396_v25  ;;  %v3211_v57 = vsel %vm8462_vm5, 0, %v3210_v33 }
 0x160   : > { %3212 = vst [vmem:[#allocation2 + $0x70] sm:$0x80] %v3211_v57 }
 0x161   : > { %9724 = vst [vmem:[#allocation6_spill] sm:$0xff] %v8514_v16  ;;  %v6263_v38 = vpop.f32.mrb[48].mxu0 }
 0x162   : > { %v6264_v51 = vpop.f32.mrb[49].mxu0 }
 0x163   : > { %v8521_v9 = vadd.f32 %v6264_v51, %v6263_v38  ;;  %v6266_v21 = vpop.f32.mrb[50].mxu0  ;;  %v6399_v28 = vpop.f32.mrb[48].mxu1  ;;  %v2981_v51 = vsel %vm8456_vm4, 0, %v2980_v7 }
 0x164   : > { %v6267_v54 = vpop.f32.mrb[51].mxu0  ;;  %v6400_v25 = vpop.f32.mrb[49].mxu1  ;;  %2982 = vst [vmem:[#allocation2 + $0x60] sm:$0x1] %v2981_v51 }
 0x165   : > { %9725 = vst [vmem:[#allocation7_spill] sm:$0xff] %v8521_v9  ;;  %v8523_v32 = vadd.f32 %v6267_v54, %v6266_v21  ;;  %v8525_v15 = vadd.f32 %v6400_v25, %v6399_v28  ;;  %v6402_v16 = vpop.f32.mrb[50].mxu1  ;;  %v3213_v9 = vld [vmem:[#allocation2 + $0x88] sm:$0x80] }
 0x166   : > { %2617 = vmatmul.mubr.bf16.gmra.mrb[156].mxu0 %v7782_v14  ;;  %v6403_v60 = vpop.f32.mrb[51].mxu1 }
 0x167   : > { %9726 = vst [vmem:[#allocation8_spill] sm:$0xff] %v8523_v32  ;;  %9727 = vst [vmem:[#allocation9_spill] sm:$0xff] %v8525_v15  ;;  %v8527_v43 = vadd.f32 %v6403_v60, %v6402_v16  ;;  %v2983_v15 = vld [vmem:[#allocation2 + $0x78] sm:$0x1] }
 0x169   : > { %9728 = vst [vmem:[#allocation10_spill] sm:$0xff] %v8527_v43  ;;  %v6269_v61 = vpop.f32.mrb[52].mxu0 }
 0x16a   : > { %v6270_v38 = vpop.f32.mrb[53].mxu0 }
 0x16b   : > { %v8533_v6 = vadd.f32 %v6270_v38, %v6269_v61  ;;  %v6272_v21 = vpop.f32.mrb[54].mxu0  ;;  %v6405_v28 = vpop.f32.mrb[52].mxu1  ;;  %v2984_v61 = vsel %vm8456_vm4, 0, %v2983_v15  ;;  %v3214_v38 = vsel %vm8462_vm5, 0, %v3213_v9 }
 0x16c   : > { %v6273_v14 = vpop.f32.mrb[55].mxu0  ;;  %v6406_v54 = vpop.f32.mrb[53].mxu1  ;;  %2985 = vst [vmem:[#allocation2 + $0x78] sm:$0x1] %v2984_v61  ;;  %3215 = vst [vmem:[#allocation2 + $0x88] sm:$0x80] %v3214_v38 }
 0x16d   : > { %9729 = vst [vmem:[#allocation11_spill] sm:$0xff] %v8533_v6  ;;  %v8535_v60 = vadd.f32 %v6273_v14, %v6272_v21  ;;  %v8537_v16 = vadd.f32 %v6406_v54, %v6405_v28  ;;  %v6408_v25 = vpop.f32.mrb[54].mxu1  ;;  %v3216_v6 = vld [vmem:[#allocation2 + $0xa0] sm:$0x80] }
 0x16e   : > { %v6409_v43 = vpop.f32.mrb[55].mxu1 }
 0x16f   : > { %9730 = vst [vmem:[#allocation12_spill] sm:$0xff] %v8535_v60  ;;  %9731 = vst [vmem:[#allocation13_spill] sm:$0xff] %v8537_v16  ;;  %v8539_v32 = vadd.f32 %v6409_v43, %v6408_v25  ;;  %v2986_v16 = vld [vmem:[#allocation2 + $0x90] sm:$0x1] }
 0x171   : > { %9732 = vst [vmem:[#allocation14_spill] sm:$0xff] %v8539_v32  ;;  %v6275_v7 = vpop.f32.mrb[56].mxu0 }
 0x172   : > { %v6276_v33 = vpop.f32.mrb[57].mxu0 }
 0x173   : > { %v8545_v51 = vadd.f32 %v6276_v33, %v6275_v7  ;;  %v6278_v57 = vpop.f32.mrb[58].mxu0  ;;  %v6411_v21 = vpop.f32.mrb[56].mxu1  ;;  %v2987_v7 = vsel %vm8456_vm4, 0, %v2986_v16  ;;  %v3217_v33 = vsel %vm8462_vm5, 0, %v3216_v6 }
 0x174   : > { %v6279_v28 = vpop.f32.mrb[59].mxu0  ;;  %v6412_v14 = vpop.f32.mrb[57].mxu1  ;;  %2988 = vst [vmem:[#allocation2 + $0x90] sm:$0x1] %v2987_v7  ;;  %3218 = vst [vmem:[#allocation2 + $0xa0] sm:$0x80] %v3217_v33 }
 0x175   : > { %9733 = vst [vmem:[#allocation15_spill] sm:$0xff] %v8545_v51  ;;  %v8547_v43 = vadd.f32 %v6279_v28, %v6278_v57  ;;  %v8549_v54 = vadd.f32 %v6412_v14, %v6411_v21  ;;  %v6414_v25 = vpop.f32.mrb[58].mxu1  ;;  %v3219_v51 = vld [vmem:[#allocation2 + $0xb8] sm:$0x80] }
 0x176   : > { %v6415_v32 = vpop.f32.mrb[59].mxu1  ;;  %v3220_v7 = vsel %vm8462_vm5, 0, %v3219_v51 }
 0x177   : > { %9734 = vst [vmem:[#allocation16_spill] sm:$0xff] %v8547_v43  ;;  %9735 = vst [vmem:[#allocation17_spill] sm:$0xff] %v8549_v54  ;;  %v8551_v60 = vadd.f32 %v6415_v32, %v6414_v25  ;;  %v2989_v54 = vld [vmem:[#allocation2 + $0xa8] sm:$0x1] }
 0x178   : > { %3221 = vst [vmem:[#allocation2 + $0xb8] sm:$0x80] %v3220_v7 }
 0x179   : > { %9736 = vst [vmem:[#allocation18_spill] sm:$0xff] %v8551_v60  ;;  %v6281_v15 = vpop.f32.mrb[60].mxu0 }
 0x17a   : > { %v6282_v9 = vpop.f32.mrb[61].mxu0 }
 0x17b   : > { %v8557_v61 = vadd.f32 %v6282_v9, %v6281_v15  ;;  %v6284_v38 = vpop.f32.mrb[62].mxu0  ;;  %v6417_v57 = vpop.f32.mrb[60].mxu1  ;;  %v2990_v9 = vsel %vm8456_vm4, 0, %v2989_v54 }
 0x17c   : > { %v6285_v21 = vpop.f32.mrb[63].mxu0  ;;  %v6418_v28 = vpop.f32.mrb[61].mxu1  ;;  %2991 = vst [vmem:[#allocation2 + $0xa8] sm:$0x1] %v2990_v9 }
 0x17d   : > { %v8559_v32 = vadd.f32 %v6285_v21, %v6284_v38  ;;  %v8561_v14 = vadd.f32 %v6418_v28, %v6417_v57  ;;  %v6420_v25 = vpop.f32.mrb[62].mxu1 }
 0x17e   : > { %v6421_v60 = vpop.f32.mrb[63].mxu1 }
 0x17f   : > { %v8563_v43 = vadd.f32 %v6421_v60, %v6420_v25  ;;  %v2992_v25 = vld [vmem:[#allocation2 + $0xc0] sm:$0x1] }
 0x181   : > { %v7009_v16 = vpop.f32.mrb[64].mxu0 }
 0x182   : > { %v1110_v6 = vadd.f32 %v7009_v16, %v8311_v58  ;;  %v1101_v15 = vpop.f32.mrb[65].mxu0  ;;  %v3222_v16 = vld [vmem:[#allocation2 + $0xd0] sm:$0x80] }
 0x183   : > { %v1102_v33 = vadd.f32 %v8299_v42, %v1101_v15  ;;  %v7010_v38 = vpop.f32.mrb[66].mxu0 }
 0x184   : > { %v8572_v60 = vadd.f32 %v8315_v63, %v1110_v6  ;;  %v1113_v57 = vadd.f32 %v7010_v38, %v8317_v1  ;;  %v1104_v21 = vpop.f32.mrb[67].mxu0  ;;  %v2993_v1 = vsel %vm8456_vm4, 0, %v2992_v25 }
 0x185   : > { %v8576_v58 = vadd.f32 %v8303_v47, %v1102_v33  ;;  %v1105_v28 = vadd.f32 %v8305_v49, %v1104_v21  ;;  %v3223_v47 = vsel %vm8462_vm5, 0, %v3222_v16  ;;  %2994 = vst [vmem:[#allocation2 + $0xc0] sm:$0x1] %v2993_v1  ;;  %v3225_v21 = vld [vmem:[#allocation2 + $0xe8] sm:$0x80] }
 0x186   : > { %v8580_v54 = vadd.f32 %v8321_v19, %v1113_v57  ;;  %3224 = vst [vmem:[#allocation2 + $0xd0] sm:$0x80] %v3223_v47  ;;  %v2995_v57 = vld [vmem:[#allocation2 + $0xd8] sm:$0x1]  ;;  %v2998_v1 = vld [vmem:[#allocation2 + $0xf0] sm:$0x1] }
 0x187   : > { %v8583_v51 = vadd.f32 %v8309_v53, %v1105_v28  ;;  %v3228_v47 = vld [vmem:[#allocation2 + $0x100] sm:$0x80] }
 0x189   : > { %v7013_v42 = vpop.f32.mrb[68].mxu0 }
 0x18a   : > { %v1126_v63 = vadd.f32 %v7013_v42, %v8335_v40  ;;  %v1117_v6 = vpop.f32.mrb[69].mxu0 }
 0x18b   : > { %v1118_v49 = vadd.f32 %v8323_v24, %v1117_v6  ;;  %v7014_v15 = vpop.f32.mrb[70].mxu0 }
 0x18c   : > { %v8592_v53 = vadd.f32 %v8339_v46, %v1126_v63  ;;  %v1129_v19 = vadd.f32 %v7014_v15, %v8341_v50  ;;  %v1120_v9 = vpop.f32.mrb[71].mxu0  ;;  %v2996_v50 = vsel %vm8456_vm4, 0, %v2995_v57  ;;  %v3001_v57 = vld [vmem:[#allocation2 + $0x108] sm:$0x1] }
 0x18d   : > { %v8596_v40 = vadd.f32 %v8327_v29, %v1118_v49  ;;  %v1121_v7 = vadd.f32 %v8329_v31, %v1120_v9  ;;  %v3226_v29 = vsel %vm8462_vm5, 0, %v3225_v21  ;;  %2997 = vst [vmem:[#allocation2 + $0xd8] sm:$0x1] %v2996_v50  ;;  %v3231_v21 = vld [vmem:[#allocation2 + $0x118] sm:$0x80] }
 0x18e   : > { %v8600_v33 = vadd.f32 %v8345_v52, %v1129_v19  ;;  %3227 = vst [vmem:[#allocation2 + $0xe8] sm:$0x80] %v3226_v29 }
 0x18f   : > { %v8603_v38 = vadd.f32 %v8333_v35, %v1121_v7 }
 0x191   : > { %v7017_v24 = vpop.f32.mrb[72].mxu0 }
 0x192   : > { %v1142_v46 = vadd.f32 %v7017_v24, %v8358_v23  ;;  %v1133_v28 = vpop.f32.mrb[73].mxu0 }
 0x193   : > { %v1134_v31 = vadd.f32 %v8347_v59, %v1133_v28  ;;  %v7018_v42 = vpop.f32.mrb[74].mxu0 }
 0x194   : > { %v8612_v35 = vadd.f32 %v8360_v27, %v1142_v46  ;;  %v1145_v52 = vadd.f32 %v7018_v42, %v8362_v30  ;;  %v1136_v25 = vpop.f32.mrb[75].mxu0  ;;  %v2999_v30 = vsel %vm8456_vm4, 0, %v2998_v1 }
 0x195   : > { %v8616_v23 = vadd.f32 %v8350_v0, %v1134_v31  ;;  %v1137_v16 = vadd.f32 %v8352_v2, %v1136_v25  ;;  %v3229_v0 = vsel %vm8462_vm5, 0, %v3228_v47  ;;  %3000 = vst [vmem:[#allocation2 + $0xf0] sm:$0x1] %v2999_v30  ;;  %v3234_v25 = vld [vmem:[#allocation2 + $0x130] sm:$0x80]  ;;  %v9737_v47 = vld [vmem:[#allocation4_spill] sm:$0xff] }
 0x196   : > { %v8620_v63 = vadd.f32 %v8366_v5, %v1145_v52  ;;  %3230 = vst [vmem:[#allocation2 + $0x100] sm:$0x80] %v3229_v0  ;;  %v3004_v52 = vld [vmem:[#allocation2 + $0x120] sm:$0x1]  ;;  %v9739_v30 = vld [vmem:[#allocation6_spill] sm:$0xff] }
 0x197   : > { %v8623_v6 = vadd.f32 %v8356_v17, %v1137_v16 }
 0x199   : > { %v7021_v59 = vpop.f32.mrb[76].mxu0 }
 0x19a   : > { %v1158_v27 = vadd.f32 %v7021_v59, %v8381_v56  ;;  %v1149_v49 = vpop.f32.mrb[77].mxu0 }
 0x19b   : > { %v1150_v2 = vadd.f32 %v8368_v37, %v1149_v49  ;;  %v7022_v15 = vpop.f32.mrb[78].mxu0 }
 0x19c   : > { %v8632_v17 = vadd.f32 %v8386_v10, %v1158_v27  ;;  %v1161_v5 = vadd.f32 %v7022_v15, %v8388_v62  ;;  %v1152_v19 = vpop.f32.mrb[79].mxu0  ;;  %v3002_v62 = vsel %vm8456_vm4, 0, %v3001_v57  ;;  %v9738_v27 = vld [vmem:[#allocation3_spill] sm:$0xff] }
 0x19d   : > { %v8636_v56 = vadd.f32 %v8370_v41, %v1150_v2  ;;  %v1153_v9 = vadd.f32 %v8372_v44, %v1152_v19  ;;  %v3232_v41 = vsel %vm8462_vm5, 0, %v3231_v21  ;;  %3003 = vst [vmem:[#allocation2 + $0x108] sm:$0x1] %v3002_v62  ;;  %v9740_v2 = vld [vmem:[#allocation5_spill] sm:$0xff]  ;;  %v3237_v19 = vld [vmem:[#allocation2 + $0x148] sm:$0x80] }
 0x19e   : > { %v8640_v7 = vadd.f32 %v8395_v18, %v1161_v5  ;;  %3233 = vst [vmem:[#allocation2 + $0x118] sm:$0x80] %v3232_v41  ;;  %v3007_v5 = vld [vmem:[#allocation2 + $0x138] sm:$0x1]  ;;  %v3238_v57 = vsel %vm8462_vm5, 0, %v3237_v19  ;;  %v9742_v21 = vld [vmem:[#allocation7_spill] sm:$0xff] }
 0x19f   : > { %v8643_v24 = vadd.f32 %v8376_v8, %v1153_v9  ;;  %v9741_v9 = vld [vmem:[#allocation11_spill] sm:$0xff]  ;;  %v8694_v62 = vld [vmem:[%s9713_s4 + $0x80] sm:$0xff]   ;;  %3239 = vst [vmem:[#allocation2 + $0x148] sm:$0x80] %v3238_v57 }
 0x1a0   : > { %v9743_v41 = vld [vmem:[#allocation13_spill] sm:$0xff]  ;;  %7183 = vmatprep.subr.bf16.mxu1 %v8694_v62 }
 0x1a1   : > { %v7025_v37 = vpop.f32.mrb[80].mxu0 }
 0x1a2   : > { %v1174_v10 = vadd.f32 %v7025_v37, %v8434_v55  ;;  %v1165_v46 = vpop.f32.mrb[81].mxu0 }
 0x1a3   : > { %v1166_v44 = vadd.f32 %v8406_v26, %v1165_v46  ;;  %v7026_v28 = vpop.f32.mrb[82].mxu0 }
 0x1a4   : > { %v8652_v8 = vadd.f32 %v8441_v20, %v1174_v10  ;;  %v1177_v18 = vadd.f32 %v7026_v28, %v8439_v3  ;;  %v1168_v50 = vpop.f32.mrb[83].mxu0  ;;  %v3005_v3 = vsel %vm8456_vm4, 0, %v3004_v52  ;;  %v9744_v28 = vld [vmem:[#allocation12_spill] sm:$0xff] }
 0x1a5   : > { %v8656_v55 = vadd.f32 %v8413_v36, %v1166_v44  ;;  %v1169_v29 = vadd.f32 %v8411_v34, %v1168_v50  ;;  %v3235_v36 = vsel %vm8462_vm5, 0, %v3234_v25  ;;  %3006 = vst [vmem:[#allocation2 + $0x120] sm:$0x1] %v3005_v3  ;;  %v9746_v52 = vld [vmem:[#allocation8_spill] sm:$0xff]  ;;  %v9748_v3 = vld [vmem:[#allocation10_spill] sm:$0xff] }
 0x1a6   : > { %v8660_v31 = vadd.f32 %v8451_v12, %v1177_v18  ;;  %3236 = vst [vmem:[#allocation2 + $0x130] sm:$0x80] %v3235_v36 }
 0x1a7   : > { %v8663_v42 = vadd.f32 %v8423_v45, %v1169_v29  ;;  %v9745_v29 = vld [vmem:[#allocation9_spill] sm:$0xff] }
 0x1a9   : > { %v7029_v26 = vpop.f32.mrb[84].mxu0 }
 0x1aa   : > { %v1190_v20 = vadd.f32 %v7029_v26, %v8498_v13  ;;  %v1181_v16 = vpop.f32.mrb[85].mxu0 }
 0x1ab   : > { %v1182_v34 = vadd.f32 %v8472_v48, %v1181_v16  ;;  %v7030_v59 = vpop.f32.mrb[86].mxu0 }
 0x1ac   : > { %v8672_v45 = vadd.f32 %v8508_v11, %v1190_v20  ;;  %v1193_v12 = vadd.f32 %v7030_v59, %v8506_v22  ;;  %v1184_v1 = vpop.f32.mrb[87].mxu0  ;;  %v3008_v22 = vsel %vm8456_vm4, 0, %v3007_v5  ;;  %v9747_v20 = vld [vmem:[#allocation14_spill] sm:$0xff]  ;;  %v3010_v59 = vld [vmem:[#allocation2 + $0x150] sm:$0x1]  ;;  %v7811_v5 = vld [vmem:[%s9713_s4 + $0x40] sm:$0xff]  }
 0x1ad   : > { %v8676_v13 = vadd.f32 %v9737_v47, %v1182_v34  ;;  %v1185_v49 = vadd.f32 %v9738_v27, %v1184_v1  ;;  %3009 = vst [vmem:[#allocation2 + $0x138] sm:$0x1] %v3008_v22  ;;  %v3011_v27 = vsel %vm8456_vm4, 0, %v3010_v59  ;;  %v9751_v22 = vld [vmem:[#allocation16_spill] sm:$0xff]  ;;  %6719 = vmatprep.subr.bf16.mxu0 %v7811_v5  ;;  %v3246_v5 = vld [vmem:[#allocation2 + $0x190] sm:$0x80] }
 0x1ae   : > { %v8680_v0 = vadd.f32 %v9739_v30, %v1193_v12  ;;  %v3240_v12 = vld [vmem:[#allocation2 + $0x160] sm:$0x80]  ;;  %v9749_v30 = vld [vmem:[#allocation15_spill] sm:$0xff]  ;;  %3012 = vst [vmem:[#allocation2 + $0x150] sm:$0x1] %v3011_v27 }
 0x1af   : > { %v8683_v15 = vadd.f32 %v9740_v2, %v1185_v49  ;;  %v3241_v49 = vsel %vm8462_vm5, 0, %v3240_v12  ;;  %v8742_v12 = vld [vmem:[%s9711_s2] ss:$0 sm:$0xff] }
 0x1b0   : > { %3242 = vst [vmem:[#allocation2 + $0x160] sm:$0x80] %v3241_v49  ;;  %v8748_v49 = vld [vmem:[%s9712_s3] ss:$0 sm:$0xff] }
 0x1b1   : > { %v7033_v48 = vpop.f32.mrb[88].mxu0 }
 0x1b2   : > { %v1206_v11 = vadd.f32 %v7033_v48, %v9741_v9  ;;  %v1197_v37 = vpop.f32.mrb[89].mxu0 }
 0x1b3   : > { %v1198_v10 = vadd.f32 %v9742_v21, %v1197_v37  ;;  %v7034_v46 = vpop.f32.mrb[90].mxu0 }
 0x1b4   : > { %v8697_v44 = vadd.f32 %v9743_v41, %v1206_v11  ;;  %v1209_v18 = vadd.f32 %v7034_v46, %v9744_v28  ;;  %v1200_v50 = vpop.f32.mrb[91].mxu0  ;;  %v9750_v11 = vld [vmem:[#allocation17_spill] sm:$0xff]  ;;  %v3013_v28 = vld [vmem:[#allocation2 + $0x168] sm:$0x1] }
 0x1b5   : > { %v8701_v26 = vadd.f32 %v9745_v29, %v1198_v10  ;;  %v1201_v25 = vadd.f32 %v9746_v52, %v1200_v50  ;;  %v9752_v10 = vld [vmem:[#allocation18_spill] sm:$0xff] }
 0x1b6   : > { %v8706_v16 = vadd.f32 %v9747_v20, %v1209_v18  ;;  %v3243_v18 = vld [vmem:[#allocation2 + $0x178] sm:$0x80] }
 0x1b7   : > { %v8709_v36 = vadd.f32 %v9748_v3, %v1201_v25  ;;  %v3244_v50 = vsel %vm8462_vm5, 0, %v3243_v18 }
 0x1b8   : > { %3245 = vst [vmem:[#allocation2 + $0x178] sm:$0x80] %v3244_v50 }
 0x1b9   : > { %v7037_v34 = vpop.f32.mrb[92].mxu0 }
 0x1ba   : > { %v1222_v1 = vadd.f32 %v7037_v34, %v8557_v61  ;;  %v1213_v47 = vpop.f32.mrb[93].mxu0 }
 0x1bb   : > { %v1214_v2 = vadd.f32 %v9749_v30, %v1213_v47  ;;  %v7038_v48 = vpop.f32.mrb[94].mxu0 }
 0x1bc   : > { %v8721_v19 = vadd.f32 %v8561_v14, %v1222_v1  ;;  %v1225_v61 = vadd.f32 %v7038_v48, %v8559_v32  ;;  %v1216_v9 = vpop.f32.mrb[95].mxu0  ;;  %v3014_v32 = vsel %vm8456_vm4, 0, %v3013_v28  ;;  %v3016_v48 = vld [vmem:[#allocation2 + $0x180] sm:$0x1] }
 0x1bd   : > { %v8725_v37 = vadd.f32 %v9750_v11, %v1214_v2  ;;  %v1217_v57 = vadd.f32 %v9751_v22, %v1216_v9  ;;  %3015 = vst [vmem:[#allocation2 + $0x168] sm:$0x1] %v3014_v32  ;;  %v3017_v9 = vsel %vm8456_vm4, 0, %v3016_v48  ;;  %v3247_v11 = vsel %vm8462_vm5, 0, %v3246_v5 }
 0x1be   : > { %v8729_v21 = vadd.f32 %v8563_v43, %v1225_v61  ;;  %3018 = vst [vmem:[#allocation2 + $0x180] sm:$0x1] %v3017_v9  ;;  %3248 = vst [vmem:[#allocation2 + $0x190] sm:$0x80] %v3247_v11  ;;  %v7832_v9 = vld [vmem:[%s9713_s4 + $0x180] sm:$0xff]  }
 0x1bf   : > { %v8732_v46 = vadd.f32 %v9752_v10, %v1217_v57 }
 0x1c1   : > { %v6463_v41 = vpop.f32.mrb[96].mxu0 }
 0x1c2   : > { %v6464_v14 = vpop.f32.mrb[97].mxu0 }
 0x1c3   : > { %v6465_v29 = vadd.f32 %v6464_v14, %v6463_v41  ;;  %v7105_v52 = vpop.f32.mrb[64].mxu1  ;;  %v6466_v25 = vpop.f32.mrb[98].mxu0 }
 0x1c4   : > { %v2659_v43 = vpop.f32.mrb[65].mxu1  ;;  %v6467_v20 = vpop.f32.mrb[99].mxu0 }
 0x1c5   : > { %v7285_v3 = vadd.f32 %v6465_v29, %v8576_v58  ;;  %v6468_v34 = vadd.f32 %v6467_v20, %v6466_v25  ;;  %v7106_v59 = vpop.f32.mrb[66].mxu1 }
 0x1c6   : > { %v2662_v1 = vpop.f32.mrb[67].mxu1 }
 0x1c7   : > { %v7286_v47 = vadd.f32 %v7285_v3, %v2659_v43  ;;  %v7293_v27 = vadd.f32 %v6468_v34, %v8583_v51 }
 0x1c9   : > { %v2825_v30 = vmul.f32 %v7286_v47, %v8742_v12  ;;  %v7294_v2 = vadd.f32 %v7293_v27, %v2662_v1  ;;  %v6469_v58 = vpop.f32.mrb[100].mxu0 }
 0x1ca   : > { %v6470_v61 = vpop.f32.mrb[101].mxu0 }
 0x1cb   : > { %v2864_v51 = vadd.f32 %v8748_v49, %v2825_v30  ;;  %v2826_v22 = vmul.f32 %v7294_v2, %v8742_v12  ;;  %v6471_v57 = vadd.f32 %v6470_v61, %v6469_v58  ;;  %v8757_v10 = vpop.f32.mrb[68].mxu1  ;;  %v6472_v41 = vpop.f32.mrb[102].mxu0 }
 0x1cc   : > { %v2675_v28 = vpop.f32.mrb[69].mxu1  ;;  %v6473_v18 = vpop.f32.mrb[103].mxu0 }
 0x1cd   : > { %v2865_v14 = vadd.f32 %v8748_v49, %v2826_v22  ;;  %v7281_v4 = vadd.f32 %v6471_v57, %v8572_v60  ;;  %v6474_v32 = vadd.f32 %v6473_v18, %v6472_v41  ;;  %v8761_v50 = vpop.f32.mrb[70].mxu1  ;;  %v2896_v29 = vmax.f32 %v2864_v51, 0.0  ;;  %v3150_v41 = vld [vmem:[#allocation2 + $0x18] sm:$0xff]  ;;  %v7833_v18 = vld [vmem:[%s9713_s4 + $0x1c8] sm:$0xff]  }
 0x1ce   : > { %v2678_v39 = vpop.f32.mrb[71].mxu1  ;;  %v7882_v57 = vmov 0  }
 0x1cf   : > { %v2897_v25 = vmax.f32 %v2865_v14, 0.0  ;;  %v7282_v43 = vadd.f32 %v7281_v4, %v7105_v52  ;;  %v7289_v20 = vadd.f32 %v6474_v32, %v8580_v54  ;;  %2945 = vst [vmem:[#allocation2 + $0x8] sm:$0xff] %v7882_v57  ;;  %v3299_v14 = vld [vmem:[#allocation2 + $0x28] sm:$0xff] }
 0x1d1   : > { %v2928_v3 = vpack.c.bf16 %v2897_v25, %v2896_v29  ;;  %v2827_v34 = vmul.f32 %v7282_v43, %v8742_v12  ;;  %v7290_v1 = vadd.f32 %v7289_v20, %v7106_v59  ;;  %v6475_v47 = vpop.f32.mrb[104].mxu0 }
 0x1d2   : > { %v6476_v27 = vpop.f32.mrb[105].mxu0 }
 0x1d3   : > { %2952 = vst [vmem:[#allocation2 + $0x20] sm:$0xff] %v2928_v3  ;;  %v3020_v60 = vshrl.u32 %v2928_v3, 16  ;;  %v3023_v30 = vshll.u32 %v2928_v3, 16  ;;  %v2866_v2 = vadd.f32 %v8748_v49, %v2827_v34  ;;  %v2828_v58 = vmul.f32 %v7290_v1, %v8742_v12  ;;  %v8767_v48 = vpop.f32.mrb[72].mxu1  ;;  %v6478_v52 = vpop.f32.mrb[106].mxu0  ;;  %3716 = vmatprep.mubr.bf16.mxu0 %v2928_v3  ;;  %v7813_v34 = vld [vmem:[%s9713_s4] sm:$0xff]  }
 0x1d4   : > { %v6477_v54 = vadd.f32 %v6476_v27, %v6475_v47  ;;  %v8769_v5 = vpop.f32.mrb[73].mxu1  ;;  %v6479_v59 = vpop.f32.mrb[107].mxu0  ;;  %v7814_v27 = vld [vmem:[%s9713_s4 + $0x48] sm:$0xff]  }
 0x1d5   : > { %v3022_v61 = vrot.slane %v3020_v60, 7  ;;  %v3249_v11 = vrot.slane %v3023_v30, 1  ;;  %v2867_v51 = vadd.f32 %v8748_v49, %v2828_v58  ;;  %v8778_v22 = vpop.f32.mrb[74].mxu1  ;;  %v6480_v32 = vadd.f32 %v6479_v59, %v6478_v52 }
 0x1d6   : > { %v7301_v4 = vadd.f32 %v6477_v54, %v8596_v40  ;;  %v8787_v29 = vpop.f32.mrb[75].mxu1  ;;  %v2898_v20 = vmax.f32 %v2866_v2, 0.0 }
 0x1d7   : > { %v3025_v25 = vor.u32 %v3023_v30, %v3022_v61  ;;  %v3250_v43 = vor.u32 %v3249_v11, %v3020_v60  ;;  %v2899_v3 = vmax.f32 %v2867_v51, 0.0  ;;  %v7309_v47 = vadd.f32 %v6480_v32, %v8603_v38  ;;  %v7815_v51 = vld [vmem:[%s9713_s4 + $0x8] sm:$0xff]  }
 0x1d8   : > { %v7302_v1 = vadd.f32 %v7301_v4, %v2675_v28  ;;  %v7816_v4 = vld [vmem:[%s9713_s4 + $0x50] sm:$0xff]  }
 0x1d9   : > { %v3151_v40 = vsel %vm8773_vm9, %v3025_v25, %v3150_v41  ;;  %v3300_v30 = vsel %vm8782_vm10, %v3250_v43, %v3299_v14  ;;  %v2929_v60 = vpack.c.bf16 %v2899_v3, %v2898_v20  ;;  %v6481_v2 = vpop.f32.mrb[108].mxu0  ;;  %v7310_v52 = vadd.f32 %v7309_v47, %v2678_v39 }
 0x1da   : > { %3152 = vst [vmem:[#allocation2 + $0x18] sm:$0xff] %v3151_v40  ;;  %3301 = vst [vmem:[#allocation2 + $0x28] sm:$0xff] %v3300_v30  ;;  %v2829_v58 = vmul.f32 %v7302_v1, %v8742_v12  ;;  %v6482_v28 = vpop.f32.mrb[109].mxu0  ;;  %3717 = vmatmul.mubr.bf16.vlgmr.msra.gmra.mrb[160].mxu0 %v3151_v40  ;;  %7151 = vmatprep.mubr.bf16.mxu1 %v3300_v30  ;;  %v3302_v1 = vld [vmem:[#allocation2 + $0x40] sm:$0xff] }
 0x1db   : > { %2953 = vst [vmem:[#allocation2 + $0x38] sm:$0xff] %v2929_v60  ;;  %v3027_v38 = vshrl.u32 %v2929_v60, 16  ;;  %v3030_v54 = vshll.u32 %v2929_v60, 16  ;;  %v6483_v59 = vadd.f32 %v6482_v28, %v6481_v2  ;;  %v8801_v61 = vpop.f32.mrb[76].mxu1  ;;  %v6484_v11 = vpop.f32.mrb[110].mxu0  ;;  %3724 = vmatprep.mubr.bf16.mxu0 %v2929_v60  ;;  %6720 = vmatpush3.bf16.msra.mxu0 %v7813_v34  ;;  %v2830_v39 = vmul.f32 %v7310_v52, %v8742_v12  ;;  %v3153_v34 = vld [vmem:[#allocation2 + $0x30] sm:$0xff] }
 0x1dc   : > { %v2868_v57 = vadd.f32 %v8748_v49, %v2829_v58  ;;  %v8808_v41 = vpop.f32.mrb[77].mxu1  ;;  %v6485_v14 = vpop.f32.mrb[111].mxu0  ;;  %6721 = vmatprep.subr.bf16.mxu0 %v7814_v27  ;;  %v7808_v28 = vld [vmem:[%s9713_s4 + $0x88] sm:$0xff]  }
 0x1dd   : > { %v3029_v32 = vrot.slane %v3027_v38, 7  ;;  %v3251_v25 = vrot.slane %v3030_v54, 1  ;;  %v7297_v43 = vadd.f32 %v6483_v59, %v8592_v53  ;;  %v6486_v20 = vadd.f32 %v6485_v14, %v6484_v11  ;;  %v8814_v3 = vpop.f32.mrb[78].mxu1  ;;  %v7818_v53 = vld [vmem:[%s9713_s4 + $0x10] sm:$0xff]   ;;  %v7819_v11 = vld [vmem:[%s9713_s4 + $0x58] sm:$0xff]  }
 0x1de   : > { %v2869_v47 = vadd.f32 %v8748_v49, %v2830_v39  ;;  %v8817_v40 = vpop.f32.mrb[79].mxu1  ;;  %v2900_v58 = vmax.f32 %v2868_v57, 0.0 }
 0x1df   : > { %v3032_v30 = vor.u32 %v3030_v54, %v3029_v32  ;;  %v3252_v60 = vor.u32 %v3251_v25, %v3027_v38  ;;  %v7298_v27 = vadd.f32 %v7297_v43, %v8757_v10  ;;  %v7305_v2 = vadd.f32 %v6486_v20, %v8600_v33  ;;  %6722 = vmatpush3.bf16.msra.mxu0 %v7815_v51 }
 0x1e0   : > { %v2901_v52 = vmax.f32 %v2869_v47, 0.0  ;;  %6723 = vmatprep.subr.bf16.mxu0 %v7816_v4  ;;  %v7809_v47 = vld [vmem:[%s9713_s4 + $0x90] sm:$0xff]  }
 0x1e1   : > { %v3154_v54 = vsel %vm8773_vm9, %v3032_v30, %v3153_v34  ;;  %v3303_v10 = vsel %vm8782_vm10, %v3252_v60, %v3302_v1  ;;  %v2831_v33 = vmul.f32 %v7298_v27, %v8742_v12  ;;  %v7306_v38 = vadd.f32 %v7305_v2, %v8761_v50  ;;  %v6487_v59 = vpop.f32.mrb[112].mxu0  ;;  %v7820_v50 = vld [vmem:[%s9713_s4 + $0x18] sm:$0xff]  }
 0x1e2   : > { %3155 = vst [vmem:[#allocation2 + $0x30] sm:$0xff] %v3154_v54  ;;  %3304 = vst [vmem:[#allocation2 + $0x40] sm:$0xff] %v3303_v10  ;;  %v2930_v51 = vpack.c.bf16 %v2901_v52, %v2900_v58  ;;  %v6488_v57 = vpop.f32.mrb[113].mxu0  ;;  %3725 = vmatmul.mubr.bf16.gmra.mrb[164].mxu0 %v3154_v54  ;;  %7152 = vmatmul.mubr.bf16.vlgmr.msra.gmra.mrb[96].mxu1 %v3303_v10  ;;  %v3156_v54 = vld [vmem:[#allocation2 + $0x48] sm:$0xff]  ;;  %v3305_v10 = vld [vmem:[#allocation2 + $0x58] sm:$0xff] }
 0x1e3   : > { %v2870_v39 = vadd.f32 %v8748_v49, %v2831_v33  ;;  %v2832_v14 = vmul.f32 %v7306_v38, %v8742_v12  ;;  %v6489_v4 = vadd.f32 %v6488_v57, %v6487_v59  ;;  %v8838_v32 = vpop.f32.mrb[80].mxu1  ;;  %v6490_v25 = vpop.f32.mrb[114].mxu0  ;;  %7184 = vmatpush3.bf16.msra.mxu1 %v8694_v62  ;;  %6724 = vmatpush3.bf16.msra.mxu0 %v7818_v53  ;;  %v7821_v62 = vld [vmem:[%s9713_s4 + $0x60] sm:$0xff]  }
 0x1e4   : > { %2954 = vst [vmem:[#allocation2 + $0x50] sm:$0xff] %v2930_v51  ;;  %v3034_v43 = vshrl.u32 %v2930_v51, 16  ;;  %v3037_v20 = vshll.u32 %v2930_v51, 16  ;;  %v8844_v34 = vpop.f32.mrb[81].mxu1  ;;  %v6491_v1 = vpop.f32.mrb[115].mxu0  ;;  %3732 = vmatprep.mubr.bf16.mxu0 %v2930_v51  ;;  %7185 = vmatprep.subr.bf16.mxu1 %v7808_v28 }
 0x1e5   : > { %v2871_v30 = vadd.f32 %v8748_v49, %v2832_v14  ;;  %v7317_v60 = vadd.f32 %v6489_v4, %v8616_v23  ;;  %v6492_v27 = vadd.f32 %v6491_v1, %v6490_v25  ;;  %v8854_v2 = vpop.f32.mrb[82].mxu1  ;;  %6725 = vmatprep.subr.bf16.mxu0 %v7819_v11  ;;  %v2902_v33 = vmax.f32 %v2870_v39, 0.0  ;;  %v7810_v39 = vld [vmem:[%s9713_s4 + $0x98] sm:$0xff]  }
 0x1e6   : > { %v3036_v53 = vrot.slane %v3034_v43, 7  ;;  %v3253_v58 = vrot.slane %v3037_v20, 1  ;;  %v8856_v52 = vpop.f32.mrb[83].mxu1 }
 0x1e7   : > { %v2903_v38 = vmax.f32 %v2871_v30, 0.0  ;;  %v7318_v59 = vadd.f32 %v7317_v60, %v8769_v5  ;;  %v7325_v51 = vadd.f32 %v6492_v27, %v8623_v6  ;;  %7186 = vmatpush3.bf16.msra.mxu1 %v7808_v28  ;;  %6726 = vmatpush3.bf16.msra.mxu0 %v7820_v50  ;;  %v7823_v6 = vld [vmem:[%s9713_s4 + $0x20] sm:$0xff]  }
 0x1e8   : > { %v3039_v57 = vor.u32 %v3037_v20, %v3036_v53  ;;  %v3254_v23 = vor.u32 %v3253_v58, %v3034_v43  ;;  %7187 = vmatprep.subr.bf16.mxu1 %v7809_v47  ;;  %6727 = vmatprep.subr.bf16.mxu0 %v7821_v62 }
 0x1e9   : > { %v2931_v14 = vpack.c.bf16 %v2903_v38, %v2902_v33  ;;  %v2833_v11 = vmul.f32 %v7318_v59, %v8742_v12  ;;  %v7326_v4 = vadd.f32 %v7325_v51, %v8787_v29  ;;  %v6493_v25 = vpop.f32.mrb[116].mxu0  ;;  %v7824_v29 = vld [vmem:[%s9713_s4 + $0x68] sm:$0xff]   ;;  %v7812_v59 = vld [vmem:[%s9713_s4 + $0xa0] sm:$0xff]  }
 0x1ea   : > { %v3157_v5 = vsel %vm8773_vm9, %v3039_v57, %v3156_v54  ;;  %v3306_v28 = vsel %vm8782_vm10, %v3254_v23, %v3305_v10  ;;  %v6494_v50 = vpop.f32.mrb[117].mxu0  ;;  %v7825_v51 = vld [vmem:[%s9713_s4 + $0x28] sm:$0xff]   ;;  %v3159_v57 = vld [vmem:[#allocation2 + $0x60] sm:$0xff]  ;;  %v3308_v23 = vld [vmem:[#allocation2 + $0x70] sm:$0xff] }
 0x1eb   : > { %3158 = vst [vmem:[#allocation2 + $0x48] sm:$0xff] %v3157_v5  ;;  %3307 = vst [vmem:[#allocation2 + $0x58] sm:$0xff] %v3306_v28  ;;  %v3041_v43 = vshrl.u32 %v2931_v14, 16  ;;  %v3044_v20 = vshll.u32 %v2931_v14, 16  ;;  %v2872_v1 = vadd.f32 %v8748_v49, %v2833_v11  ;;  %v2834_v62 = vmul.f32 %v7326_v4, %v8742_v12  ;;  %v8877_v30 = vpop.f32.mrb[84].mxu1  ;;  %v6496_v60 = vpop.f32.mrb[118].mxu0  ;;  %3733 = vmatmul.mubr.bf16.gmra.mrb[168].mxu0 %v3157_v5 }
 0x1ec   : > { %2955 = vst [vmem:[#allocation2 + $0x68] sm:$0xff] %v2931_v14  ;;  %7155 = vmatprep.mubr.bf16.mxu1 %v3306_v28  ;;  %v6495_v27 = vadd.f32 %v6494_v50, %v6493_v25  ;;  %v8879_v53 = vpop.f32.mrb[85].mxu1  ;;  %v6497_v58 = vpop.f32.mrb[119].mxu0  ;;  %3740 = vmatprep.mubr.bf16.mxu0 %v2931_v14  ;;  %v7826_v4 = vld [vmem:[%s9713_s4 + $0x70] sm:$0xff]  }
 0x1ed   : > { %7188 = vmatpush3.bf16.msra.mxu1 %v7809_v47  ;;  %v3043_v54 = vrot.slane %v3041_v43, 7  ;;  %v3255_v10 = vrot.slane %v3044_v20, 1  ;;  %v2873_v33 = vadd.f32 %v8748_v49, %v2834_v62  ;;  %v8882_v38 = vpop.f32.mrb[86].mxu1  ;;  %6728 = vmatpush3.bf16.msra.mxu0 %v7823_v6  ;;  %v6498_v14 = vadd.f32 %v6497_v58, %v6496_v60 }
 0x1ee   : > { %7189 = vmatprep.subr.bf16.mxu1 %v7810_v39  ;;  %v7313_v47 = vadd.f32 %v6495_v27, %v8612_v35  ;;  %v8891_v11 = vpop.f32.mrb[87].mxu1  ;;  %6729 = vmatprep.subr.bf16.mxu0 %v7824_v29  ;;  %v2904_v28 = vmax.f32 %v2872_v1, 0.0  ;;  %v7829_v1 = vld [vmem:[%s9713_s4 + $0x78] sm:$0xff]  }
 0x1ef   : > { %v3046_v25 = vor.u32 %v3044_v20, %v3043_v54  ;;  %v3256_v5 = vor.u32 %v3255_v10, %v3041_v43  ;;  %v2905_v6 = vmax.f32 %v2873_v33, 0.0  ;;  %v7321_v62 = vadd.f32 %v6498_v14, %v8620_v63  ;;  %v7817_v43 = vld [vmem:[%s9713_s4 + $0xa8] sm:$0xff]  }
 0x1f0   : > { %v7314_v50 = vadd.f32 %v7313_v47, %v8767_v48  ;;  %v7828_v48 = vld [vmem:[%s9713_s4 + $0x30] sm:$0xff]  }
 0x1f1   : > { %7190 = vmatpush3.bf16.msra.mxu1 %v7810_v39  ;;  %v3160_v35 = vsel %vm8773_vm9, %v3046_v25, %v3159_v57  ;;  %v3309_v60 = vsel %vm8782_vm10, %v3256_v5, %v3308_v23  ;;  %v2932_v29 = vpack.c.bf16 %v2905_v6, %v2904_v28  ;;  %v6499_v27 = vpop.f32.mrb[120].mxu0  ;;  %6730 = vmatpush3.bf16.msra.mxu0 %v7825_v51  ;;  %v7822_v6 = vld [vmem:[%s9713_s4 + $0xb0] sm:$0xff]  }
 0x1f2   : > { %7191 = vmatprep.subr.bf16.mxu1 %v7812_v59  ;;  %3161 = vst [vmem:[#allocation2 + $0x60] sm:$0xff] %v3160_v35  ;;  %3310 = vst [vmem:[#allocation2 + $0x70] sm:$0xff] %v3309_v60  ;;  %v2835_v63 = vmul.f32 %v7314_v50, %v8742_v12  ;;  %v7322_v39 = vadd.f32 %v7321_v62, %v8778_v22  ;;  %v6500_v20 = vpop.f32.mrb[121].mxu0  ;;  %7156 = vmatmul.mubr.bf16.gmra.mrb[100].mxu1 %v3309_v60  ;;  %v3162_v50 = vld [vmem:[#allocation2 + $0x78] sm:$0xff]  ;;  %v3311_v62 = vld [vmem:[#allocation2 + $0x88] sm:$0xff] }
 0x1f3   : > { %6731 = vmatprep.subr.bf16.mxu0 %v7826_v4  ;;  %2956 = vst [vmem:[#allocation2 + $0x80] sm:$0xff] %v2932_v29  ;;  %v3048_v58 = vshrl.u32 %v2932_v29, 16  ;;  %v3051_v54 = vshll.u32 %v2932_v29, 16  ;;  %v6501_v10 = vadd.f32 %v6500_v20, %v6499_v27  ;;  %v8913_v33 = vpop.f32.mrb[88].mxu1  ;;  %v6502_v51 = vpop.f32.mrb[122].mxu0  ;;  %3741 = vmatmul.mubr.bf16.gmra.mrb[172].mxu0 %v3160_v35 }
 0x1f4   : > { %v2874_v57 = vadd.f32 %v8748_v49, %v2835_v63  ;;  %v2836_v23 = vmul.f32 %v7322_v39, %v8742_v12  ;;  %v8917_v22 = vpop.f32.mrb[89].mxu1  ;;  %v6503_v47 = vpop.f32.mrb[123].mxu0  ;;  %3748 = vmatprep.mubr.bf16.mxu0 %v2932_v29 }
 0x1f5   : > { %7192 = vmatpush3.bf16.msra.mxu1 %v7812_v59  ;;  %v3050_v14 = vrot.slane %v3048_v58, 7  ;;  %v3257_v4 = vrot.slane %v3051_v54, 1  ;;  %v7333_v25 = vadd.f32 %v6501_v10, %v8636_v56  ;;  %v6504_v5 = vadd.f32 %v6503_v47, %v6502_v51  ;;  %v8920_v28 = vpop.f32.mrb[90].mxu1  ;;  %6732 = vmatpush3.bf16.msra.mxu0 %v7828_v48  ;;  %v7830_v56 = vld [vmem:[%s9713_s4 + $0x38] sm:$0xff]  }
 0x1f6   : > { %7193 = vmatprep.subr.bf16.mxu1 %v7817_v43  ;;  %v2875_v35 = vadd.f32 %v8748_v49, %v2836_v23  ;;  %v8926_v60 = vpop.f32.mrb[91].mxu1  ;;  %6733 = vmatprep.subr.bf16.mxu0 %v7829_v1  ;;  %v2906_v39 = vmax.f32 %v2874_v57, 0.0 }
 0x1f7   : > { %v3053_v59 = vor.u32 %v3051_v54, %v3050_v14  ;;  %v3258_v29 = vor.u32 %v3257_v4, %v3048_v58  ;;  %v7334_v27 = vadd.f32 %v7333_v25, %v8808_v41  ;;  %v7341_v63 = vadd.f32 %v6504_v5, %v8643_v24  ;;  %v7827_v41 = vld [vmem:[%s9713_s4 + $0xb8] sm:$0xff]  }
 0x1f8   : > { %v2907_v20 = vmax.f32 %v2875_v35, 0.0 }
 0x1f9   : > { %7194 = vmatpush3.bf16.msra.mxu1 %v7817_v43  ;;  %v3163_v48 = vsel %vm8773_vm9, %v3053_v59, %v3162_v50  ;;  %v3312_v10 = vsel %vm8782_vm10, %v3258_v29, %v3311_v62  ;;  %v2837_v1 = vmul.f32 %v7334_v27, %v8742_v12  ;;  %v7342_v51 = vadd.f32 %v7341_v63, %v8817_v40  ;;  %v6505_v23 = vpop.f32.mrb[124].mxu0  ;;  %v7831_v59 = vld [vmem:[%s9713_s4 + $0x1c0] sm:$0xff]  }
 0x1fa   : > { %7195 = vmatprep.subr.bf16.mxu1 %v7822_v6  ;;  %3164 = vst [vmem:[#allocation2 + $0x78] sm:$0xff] %v3163_v48  ;;  %3313 = vst [vmem:[#allocation2 + $0x88] sm:$0xff] %v3312_v10  ;;  %v2933_v24 = vpack.c.bf16 %v2907_v20, %v2906_v39  ;;  %v6506_v43 = vpop.f32.mrb[125].mxu0  ;;  %7159 = vmatprep.mubr.bf16.mxu1 %v3312_v10  ;;  %v3165_v39 = vld [vmem:[#allocation2 + $0x90] sm:$0xff]  ;;  %v3314_v20 = vld [vmem:[#allocation2 + $0xa0] sm:$0xff] }
 0x1fb   : > { %6734 = vmatpush3.bf16.msra.mxu0 %v7830_v56  ;;  %v2876_v58 = vadd.f32 %v8748_v49, %v2837_v1  ;;  %v2838_v54 = vmul.f32 %v7342_v51, %v8742_v12  ;;  %v6507_v57 = vadd.f32 %v6506_v43, %v6505_v23  ;;  %v8944_v47 = vpop.f32.mrb[92].mxu1  ;;  %v6508_v40 = vpop.f32.mrb[126].mxu0 }
 0x1fc   : > { %3749 = vmatmul.mubr.bf16.gmra.mrb[176].mxu0 %v3163_v48  ;;  %2957 = vst [vmem:[#allocation2 + $0x98] sm:$0xff] %v2933_v24  ;;  %v3055_v14 = vshrl.u32 %v2933_v24, 16  ;;  %v3058_v4 = vshll.u32 %v2933_v24, 16  ;;  %v8946_v25 = vpop.f32.mrb[93].mxu1  ;;  %v6509_v5 = vpop.f32.mrb[127].mxu0 }
 0x1fd   : > { %3756 = vmatprep.mubr.bf16.mxu0 %v2933_v24  ;;  %7196 = vmatpush3.bf16.msra.mxu1 %v7822_v6  ;;  %v2877_v50 = vadd.f32 %v8748_v49, %v2838_v54  ;;  %v7329_v62 = vadd.f32 %v6507_v57, %v8632_v17  ;;  %v6510_v35 = vadd.f32 %v6509_v5, %v6508_v40  ;;  %v8950_v56 = vpop.f32.mrb[94].mxu1  ;;  %v2908_v48 = vmax.f32 %v2876_v58, 0.0 }
 0x1fe   : > { %7197 = vmatprep.subr.bf16.mxu1 %v7827_v41  ;;  %v3057_v29 = vrot.slane %v3055_v14, 7  ;;  %v3259_v27 = vrot.slane %v3058_v4, 1  ;;  %v8955_v63 = vpop.f32.mrb[95].mxu1 }
 0x1ff   : > { %v2909_v6 = vmax.f32 %v2877_v50, 0.0  ;;  %v7330_v10 = vadd.f32 %v7329_v62, %v8801_v61  ;;  %v7337_v17 = vadd.f32 %v6510_v35, %v8640_v7 }
 0x200   : > { %v3060_v1 = vor.u32 %v3058_v4, %v3057_v29  ;;  %v3260_v51 = vor.u32 %v3259_v27, %v3055_v14  ;;  %v3317_v29 = vld [vmem:[#allocation2 + $0xb8] sm:$0xff] }
 0x201   : > { %7198 = vmatpush3.bf16.msra.mxu1 %v7827_v41  ;;  %v2934_v23 = vpack.c.bf16 %v2909_v6, %v2908_v48  ;;  %v2839_v24 = vmul.f32 %v7330_v10, %v8742_v12  ;;  %v7338_v43 = vadd.f32 %v7337_v17, %v8814_v3  ;;  %v6511_v54 = vpop.f32.mrb[128].mxu0 }
 0x202   : > { %6855 = vmatprep.subr.bf16.mxu1 %v7831_v59  ;;  %v3166_v57 = vsel %vm8773_vm9, %v3060_v1, %v3165_v39  ;;  %v3315_v58 = vsel %vm8782_vm10, %v3260_v51, %v3314_v20  ;;  %v6512_v40 = vpop.f32.mrb[129].mxu0  ;;  %v3168_v59 = vld [vmem:[#allocation2 + $0xa8] sm:$0xff] }
 0x203   : > { %3167 = vst [vmem:[#allocation2 + $0x90] sm:$0xff] %v3166_v57  ;;  %3316 = vst [vmem:[#allocation2 + $0xa0] sm:$0xff] %v3315_v58  ;;  %v3062_v7 = vshrl.u32 %v2934_v23, 16  ;;  %v3065_v61 = vshll.u32 %v2934_v23, 16  ;;  %v2878_v41 = vadd.f32 %v8748_v49, %v2839_v24  ;;  %v2840_v14 = vmul.f32 %v7338_v43, %v8742_v12  ;;  %v6514_v4 = vpop.f32.mrb[130].mxu0  ;;  %7160 = vmatmul.mubr.bf16.gmra.mrb[104].mxu1 %v3315_v58 }
 0x204   : > { %2958 = vst [vmem:[#allocation2 + $0xb0] sm:$0xff] %v2934_v23  ;;  %3757 = vmatmul.mubr.bf16.gmra.mrb[180].mxu0 %v3166_v57  ;;  %v6513_v3 = vadd.f32 %v6512_v40, %v6511_v54  ;;  %v6515_v5 = vpop.f32.mrb[131].mxu0 }
 0x205   : > { %3764 = vmatprep.mubr.bf16.mxu0 %v2934_v23  ;;  %v3064_v50 = vrot.slane %v3062_v7, 7  ;;  %v3261_v62 = vrot.slane %v3065_v61, 1  ;;  %v2879_v35 = vadd.f32 %v8748_v49, %v2840_v14  ;;  %v6516_v39 = vadd.f32 %v6515_v5, %v6514_v4 }
 0x206   : > { %v7349_v27 = vadd.f32 %v6513_v3, %v8656_v55  ;;  %v2910_v6 = vmax.f32 %v2878_v41, 0.0 }
 0x207   : > { %v3067_v20 = vor.u32 %v3065_v61, %v3064_v50  ;;  %v3262_v48 = vor.u32 %v3261_v62, %v3062_v7  ;;  %v2911_v10 = vmax.f32 %v2879_v35, 0.0  ;;  %v7357_v1 = vadd.f32 %v6516_v39, %v8663_v42  ;;  %v3320_v50 = vld [vmem:[#allocation2 + $0xd0] sm:$0xff] }
 0x208   : > { %v7350_v17 = vadd.f32 %v7349_v27, %v8844_v34 }
 0x209   : > { %v3169_v51 = vsel %vm8773_vm9, %v3067_v20, %v3168_v59  ;;  %v3318_v23 = vsel %vm8782_vm10, %v3262_v48, %v3317_v29  ;;  %v2935_v24 = vpack.c.bf16 %v2911_v10, %v2910_v6  ;;  %v6517_v43 = vpop.f32.mrb[132].mxu0  ;;  %v7358_v54 = vadd.f32 %v7357_v1, %v8856_v52  ;;  %v3171_v52 = vld [vmem:[#allocation2 + $0xc0] sm:$0xff] }
 0x20a   : > { %3170 = vst [vmem:[#allocation2 + $0xa8] sm:$0xff] %v3169_v51  ;;  %3319 = vst [vmem:[#allocation2 + $0xb8] sm:$0xff] %v3318_v23  ;;  %v2841_v55 = vmul.f32 %v7350_v17, %v8742_v12  ;;  %v6518_v57 = vpop.f32.mrb[133].mxu0  ;;  %7163 = vmatprep.mubr.bf16.mxu1 %v3318_v23 }
 0x20b   : > { %2959 = vst [vmem:[#allocation2 + $0xc8] sm:$0xff] %v2935_v24  ;;  %v3069_v34 = vshrl.u32 %v2935_v24, 16  ;;  %v3072_v58 = vshll.u32 %v2935_v24, 16  ;;  %v6519_v42 = vadd.f32 %v6518_v57, %v6517_v43  ;;  %v6520_v40 = vpop.f32.mrb[134].mxu0  ;;  %v2842_v61 = vmul.f32 %v7358_v54, %v8742_v12 }
 0x20c   : > { %3765 = vmatmul.mubr.bf16.gmra.mrb[184].mxu0 %v3169_v51  ;;  %v2880_v7 = vadd.f32 %v8748_v49, %v2841_v55  ;;  %v6521_v41 = vpop.f32.mrb[135].mxu0 }
 0x20d   : > { %3772 = vmatprep.mubr.bf16.mxu0 %v2935_v24  ;;  %v3071_v14 = vrot.slane %v3069_v34, 7  ;;  %v3263_v4 = vrot.slane %v3072_v58, 1  ;;  %v7345_v3 = vadd.f32 %v6519_v42, %v8652_v8  ;;  %v6522_v5 = vadd.f32 %v6521_v41, %v6520_v40  ;;  %v3174_v40 = vld [vmem:[#allocation2 + $0xd8] sm:$0xff] }
 0x20e   : > { %v2881_v62 = vadd.f32 %v8748_v49, %v2842_v61  ;;  %v2912_v39 = vmax.f32 %v2880_v7, 0.0  ;;  %v3323_v7 = vld [vmem:[#allocation2 + $0xe8] sm:$0xff] }
 0x20f   : > { %v3074_v35 = vor.u32 %v3072_v58, %v3071_v14  ;;  %v3264_v59 = vor.u32 %v3263_v4, %v3069_v34  ;;  %v7346_v29 = vadd.f32 %v7345_v3, %v8838_v32  ;;  %v7353_v27 = vadd.f32 %v6522_v5, %v8660_v31 }
 0x210   : > { %v2913_v20 = vmax.f32 %v2881_v62, 0.0 }
 0x211   : > { %v3172_v48 = vsel %vm8773_vm9, %v3074_v35, %v3171_v52  ;;  %v3321_v6 = vsel %vm8782_vm10, %v3264_v59, %v3320_v50  ;;  %v2843_v8 = vmul.f32 %v7346_v29, %v8742_v12  ;;  %v7354_v10 = vadd.f32 %v7353_v27, %v8854_v2  ;;  %v6523_v17 = vpop.f32.mrb[136].mxu0 }
 0x212   : > { %3173 = vst [vmem:[#allocation2 + $0xc0] sm:$0xff] %v3172_v48  ;;  %3322 = vst [vmem:[#allocation2 + $0xd0] sm:$0xff] %v3321_v6  ;;  %v2936_v1 = vpack.c.bf16 %v2913_v20, %v2912_v39  ;;  %v6524_v51 = vpop.f32.mrb[137].mxu0  ;;  %7164 = vmatmul.mubr.bf16.gmra.mrb[108].mxu1 %v3321_v6 }
 0x213   : > { %v2882_v31 = vadd.f32 %v8748_v49, %v2843_v8  ;;  %v2844_v32 = vmul.f32 %v7354_v10, %v8742_v12  ;;  %v6525_v23 = vadd.f32 %v6524_v51, %v6523_v17  ;;  %v6526_v24 = vpop.f32.mrb[138].mxu0  ;;  %v3177_v17 = vld [vmem:[#allocation2 + $0xf0] sm:$0xff] }
 0x214   : > { %3773 = vmatmul.mubr.bf16.gmra.mrb[188].mxu0 %v3172_v48  ;;  %2960 = vst [vmem:[#allocation2 + $0xe0] sm:$0xff] %v2936_v1  ;;  %v3076_v43 = vshrl.u32 %v2936_v1, 16  ;;  %v3079_v55 = vshll.u32 %v2936_v1, 16  ;;  %v6527_v54 = vpop.f32.mrb[139].mxu0 }
 0x215   : > { %3780 = vmatprep.mubr.bf16.mxu0 %v2936_v1  ;;  %v2883_v2 = vadd.f32 %v8748_v49, %v2844_v32  ;;  %v7365_v57 = vadd.f32 %v6525_v23, %v8676_v13  ;;  %v6528_v34 = vadd.f32 %v6527_v54, %v6526_v24  ;;  %v2914_v61 = vmax.f32 %v2882_v31, 0.0  ;;  %v3326_v1 = vld [vmem:[#allocation2 + $0x100] sm:$0xff] }
 0x216   : > { %v3078_v58 = vrot.slane %v3076_v43, 7  ;;  %v3265_v42 = vrot.slane %v3079_v55, 1 }
 0x217   : > { %v2915_v41 = vmax.f32 %v2883_v2, 0.0  ;;  %v7366_v14 = vadd.f32 %v7365_v57, %v8879_v53  ;;  %v7373_v4 = vadd.f32 %v6528_v34, %v8683_v15 }
 0x218   : > { %v3081_v3 = vor.u32 %v3079_v55, %v3078_v58  ;;  %v3266_v5 = vor.u32 %v3265_v42, %v3076_v43 }
 0x219   : > { %v2937_v52 = vpack.c.bf16 %v2915_v41, %v2914_v61  ;;  %v2845_v50 = vmul.f32 %v7366_v14, %v8742_v12  ;;  %v7374_v62 = vadd.f32 %v7373_v4, %v8891_v11  ;;  %v6529_v35 = vpop.f32.mrb[140].mxu0 }
 0x21a   : > { %v3175_v13 = vsel %vm8773_vm9, %v3081_v3, %v3174_v40  ;;  %v9001_v59 = vsel %vm8782_vm10, %v3266_v5, %v3323_v7  ;;  %v6530_v29 = vpop.f32.mrb[141].mxu0 }
 0x21b   : > { %3176 = vst [vmem:[#allocation2 + $0xd8] sm:$0xff] %v3175_v13  ;;  %3325 = vst [vmem:[#allocation2 + $0xe8] sm:$0xff] %v9001_v59  ;;  %v3083_v15 = vshrl.u32 %v2937_v52, 16  ;;  %v3086_v53 = vshll.u32 %v2937_v52, 16  ;;  %v2884_v27 = vadd.f32 %v8748_v49, %v2845_v50  ;;  %v2846_v39 = vmul.f32 %v7374_v62, %v8742_v12  ;;  %v6532_v11 = vpop.f32.mrb[142].mxu0  ;;  %7167 = vmatprep.mubr.bf16.mxu1 %v9001_v59  ;;  %v3180_v50 = vld [vmem:[#allocation2 + $0x108] sm:$0xff] }
 0x21c   : > { %2961 = vst [vmem:[#allocation2 + $0xf8] sm:$0xff] %v2937_v52  ;;  %3781 = vmatmul.mubr.bf16.gmra.mrb[192].mxu0 %v3175_v13  ;;  %v6531_v20 = vadd.f32 %v6530_v29, %v6529_v35  ;;  %v6533_v48 = vpop.f32.mrb[143].mxu0  ;;  %v3329_v62 = vld [vmem:[#allocation2 + $0x118] sm:$0xff] }
 0x21d   : > { %3788 = vmatprep.mubr.bf16.mxu0 %v2937_v52  ;;  %v3085_v6 = vrot.slane %v3083_v15, 7  ;;  %v3267_v8 = vrot.slane %v3086_v53, 1  ;;  %v2885_v10 = vadd.f32 %v8748_v49, %v2846_v39  ;;  %v6534_v31 = vadd.f32 %v6533_v48, %v6532_v11 }
 0x21e   : > { %v7361_v51 = vadd.f32 %v6531_v20, %v8672_v45  ;;  %v2916_v24 = vmax.f32 %v2884_v27, 0.0 }
 0x21f   : > { %v3088_v32 = vor.u32 %v3086_v53, %v3085_v6  ;;  %v3268_v23 = vor.u32 %v3267_v8, %v3083_v15  ;;  %v2917_v43 = vmax.f32 %v2885_v10, 0.0  ;;  %v7369_v54 = vadd.f32 %v6534_v31, %v8680_v0 }
 0x220   : > { %v7362_v55 = vadd.f32 %v7361_v51, %v8877_v30 }
 0x221   : > { %v3178_v2 = vsel %vm8773_vm9, %v3088_v32, %v3177_v17  ;;  %v9015_v57 = vsel %vm8782_vm10, %v3268_v23, %v3326_v1  ;;  %v2938_v34 = vpack.c.bf16 %v2917_v43, %v2916_v24  ;;  %v6535_v58 = vpop.f32.mrb[144].mxu0  ;;  %v7370_v42 = vadd.f32 %v7369_v54, %v8882_v38  ;;  %v3332_v54 = vld [vmem:[#allocation2 + $0x130] sm:$0xff] }
 0x222   : > { %3179 = vst [vmem:[#allocation2 + $0xf0] sm:$0xff] %v3178_v2  ;;  %3328 = vst [vmem:[#allocation2 + $0x100] sm:$0xff] %v9015_v57  ;;  %v2847_v45 = vmul.f32 %v7362_v55, %v8742_v12  ;;  %v6536_v40 = vpop.f32.mrb[145].mxu0  ;;  %7168 = vmatmul.mubr.bf16.gmra.mrb[112].mxu1 %v9015_v57 }
 0x223   : > { %2962 = vst [vmem:[#allocation2 + $0x110] sm:$0xff] %v2938_v34  ;;  %v3090_v0 = vshrl.u32 %v2938_v34, 16  ;;  %v3093_v30 = vshll.u32 %v2938_v34, 16  ;;  %v6537_v7 = vadd.f32 %v6536_v40, %v6535_v58  ;;  %v6538_v61 = vpop.f32.mrb[146].mxu0  ;;  %v2848_v14 = vmul.f32 %v7370_v42, %v8742_v12 }
 0x224   : > { %3789 = vmatmul.mubr.bf16.gmra.mrb[196].mxu0 %v3178_v2  ;;  %v2886_v41 = vadd.f32 %v8748_v49, %v2847_v45  ;;  %v6539_v4 = vpop.f32.mrb[147].mxu0 }
 0x225   : > { %3796 = vmatprep.mubr.bf16.mxu0 %v2938_v34  ;;  %v3092_v3 = vrot.slane %v3090_v0, 7  ;;  %v3269_v5 = vrot.slane %v3093_v30, 1  ;;  %v7381_v52 = vadd.f32 %v6537_v7, %v8701_v26  ;;  %v6540_v38 = vadd.f32 %v6539_v4, %v6538_v61 }
 0x226   : > { %v2887_v35 = vadd.f32 %v8748_v49, %v2848_v14  ;;  %v2918_v27 = vmax.f32 %v2886_v41, 0.0  ;;  %v9074_v14 = vld [vmem:[%s9712_s3] ss:$0 sm:$0xff] }
 0x227   : > { %v3095_v13 = vor.u32 %v3093_v30, %v3092_v3  ;;  %v3270_v29 = vor.u32 %v3269_v5, %v3090_v0  ;;  %v7382_v15 = vadd.f32 %v7381_v52, %v8917_v22  ;;  %v7389_v53 = vadd.f32 %v6540_v38, %v8709_v36 }
 0x228   : > { %v2919_v39 = vmax.f32 %v2887_v35, 0.0 }
 0x229   : > { %v3181_v11 = vsel %vm8773_vm9, %v3095_v13, %v3180_v50  ;;  %v9031_v20 = vsel %vm8782_vm10, %v3270_v29, %v3329_v62  ;;  %v2849_v26 = vmul.f32 %v7382_v15, %v8742_v12  ;;  %v7390_v48 = vadd.f32 %v7389_v53, %v8926_v60  ;;  %v6541_v6 = vpop.f32.mrb[148].mxu0  ;;  %v3186_v13 = vld [vmem:[#allocation2 + $0x138] sm:$0xff]  ;;  %v3335_v29 = vld [vmem:[#allocation2 + $0x148] sm:$0xff] }
 0x22a   : > { %3182 = vst [vmem:[#allocation2 + $0x108] sm:$0xff] %v3181_v11  ;;  %3331 = vst [vmem:[#allocation2 + $0x118] sm:$0xff] %v9031_v20  ;;  %v9036_v22 = vpack.c.bf16 %v2919_v39, %v2918_v27  ;;  %v6542_v36 = vpop.f32.mrb[149].mxu0  ;;  %7171 = vmatprep.mubr.bf16.mxu1 %v9031_v20 }
 0x22b   : > { %v2888_v8 = vadd.f32 %v8748_v49, %v2849_v26  ;;  %v2850_v10 = vmul.f32 %v7390_v48, %v8742_v12  ;;  %v6543_v17 = vadd.f32 %v6542_v36, %v6541_v6  ;;  %v6544_v1 = vpop.f32.mrb[150].mxu0  ;;  %v3183_v12 = vld [vmem:[#allocation2 + $0x120] sm:$0xff] }
 0x22c   : > { %3797 = vmatmul.mubr.bf16.gmra.mrb[200].mxu0 %v3181_v11  ;;  %2963 = vst [vmem:[#allocation2 + $0x128] sm:$0xff] %v9036_v22  ;;  %v3097_v60 = vshrl.u32 %v9036_v22, 16  ;;  %v3100_v51 = vshll.u32 %v9036_v22, 16  ;;  %v6545_v31 = vpop.f32.mrb[151].mxu0 }
 0x22d   : > { %3804 = vmatprep.mubr.bf16.mxu0 %v9036_v22  ;;  %v2889_v32 = vadd.f32 %v8748_v49, %v2850_v10  ;;  %v7377_v23 = vadd.f32 %v6543_v17, %v8697_v44  ;;  %v6546_v24 = vadd.f32 %v6545_v31, %v6544_v1  ;;  %v2920_v2 = vmax.f32 %v2888_v8, 0.0  ;;  %v9054_v49 = vld [vmem:[%s9711_s2] ss:$0 sm:$0xff] }
 0x22e   : > { %v3099_v43 = vrot.slane %v3097_v60, 7  ;;  %v3271_v55 = vrot.slane %v3100_v51, 1 }
 0x22f   : > { %v2921_v34 = vmax.f32 %v2889_v32, 0.0  ;;  %v7378_v58 = vadd.f32 %v7377_v23, %v8913_v33  ;;  %v7385_v45 = vadd.f32 %v6546_v24, %v8706_v16 }
 0x230   : > { %v3102_v42 = vor.u32 %v3100_v51, %v3099_v43  ;;  %v3272_v40 = vor.u32 %v3271_v55, %v3097_v60 }
 0x231   : > { %v9049_v0 = vpack.c.bf16 %v2921_v34, %v2920_v2  ;;  %v2851_v44 = vmul.f32 %v9054_v49, %v7378_v58  ;;  %v7386_v30 = vadd.f32 %v7385_v45, %v8920_v28  ;;  %v6547_v7 = vpop.f32.mrb[152].mxu0  ;;  %v3338_v2 = vld [vmem:[#allocation2 + $0x160] sm:$0xff] }
 0x232   : > { %v9060_v61 = vsel %vm8773_vm9, %v3102_v42, %v3183_v12  ;;  %v9064_v16 = vsel %vm8782_vm10, %v3272_v40, %v3332_v54  ;;  %v6548_v33 = vpop.f32.mrb[153].mxu0  ;;  %v3189_v54 = vld [vmem:[#allocation2 + $0x150] sm:$0xff] }
 0x233   : > { %3185 = vst [vmem:[#allocation2 + $0x120] sm:$0xff] %v9060_v61  ;;  %3334 = vst [vmem:[#allocation2 + $0x130] sm:$0xff] %v9064_v16  ;;  %v3104_v41 = vshrl.u32 %v9049_v0, 16  ;;  %v3107_v28 = vshll.u32 %v9049_v0, 16  ;;  %v2890_v4 = vadd.f32 %v9074_v14, %v2851_v44  ;;  %v2852_v3 = vmul.f32 %v9054_v49, %v7386_v30  ;;  %v6550_v5 = vpop.f32.mrb[154].mxu0  ;;  %7172 = vmatmul.mubr.bf16.gmra.mrb[116].mxu1 %v9064_v16 }
 0x234   : > { %2964 = vst [vmem:[#allocation2 + $0x140] sm:$0xff] %v9049_v0  ;;  %3805 = vmatmul.mubr.bf16.gmra.mrb[204].mxu0 %v9060_v61  ;;  %v6549_v52 = vadd.f32 %v6548_v33, %v6547_v7  ;;  %v6551_v38 = vpop.f32.mrb[155].mxu0 }
 0x235   : > { %3812 = vmatprep.mubr.bf16.mxu0 %v9049_v0  ;;  %v3106_v50 = vrot.slane %v3104_v41, 7  ;;  %v3273_v62 = vrot.slane %v3107_v28, 1  ;;  %v2891_v35 = vadd.f32 %v9074_v14, %v2852_v3  ;;  %v6552_v53 = vadd.f32 %v6551_v38, %v6550_v5  ;;  %v3192_v38 = vld [vmem:[#allocation2 + $0x168] sm:$0xff] }
 0x236   : > { %v7397_v15 = vadd.f32 %v6549_v52, %v8725_v37  ;;  %v2922_v11 = vmax.f32 %v2890_v4, 0.0 }
 0x237   : > { %v3109_v27 = vor.u32 %v3107_v28, %v3106_v50  ;;  %v3274_v39 = vor.u32 %v3273_v62, %v3104_v41  ;;  %v2923_v26 = vmax.f32 %v2891_v35, 0.0  ;;  %v7405_v6 = vadd.f32 %v6552_v53, %v8732_v46  ;;  %v3341_v50 = vld [vmem:[#allocation2 + $0x178] sm:$0xff] }
 0x238   : > { %v7398_v48 = vadd.f32 %v7397_v15, %v8946_v25 }
 0x239   : > { %v9087_v36 = vsel %vm8773_vm9, %v3109_v27, %v3186_v13  ;;  %v9091_v8 = vsel %vm8782_vm10, %v3274_v39, %v3335_v29  ;;  %v9093_v10 = vpack.c.bf16 %v2923_v26, %v2922_v11  ;;  %v6553_v37 = vpop.f32.mrb[156].mxu0  ;;  %v7406_v25 = vadd.f32 %v7405_v6, %v8955_v63  ;;  %v3195_v26 = vld [vmem:[#allocation2 + $0x180] sm:$0xff] }
 0x23a   : > { %3188 = vst [vmem:[#allocation2 + $0x138] sm:$0xff] %v9087_v36  ;;  %3337 = vst [vmem:[#allocation2 + $0x148] sm:$0xff] %v9091_v8  ;;  %v2853_v17 = vmul.f32 %v9054_v49, %v7398_v48  ;;  %v6554_v46 = vpop.f32.mrb[157].mxu0  ;;  %7175 = vmatprep.mubr.bf16.mxu1 %v9091_v8  ;;  %v3344_v48 = vld [vmem:[#allocation2 + $0x190] sm:$0xff] }
 0x23b   : > { %2965 = vst [vmem:[#allocation2 + $0x158] sm:$0xff] %v9093_v10  ;;  %v3111_v1 = vshrl.u32 %v9093_v10, 16  ;;  %v3114_v60 = vshll.u32 %v9093_v10, 16  ;;  %v6555_v51 = vadd.f32 %v6554_v46, %v6553_v37  ;;  %v6556_v31 = vpop.f32.mrb[158].mxu0  ;;  %v2854_v23 = vmul.f32 %v9054_v49, %v7406_v25  ;;  %v9158_v46 = vld [vmem:[#allocation2 + $0x8] sm:$0xff] }
 0x23c   : > { %3813 = vmatmul.mubr.bf16.gmra.mrb[208].mxu0 %v9087_v36  ;;  %v2892_v32 = vadd.f32 %v9074_v14, %v2853_v17  ;;  %v6557_v24 = vpop.f32.mrb[159].mxu0 }
 0x23d   : > { %3820 = vmatprep.mubr.bf16.mxu0 %v9093_v10  ;;  %v3113_v63 = vrot.slane %v3111_v1, 7  ;;  %v3275_v43 = vrot.slane %v3114_v60, 1  ;;  %v7393_v55 = vadd.f32 %v6555_v51, %v8721_v19  ;;  %v6558_v12 = vadd.f32 %v6557_v24, %v6556_v31  ;;  %v3351_v51 = vld [vmem:[#allocation2 + $0x20] sm:$0xff]  ;;  %v7834_v31 = vld [vmem:[%s9713_s4 + $0x188] sm:$0xff]   ;;  %v9181_v24 = vld [vmem:[#allocation2 + $0x58] sm:$0xff] }
 0x23e   : > { %v2893_v34 = vadd.f32 %v9074_v14, %v2854_v23  ;;  %v2924_v44 = vmax.f32 %v2892_v32, 0.0  ;;  %v7835_v32 = vld [vmem:[%s9713_s4 + $0x1d0] sm:$0xff]  }
 0x23f   : > { %v3116_v58 = vor.u32 %v3114_v60, %v3113_v63  ;;  %v3276_v45 = vor.u32 %v3275_v43, %v3111_v1  ;;  %v7394_v42 = vadd.f32 %v7393_v55, %v8944_v47  ;;  %v7401_v40 = vadd.f32 %v6558_v12, %v8729_v21  ;;  %v3352_v1 = vld [vmem:[#allocation2 + $0x28] sm:$0xff]  ;;  %v9168_v60 = vld [vmem:[#allocation2 + $0x40] sm:$0xff]  ;;  %v7836_v23 = vld [vmem:[%s9713_s4 + $0x190] sm:$0xff]  }
 0x240   : > { %v2925_v30 = vmax.f32 %v2893_v34, 0.0  ;;  %v7837_v63 = vld [vmem:[%s9713_s4 + $0x1d8] sm:$0xff]   ;;  %v9187_v55 = vld [vmem:[#allocation2 + $0x70] sm:$0xff]  ;;  %v7840_v34 = vld [vmem:[%s9713_s4 + $0x1a0] sm:$0xff]  }
 0x241   : > { %v9113_v7 = vsel %vm8773_vm9, %v3116_v58, %v3189_v54  ;;  %v9117_v19 = vsel %vm8782_vm10, %v3276_v45, %v3338_v2  ;;  %v2855_v33 = vmul.f32 %v9054_v49, %v7394_v42  ;;  %v7402_v41 = vadd.f32 %v7401_v40, %v8950_v56  ;;  %v3350_v43 = vld [vmem:[#allocation2 + $0x18] sm:$0xff]  ;;  %v7839_v2 = vld [vmem:[%s9713_s4 + $0x1e0] sm:$0xff]   ;;  %v9199_v58 = vld [vmem:[#allocation2 + $0x88] sm:$0xff] }
 0x242   : > { %3191 = vst [vmem:[#allocation2 + $0x150] sm:$0xff] %v9113_v7  ;;  %3340 = vst [vmem:[#allocation2 + $0x160] sm:$0xff] %v9117_v19  ;;  %v9123_v47 = vpack.c.bf16 %v2925_v30, %v2924_v44  ;;  %7176 = vmatmul.mubr.bf16.gmra.mrb[120].mxu1 %v9117_v19  ;;  %v3354_v12 = vld [vmem:[#allocation2 + $0x38] sm:$0xff]  ;;  %v7841_v45 = vld [vmem:[%s9713_s4 + $0x1e8] sm:$0xff]  }
 0x243   : > { %v2894_v21 = vadd.f32 %v9074_v14, %v2855_v33  ;;  %v2856_v28 = vmul.f32 %v9054_v49, %v7402_v41  ;;  %v7838_v54 = vld [vmem:[%s9713_s4 + $0x198] sm:$0xff]   ;;  %v3353_v42 = vld [vmem:[#allocation2 + $0x30] sm:$0xff]  ;;  %v9205_v40 = vld [vmem:[#allocation2 + $0xa0] sm:$0xff] }
 0x244   : > { %3821 = vmatmul.mubr.bf16.gmra.mrb[212].mxu0 %v9113_v7  ;;  %v3118_v4 = vshrl.u32 %v9123_v47, 16  ;;  %v3121_v3 = vshll.u32 %v9123_v47, 16  ;;  %v3357_v44 = vld [vmem:[#allocation2 + $0x50] sm:$0xff]  ;;  %v7842_v30 = vld [vmem:[%s9713_s4 + $0x1a8] sm:$0xff]  }
 0x245   : > { %3828 = vmatprep.mubr.bf16.mxu0 %v9123_v47  ;;  %v2895_v56 = vadd.f32 %v9074_v14, %v2856_v28  ;;  %v2926_v62 = vmax.f32 %v2894_v21, 0.0  ;;  %v7843_v33 = vld [vmem:[%s9713_s4 + $0x1f0] sm:$0xff]   ;;  %v9217_v21 = vld [vmem:[#allocation2 + $0xb8] sm:$0xff] }
 0x246   : > { %v3120_v5 = vrot.slane %v3118_v4, 7  ;;  %v3277_v52 = vrot.slane %v3121_v3, 1  ;;  %v7844_v41 = vld [vmem:[%s9713_s4 + $0x1b0] sm:$0xff]   ;;  %v7845_v28 = vld [vmem:[%s9713_s4 + $0x1f8] sm:$0xff]  }
 0x247   : > { %v2927_v35 = vmax.f32 %v2895_v56, 0.0  ;;  %v3360_v56 = vld [vmem:[#allocation2 + $0x68] sm:$0xff] }
 0x248   : > { %v3123_v13 = vor.u32 %v3121_v3, %v3120_v5  ;;  %v3278_v29 = vor.u32 %v3277_v52, %v3118_v4  ;;  %v3356_v4 = vld [vmem:[#allocation2 + $0x48] sm:$0xff]  ;;  %v9223_v3 = vld [vmem:[#allocation2 + $0xd0] sm:$0xff]  ;;  %v7846_v5 = vld [vmem:[%s9713_s4 + $0x1b8] sm:$0xff]  }
 0x249   : > { %v9133_v15 = vpack.c.bf16 %v2927_v35, %v2926_v62  ;;  %v7847_v52 = vld [vmem:[%s9713_s4 + $0x200] sm:$0xff]   ;;  %v3362_v62 = vld [vmem:[#allocation2 + $0x78] sm:$0xff] }
 0x24a   : > { %v9137_v49 = vsel %vm8773_vm9, %v3123_v13, %v3192_v38  ;;  %v9141_v53 = vsel %vm8782_vm10, %v3278_v29, %v3341_v50  ;;  %v3359_v38 = vld [vmem:[#allocation2 + $0x60] sm:$0xff]  ;;  %v3366_v35 = vld [vmem:[#allocation2 + $0x98] sm:$0xff]  ;;  %v9236_v13 = vld [vmem:[#allocation2 + $0x90] sm:$0xff] }
 0x24b   : > { %3194 = vst [vmem:[#allocation2 + $0x168] sm:$0xff] %v9137_v49  ;;  %3343 = vst [vmem:[#allocation2 + $0x178] sm:$0xff] %v9141_v53  ;;  %v3125_v14 = vshrl.u32 %v9133_v15, 16  ;;  %v3128_v27 = vshll.u32 %v9133_v15, 16  ;;  %7179 = vmatprep.mubr.bf16.mxu1 %v9141_v53  ;;  %v3363_v50 = vld [vmem:[#allocation2 + $0x80] sm:$0xff]  ;;  %v7849_v29 = vld [vmem:[%s9713_s4 + $0x210] sm:$0xff]  }
 0x24c   : > { %3829 = vmatmul.mubr.bf16.gmra.mrb[216].mxu0 %v9137_v49 }
 0x24d   : > { %3836 = vmatprep.mubr.bf16.mxu0 %v9133_v15  ;;  %v3127_v39 = vrot.slane %v3125_v14, 7  ;;  %v3279_v11 = vrot.slane %v3128_v27, 1 }
 0x24f   : > { %v3130_v6 = vor.u32 %v3128_v27, %v3127_v39  ;;  %v3280_v37 = vor.u32 %v3279_v11, %v3125_v14  ;;  %v9266_v14 = vld [vmem:[#allocation2 + $0xd8] sm:$0xff]  ;;  %v7851_v39 = vld [vmem:[%s9713_s4 + $0x220] sm:$0xff]   ;;  %v7852_v11 = vld [vmem:[%s9713_s4 + $0x228] sm:$0xff]  }
 0x250   : > { %v9269_v27 = vld [vmem:[#allocation2 + $0xf8] sm:$0xff] }
 0x251   : > { %v9152_v17 = vsel %vm8773_vm9, %v3130_v6, %v3195_v26  ;;  %v3345_v25 = vsel %vm8782_vm10, %v3280_v37, %v3344_v48  ;;  %v9278_v26 = vld [vmem:[#allocation2 + $0xf0] sm:$0xff] }
 0x252   : > { %3197 = vst [vmem:[#allocation2 + $0x180] sm:$0xff] %v9152_v17  ;;  %3346 = vst [vmem:[#allocation2 + $0x190] sm:$0xff] %v3345_v25  ;;  %7180 = vmatmul.mubr.bf16.gmra.mrb[124].mxu1 %v3345_v25  ;;  %v9281_v48 = vld [vmem:[#allocation2 + $0x110] sm:$0xff] }
 0x253   : > { %7199 = vmatprep.mubr.bf16.mxu1 %v9158_v46  ;;  %v7853_v37 = vld [vmem:[%s9713_s4 + $0x230] sm:$0xff]  }
 0x254   : > { %3837 = vmatmul.mubr.bf16.gmra.mrb[220].mxu0 %v9152_v17 }
 0x255   : > { %4182 = vmatprep.mubr.bf16.mxu0 %v9158_v46 }
 0x25a   : > { %7200 = vmatmul.mubr.bf16.vlgmr.msra.gmra.mrb[96].mxu1 %v3352_v1 }
 0x25b   : > { %7203 = vmatprep.mubr.bf16.mxu1 %v9168_v60  ;;  %6856 = vmatpush3.bf16.msra.mxu1 %v7832_v9 }
 0x25c   : > { %4183 = vmatmul.mubr.bf16.vlgmr.msra.gmra.mrb[224].mxu0 %v9158_v46  ;;  %6857 = vmatprep.subr.bf16.mxu1 %v7833_v18 }
 0x25d   : > { %4190 = vmatprep.mubr.bf16.mxu0 %v3351_v51 }
 0x25f   : > { %6858 = vmatpush3.bf16.msra.mxu1 %v7834_v31  ;;  %v7854_v31 = vld [vmem:[%s9713_s4 + $0x238] sm:$0xff]  }
 0x260   : > { %6859 = vmatprep.subr.bf16.mxu1 %v7835_v32  ;;  %v3380_v32 = vld [vmem:[#allocation2 + $0x108] sm:$0xff] }
 0x262   : > { %7204 = vmatmul.mubr.bf16.gmra.mrb[100].mxu1 %v9181_v24 }
 0x263   : > { %7207 = vmatprep.mubr.bf16.mxu1 %v9187_v55  ;;  %6860 = vmatpush3.bf16.msra.mxu1 %v7836_v23 }
 0x264   : > { %4191 = vmatmul.mubr.bf16.gmra.mrb[228].mxu0 %v3350_v43  ;;  %6861 = vmatprep.subr.bf16.mxu1 %v7837_v63 }
 0x265   : > { %4198 = vmatprep.mubr.bf16.mxu0 %v3354_v12 }
 0x267   : > { %6862 = vmatpush3.bf16.msra.mxu1 %v7838_v54 }
 0x268   : > { %6863 = vmatprep.subr.bf16.mxu1 %v7839_v2 }
 0x26a   : > { %7208 = vmatmul.mubr.bf16.gmra.mrb[104].mxu1 %v9199_v58 }
 0x26b   : > { %7211 = vmatprep.mubr.bf16.mxu1 %v9205_v40  ;;  %6864 = vmatpush3.bf16.msra.mxu1 %v7840_v34 }
 0x26c   : > { %4199 = vmatmul.mubr.bf16.gmra.mrb[232].mxu0 %v3353_v42  ;;  %6865 = vmatprep.subr.bf16.mxu1 %v7841_v45 }
 0x26d   : > { %4206 = vmatprep.mubr.bf16.mxu0 %v3357_v44 }
 0x26f   : > { %6866 = vmatpush3.bf16.msra.mxu1 %v7842_v30 }
 0x270   : > { %6867 = vmatprep.subr.bf16.mxu1 %v7843_v33 }
 0x272   : > { %7212 = vmatmul.mubr.bf16.gmra.mrb[108].mxu1 %v9217_v21 }
 0x273   : > { %7215 = vmatprep.mubr.bf16.mxu1 %v9223_v3  ;;  %6868 = vmatpush3.bf16.msra.mxu1 %v7844_v41 }
 0x274   : > { %4207 = vmatmul.mubr.bf16.gmra.mrb[236].mxu0 %v3356_v4  ;;  %6869 = vmatprep.subr.bf16.mxu1 %v7845_v28 }
 0x275   : > { %4214 = vmatprep.mubr.bf16.mxu0 %v3360_v56 }
 0x277   : > { %6870 = vmatpush3.bf16.msra.mxu1 %v7846_v5 }
 0x278   : > { %7231 = vmatprep.subr.bf16.mxu1 %v7847_v52 }
 0x27a   : > { %7216 = vmatmul.mubr.bf16.gmra.mrb[112].mxu1 %v9001_v59  ;;  %v9240_v59 = vld [vmem:[#allocation2 + $0xb0] sm:$0xff] }
 0x27b   : > { %7219 = vmatprep.mubr.bf16.mxu1 %v9015_v57  ;;  %v9244_v57 = vld [vmem:[#allocation2 + $0xa8] sm:$0xff] }
 0x27c   : > { %4215 = vmatmul.mubr.bf16.gmra.mrb[240].mxu0 %v3359_v38 }
 0x27d   : > { %4222 = vmatprep.mubr.bf16.mxu0 %v3363_v50 }
 0x282   : > { %7220 = vmatmul.mubr.bf16.gmra.mrb[116].mxu1 %v9031_v20  ;;  %v9248_v20 = vld [vmem:[#allocation2 + $0xc8] sm:$0xff] }
 0x283   : > { %7223 = vmatprep.mubr.bf16.mxu1 %v9064_v16  ;;  %v7848_v16 = vld [vmem:[%s9713_s4 + $0x208] sm:$0xff]  }
 0x284   : > { %4223 = vmatmul.mubr.bf16.gmra.mrb[244].mxu0 %v3362_v62 }
 0x285   : > { %4230 = vmatprep.mubr.bf16.mxu0 %v3366_v35 }
 0x28a   : > { %7224 = vmatmul.mubr.bf16.gmra.mrb[120].mxu1 %v9091_v8  ;;  %v9254_v8 = vld [vmem:[#allocation2 + $0xc0] sm:$0xff] }
 0x28b   : > { %7227 = vmatprep.mubr.bf16.mxu1 %v9117_v19  ;;  %v9257_v19 = vld [vmem:[#allocation2 + $0xe0] sm:$0xff] }
 0x28c   : > { %4231 = vmatmul.mubr.bf16.gmra.mrb[248].mxu0 %v9236_v13 }
 0x28d   : > { %4238 = vmatprep.mubr.bf16.mxu0 %v9240_v59 }
 0x292   : > { %7228 = vmatmul.mubr.bf16.gmra.mrb[124].mxu1 %v9141_v53  ;;  %v7850_v53 = vld [vmem:[%s9713_s4 + $0x218] sm:$0xff]  }
 0x293   : > { %4746 = vmatprep.mubr.bf16.mxu1 %v3354_v12 }
 0x294   : > { %4239 = vmatmul.mubr.bf16.gmra.mrb[252].mxu0 %v9244_v57 }
 0x295   : > { %4246 = vmatprep.mubr.bf16.mxu0 %v9248_v20 }
 0x29a   : > { %4747 = vmatmul.mubr.bf16.vlgmr.msra.gmra.mrb[128].mxu1 %v3353_v42 }
 0x29b   : > { %4754 = vmatprep.mubr.bf16.mxu1 %v3357_v44  ;;  %7232 = vmatpush3.bf16.msra.mxu1 %v7847_v52 }
 0x29c   : > { %4247 = vmatmul.mubr.bf16.gmra.mrb[0].mxu0 %v9254_v8  ;;  %7233 = vmatprep.subr.bf16.mxu1 %v7848_v16 }
 0x29d   : > { %4254 = vmatprep.mubr.bf16.mxu0 %v9257_v19 }
 0x29f   : > { %7234 = vmatpush3.bf16.msra.mxu1 %v7848_v16 }
 0x2a0   : > { %7235 = vmatprep.subr.bf16.mxu1 %v7849_v29 }
 0x2a2   : > { %4755 = vmatmul.mubr.bf16.gmra.mrb[132].mxu1 %v3356_v4 }
 0x2a3   : > { %4762 = vmatprep.mubr.bf16.mxu1 %v3360_v56  ;;  %7236 = vmatpush3.bf16.msra.mxu1 %v7849_v29 }
 0x2a4   : > { %4255 = vmatmul.mubr.bf16.gmra.mrb[4].mxu0 %v9266_v14  ;;  %7237 = vmatprep.subr.bf16.mxu1 %v7850_v53 }
 0x2a5   : > { %4262 = vmatprep.mubr.bf16.mxu0 %v9269_v27 }
 0x2a7   : > { %7238 = vmatpush3.bf16.msra.mxu1 %v7850_v53  ;;  %v4504_v53 = vld [vmem:[#allocation2 + $0x128] sm:$0xff] }
 0x2a8   : > { %7239 = vmatprep.subr.bf16.mxu1 %v7851_v39 }
 0x2aa   : > { %4763 = vmatmul.mubr.bf16.gmra.mrb[136].mxu1 %v3359_v38 }
 0x2ab   : > { %4770 = vmatprep.mubr.bf16.mxu1 %v3363_v50  ;;  %7240 = vmatpush3.bf16.msra.mxu1 %v7851_v39 }
 0x2ac   : > { %4263 = vmatmul.mubr.bf16.gmra.mrb[8].mxu0 %v9278_v26  ;;  %7241 = vmatprep.subr.bf16.mxu1 %v7852_v11 }
 0x2ad   : > { %4270 = vmatprep.mubr.bf16.mxu0 %v9281_v48  ;;  %v6599_v6 = vpop.f32.mrb[160].mxu0 }
 0x2ae   : > { %v6600_v25 = vpop.f32.mrb[161].mxu0 }
 0x2af   : > { %v9287_v9 = vadd.f32 %v6600_v25, %v6599_v6  ;;  %v6602_v1 = vpop.f32.mrb[162].mxu0  ;;  %7242 = vmatpush3.bf16.msra.mxu1 %v7852_v11 }
 0x2b0   : > { %v6603_v18 = vpop.f32.mrb[163].mxu0  ;;  %7243 = vmatprep.subr.bf16.mxu1 %v7853_v37 }
 0x2b1   : > { %v9289_v51 = vadd.f32 %v6603_v18, %v6602_v1 }
 0x2b2   : > { %4771 = vmatmul.mubr.bf16.gmra.mrb[140].mxu1 %v3362_v62 }
 0x2b3   : > { %4778 = vmatprep.mubr.bf16.mxu1 %v3366_v35  ;;  %7244 = vmatpush3.bf16.msra.mxu1 %v7853_v37 }
 0x2b4   : > { %4271 = vmatmul.mubr.bf16.gmra.mrb[12].mxu0 %v3380_v32  ;;  %7245 = vmatprep.subr.bf16.mxu1 %v7854_v31 }
 0x2b5   : > { %4278 = vmatprep.mubr.bf16.mxu0 %v9036_v22  ;;  %v6605_v23 = vpop.f32.mrb[164].mxu0 }
 0x2b6   : > { %v6606_v63 = vpop.f32.mrb[165].mxu0 }
 0x2b7   : > { %v9295_v43 = vadd.f32 %v6606_v63, %v6605_v23  ;;  %v6608_v12 = vpop.f32.mrb[166].mxu0  ;;  %7246 = vmatpush3.bf16.msra.mxu1 %v7854_v31  ;;  %v4506_v23 = vld [vmem:[#allocation2 + $0x138] sm:$0xff] }
 0x2b8   : > { %v6609_v54 = vpop.f32.mrb[167].mxu0 }
 0x2b9   : > { %v9297_v2 = vadd.f32 %v6609_v54, %v6608_v12  ;;  %v4510_v12 = vld [vmem:[#allocation2 + $0x158] sm:$0xff] }
 0x2ba   : > { %4779 = vmatmul.mubr.bf16.gmra.mrb[144].mxu1 %v9236_v13 }
 0x2bb   : > { %4786 = vmatprep.mubr.bf16.mxu1 %v9240_v59 }
 0x2bc   : > { %4279 = vmatmul.mubr.bf16.gmra.mrb[16].mxu0 %v9060_v61 }
 0x2bd   : > { %4286 = vmatprep.mubr.bf16.mxu0 %v9049_v0 }
 0x2be   : > { %v6611_v22 = vpop.f32.mrb[168].mxu0 }
 0x2bf   : > { %v6612_v34 = vpop.f32.mrb[169].mxu0 }
 0x2c0   : > { %v9303_v45 = vadd.f32 %v6612_v34, %v6611_v22  ;;  %v6614_v42 = vpop.f32.mrb[170].mxu0 }
 0x2c1   : > { %v6615_v44 = vpop.f32.mrb[171].mxu0 }
 0x2c2   : > { %v9305_v30 = vadd.f32 %v6615_v44, %v6614_v42  ;;  %4787 = vmatmul.mubr.bf16.gmra.mrb[148].mxu1 %v9244_v57 }
 0x2c3   : > { %4794 = vmatprep.mubr.bf16.mxu1 %v9248_v20 }
 0x2c4   : > { %4287 = vmatmul.mubr.bf16.gmra.mrb[20].mxu0 %v9087_v36 }
 0x2c5   : > { %4294 = vmatprep.mubr.bf16.mxu0 %v9093_v10 }
 0x2c6   : > { %v6617_v61 = vpop.f32.mrb[172].mxu0 }
 0x2c7   : > { %v6618_v33 = vpop.f32.mrb[173].mxu0 }
 0x2c8   : > { %v9311_v41 = vadd.f32 %v6618_v33, %v6617_v61  ;;  %v6620_v0 = vpop.f32.mrb[174].mxu0  ;;  %v4509_v61 = vld [vmem:[#allocation2 + $0x150] sm:$0xff] }
 0x2c9   : > { %v6621_v28 = vpop.f32.mrb[175].mxu0 }
 0x2ca   : > { %v9313_v4 = vadd.f32 %v6621_v28, %v6620_v0  ;;  %4795 = vmatmul.mubr.bf16.gmra.mrb[152].mxu1 %v9254_v8 }
 0x2cb   : > { %4802 = vmatprep.mubr.bf16.mxu1 %v9257_v19 }
 0x2cc   : > { %4295 = vmatmul.mubr.bf16.gmra.mrb[24].mxu0 %v9113_v7 }
 0x2cd   : > { %4302 = vmatprep.mubr.bf16.mxu0 %v9123_v47 }
 0x2cf   : > { %v6623_v36 = vpop.f32.mrb[176].mxu0 }
 0x2d0   : > { %v6624_v56 = vpop.f32.mrb[177].mxu0 }
 0x2d1   : > { %v9319_v5 = vadd.f32 %v6624_v56, %v6623_v36  ;;  %v6626_v10 = vpop.f32.mrb[178].mxu0 }
 0x2d2   : > { %v6627_v52 = vpop.f32.mrb[179].mxu0  ;;  %4803 = vmatmul.mubr.bf16.gmra.mrb[156].mxu1 %v9266_v14 }
 0x2d3   : > { %v9321_v38 = vadd.f32 %v6627_v52, %v6626_v10  ;;  %4810 = vmatprep.mubr.bf16.mxu1 %v9269_v27 }
 0x2d4   : > { %4303 = vmatmul.mubr.bf16.gmra.mrb[28].mxu0 %v9137_v49 }
 0x2d7   : > { %v6629_v50 = vpop.f32.mrb[180].mxu0 }
 0x2d8   : > { %v6630_v7 = vpop.f32.mrb[181].mxu0 }
 0x2d9   : > { %v9326_v62 = vadd.f32 %v6630_v7, %v6629_v50  ;;  %v6632_v35 = vpop.f32.mrb[182].mxu0 }
 0x2da   : > { %v6633_v13 = vpop.f32.mrb[183].mxu0  ;;  %4811 = vmatmul.mubr.bf16.gmra.mrb[160].mxu1 %v9278_v26  ;;  %v4503_v26 = vld [vmem:[#allocation2 + $0x120] sm:$0xff] }
 0x2db   : > { %v9328_v59 = vadd.f32 %v6633_v13, %v6632_v35  ;;  %4818 = vmatprep.mubr.bf16.mxu1 %v9281_v48  ;;  %v4507_v48 = vld [vmem:[#allocation2 + $0x140] sm:$0xff] }
 0x2df   : > { %v6635_v57 = vpop.f32.mrb[184].mxu0 }
 0x2e0   : > { %v6636_v20 = vpop.f32.mrb[185].mxu0 }
 0x2e1   : > { %v9332_v16 = vadd.f32 %v6636_v20, %v6635_v57  ;;  %v6638_v8 = vpop.f32.mrb[186].mxu0 }
 0x2e2   : > { %v6639_v19 = vpop.f32.mrb[187].mxu0  ;;  %4819 = vmatmul.mubr.bf16.gmra.mrb[164].mxu1 %v3380_v32 }
 0x2e3   : > { %v9334_v29 = vadd.f32 %v6639_v19, %v6638_v8  ;;  %4826 = vmatprep.mubr.bf16.mxu1 %v4504_v53 }
 0x2e7   : > { %v6641_v14 = vpop.f32.mrb[188].mxu0 }
 0x2e8   : > { %v6642_v27 = vpop.f32.mrb[189].mxu0 }
 0x2e9   : > { %v9336_v39 = vadd.f32 %v6642_v27, %v6641_v14  ;;  %v6644_v11 = vpop.f32.mrb[190].mxu0 }
 0x2ea   : > { %v6645_v6 = vpop.f32.mrb[191].mxu0  ;;  %4827 = vmatmul.mubr.bf16.gmra.mrb[168].mxu1 %v4503_v26 }
 0x2eb   : > { %v9338_v37 = vadd.f32 %v6645_v6, %v6644_v11  ;;  %4834 = vmatprep.mubr.bf16.mxu1 %v4507_v48 }
 0x2ef   : > { %v6647_v25 = vpop.f32.mrb[192].mxu0 }
 0x2f0   : > { %v6648_v1 = vpop.f32.mrb[193].mxu0 }
 0x2f1   : > { %v9340_v18 = vadd.f32 %v6648_v1, %v6647_v25  ;;  %v6650_v31 = vpop.f32.mrb[194].mxu0 }
 0x2f2   : > { %v6651_v32 = vpop.f32.mrb[195].mxu0  ;;  %4835 = vmatmul.mubr.bf16.gmra.mrb[172].mxu1 %v4506_v23 }
 0x2f3   : > { %v9342_v63 = vadd.f32 %v6651_v32, %v6650_v31  ;;  %4842 = vmatprep.mubr.bf16.mxu1 %v4510_v12 }
 0x2f7   : > { %v6653_v54 = vpop.f32.mrb[196].mxu0 }
 0x2f8   : > { %v6654_v22 = vpop.f32.mrb[197].mxu0 }
 0x2f9   : > { %v9344_v34 = vadd.f32 %v6654_v22, %v6653_v54  ;;  %v6656_v42 = vpop.f32.mrb[198].mxu0 }
 0x2fa   : > { %v6657_v44 = vpop.f32.mrb[199].mxu0  ;;  %4843 = vmatmul.mubr.bf16.gmra.mrb[176].mxu1 %v4509_v61 }
 0x2fb   : > { %v9346_v33 = vadd.f32 %v6657_v44, %v6656_v42  ;;  %4850 = vmatprep.mubr.bf16.mxu1 %v9123_v47 }
 0x2ff   : > { %v6659_v0 = vpop.f32.mrb[200].mxu0 }
 0x300   : > { %v6660_v28 = vpop.f32.mrb[201].mxu0 }
 0x301   : > { %v9349_v36 = vadd.f32 %v6660_v28, %v6659_v0  ;;  %v6662_v56 = vpop.f32.mrb[202].mxu0 }
 0x302   : > { %v6663_v10 = vpop.f32.mrb[203].mxu0  ;;  %4851 = vmatmul.mubr.bf16.gmra.mrb[180].mxu1 %v9137_v49 }
 0x303   : > { %v9351_v52 = vadd.f32 %v6663_v10, %v6662_v56  ;;  %4858 = vmatprep.mubr.bf16.mxu1 %v9133_v15  ;;  %v4499_v10 = vld [vmem:[#allocation2 + $0x100] sm:$0xff] }
 0x307   : > { %v6665_v50 = vpop.f32.mrb[204].mxu0 }
 0x308   : > { %v6666_v7 = vpop.f32.mrb[205].mxu0 }
 0x309   : > { %v9355_v35 = vadd.f32 %v6666_v7, %v6665_v50  ;;  %v6668_v13 = vpop.f32.mrb[206].mxu0 }
 0x30a   : > { %v6669_v57 = vpop.f32.mrb[207].mxu0  ;;  %4859 = vmatmul.mubr.bf16.gmra.mrb[184].mxu1 %v9152_v17 }
 0x30b   : > { %v9357_v20 = vadd.f32 %v6669_v57, %v6668_v13  ;;  %4866 = vmatprep.mubr.bf16.mxu1 %v9158_v46 }
 0x30f   : > { %v6671_v47 = vpop.f32.mrb[208].mxu0 }
 0x310   : > { %v6672_v8 = vpop.f32.mrb[209].mxu0 }
 0x311   : > { %v9361_v19 = vadd.f32 %v6672_v8, %v6671_v47  ;;  %v6674_v53 = vpop.f32.mrb[210].mxu0  ;;  %v4502_v47 = vld [vmem:[#allocation2 + $0x118] sm:$0xff] }
 0x312   : > { %v6675_v49 = vpop.f32.mrb[211].mxu0  ;;  %4867 = vmatmul.mubr.bf16.gmra.mrb[188].mxu1 %v9158_v46 }
 0x313   : > { %v9363_v14 = vadd.f32 %v6675_v49, %v6674_v53  ;;  %7247 = vmatprep.mubr.bf16.mxu1 %v9168_v60 }
 0x317   : > { %v6677_v15 = vpop.f32.mrb[212].mxu0 }
 0x318   : > { %v6678_v27 = vpop.f32.mrb[213].mxu0 }
 0x319   : > { %v9367_v11 = vadd.f32 %v6678_v27, %v6677_v15  ;;  %v6680_v6 = vpop.f32.mrb[214].mxu0 }
 0x31a   : > { %v6681_v17 = vpop.f32.mrb[215].mxu0  ;;  %7248 = vmatmul.mubr.bf16.vlgmr.msra.gmra.mrb[96].mxu1 %v9181_v24 }
 0x31b   : > { %v9369_v26 = vadd.f32 %v6681_v17, %v6680_v6  ;;  %7251 = vmatprep.mubr.bf16.mxu1 %v9187_v55 }
 0x31f   : > { %v6683_v48 = vpop.f32.mrb[216].mxu0 }
 0x320   : > { %v6684_v25 = vpop.f32.mrb[217].mxu0 }
 0x321   : > { %v9373_v1 = vadd.f32 %v6684_v25, %v6683_v48  ;;  %v6686_v31 = vpop.f32.mrb[218].mxu0  ;;  %v4508_v48 = vld [vmem:[#allocation2 + $0x148] sm:$0xff] }
 0x322   : > { %v6687_v32 = vpop.f32.mrb[219].mxu0  ;;  %7252 = vmatmul.mubr.bf16.gmra.mrb[100].mxu1 %v9199_v58  ;;  %v4496_v58 = vld [vmem:[#allocation2 + $0xe8] sm:$0xff] }
 0x323   : > { %v9375_v23 = vadd.f32 %v6687_v32, %v6686_v31  ;;  %7255 = vmatprep.mubr.bf16.mxu1 %v9205_v40 }
 0x327   : > { %v6689_v60 = vpop.f32.mrb[220].mxu0 }
 0x328   : > { %v6690_v12 = vpop.f32.mrb[221].mxu0 }
 0x329   : > { %v9379_v54 = vadd.f32 %v6690_v12, %v6689_v60  ;;  %v6692_v22 = vpop.f32.mrb[222].mxu0 }
 0x32a   : > { %v6693_v24 = vpop.f32.mrb[223].mxu0  ;;  %7256 = vmatmul.mubr.bf16.gmra.mrb[104].mxu1 %v9217_v21 }
 0x32b   : > { %v9381_v42 = vadd.f32 %v6693_v24, %v6692_v22  ;;  %7259 = vmatprep.mubr.bf16.mxu1 %v9223_v3 }
 0x32f   : > { %v6735_v55 = vpop.f32.mrb[224].mxu0 }
 0x330   : > { %v6736_v44 = vpop.f32.mrb[225].mxu0 }
 0x331   : > { %v6737_v61 = vadd.f32 %v6736_v44, %v6735_v55  ;;  %v6738_v0 = vpop.f32.mrb[226].mxu0  ;;  %v4514_v55 = vld [vmem:[#allocation2 + $0x178] sm:$0xff] }
 0x332   : > { %v6739_v28 = vpop.f32.mrb[227].mxu0  ;;  %7260 = vmatmul.mubr.bf16.gmra.mrb[108].mxu1 %v4496_v58 }
 0x333   : > { %v9386_v40 = vadd.f32 %v6737_v61, %v9287_v9  ;;  %v6740_v56 = vadd.f32 %v6739_v28, %v6738_v0  ;;  %7263 = vmatprep.mubr.bf16.mxu1 %v4499_v10  ;;  %v4505_v9 = vld [vmem:[#allocation2 + $0x130] sm:$0xff] }
 0x335   : > { %v9389_v50 = vadd.f32 %v6740_v56, %v9289_v51 }
 0x337   : > { %v6741_v7 = vpop.f32.mrb[228].mxu0 }
 0x338   : > { %v6742_v21 = vpop.f32.mrb[229].mxu0 }
 0x339   : > { %v6743_v13 = vadd.f32 %v6742_v21, %v6741_v7  ;;  %v6744_v3 = vpop.f32.mrb[230].mxu0 }
 0x33a   : > { %v6745_v57 = vpop.f32.mrb[231].mxu0  ;;  %7264 = vmatmul.mubr.bf16.gmra.mrb[112].mxu1 %v4502_v47 }
 0x33b   : > { %v9392_v8 = vadd.f32 %v6743_v13, %v9295_v43  ;;  %v6746_v53 = vadd.f32 %v6745_v57, %v6744_v3  ;;  %7267 = vmatprep.mubr.bf16.mxu1 %v4505_v9  ;;  %v4511_v43 = vld [vmem:[#allocation2 + $0x160] sm:$0xff] }
 0x33d   : > { %v9395_v49 = vadd.f32 %v6746_v53, %v9297_v2 }
 0x33f   : > { %v6747_v15 = vpop.f32.mrb[232].mxu0 }
 0x340   : > { %v6748_v27 = vpop.f32.mrb[233].mxu0 }
 0x341   : > { %v6749_v51 = vadd.f32 %v6748_v27, %v6747_v15  ;;  %v6750_v6 = vpop.f32.mrb[234].mxu0 }
 0x342   : > { %v6751_v17 = vpop.f32.mrb[235].mxu0  ;;  %7268 = vmatmul.mubr.bf16.gmra.mrb[116].mxu1 %v4508_v48 }
 0x343   : > { %v9398_v25 = vadd.f32 %v6749_v51, %v9303_v45  ;;  %v6752_v31 = vadd.f32 %v6751_v17, %v6750_v6  ;;  %7271 = vmatprep.mubr.bf16.mxu1 %v4511_v43  ;;  %v4517_v45 = vld [vmem:[#allocation2 + $0x190] sm:$0xff] }
 0x345   : > { %v9401_v32 = vadd.f32 %v6752_v31, %v9305_v30 }
 0x347   : > { %v6753_v60 = vpop.f32.mrb[236].mxu0 }
 0x348   : > { %v6754_v12 = vpop.f32.mrb[237].mxu0 }
 0x349   : > { %v6755_v2 = vadd.f32 %v6754_v12, %v6753_v60  ;;  %v6756_v22 = vpop.f32.mrb[238].mxu0 }
 0x34a   : > { %v6757_v24 = vpop.f32.mrb[239].mxu0  ;;  %7272 = vmatmul.mubr.bf16.gmra.mrb[120].mxu1 %v4514_v55 }
 0x34b   : > { %v9404_v44 = vadd.f32 %v6755_v2, %v9311_v41  ;;  %v6758_v61 = vadd.f32 %v6757_v24, %v6756_v22  ;;  %7275 = vmatprep.mubr.bf16.mxu1 %v4517_v45 }
 0x34d   : > { %v9407_v0 = vadd.f32 %v6758_v61, %v9313_v4 }
 0x34f   : > { %v6759_v28 = vpop.f32.mrb[240].mxu0 }
 0x350   : > { %v6760_v58 = vpop.f32.mrb[241].mxu0 }
 0x351   : > { %v6761_v30 = vadd.f32 %v6760_v58, %v6759_v28  ;;  %v6762_v56 = vpop.f32.mrb[242].mxu0 }
 0x352   : > { %v6763_v10 = vpop.f32.mrb[243].mxu0  ;;  %7276 = vmatmul.mubr.bf16.gmra.mrb[124].mxu1 %v9158_v46 }
 0x353   : > { %v9410_v7 = vadd.f32 %v6761_v30, %v9319_v5  ;;  %v6764_v21 = vadd.f32 %v6763_v10, %v6762_v56 }
 0x355   : > { %v9414_v41 = vadd.f32 %v6764_v21, %v9321_v38 }
 0x357   : > { %v6765_v13 = vpop.f32.mrb[244].mxu0 }
 0x358   : > { %v6766_v3 = vpop.f32.mrb[245].mxu0 }
 0x359   : > { %v6767_v57 = vadd.f32 %v6766_v3, %v6765_v13  ;;  %v6768_v47 = vpop.f32.mrb[246].mxu0 }
 0x35a   : > { %v6769_v4 = vpop.f32.mrb[247].mxu0 }
 0x35b   : > { %v9417_v53 = vadd.f32 %v6767_v57, %v9326_v62  ;;  %v6770_v9 = vadd.f32 %v6769_v4, %v6768_v47 }
 0x35d   : > { %v9420_v15 = vadd.f32 %v6770_v9, %v9328_v59 }
 0x35f   : > { %v6771_v5 = vpop.f32.mrb[248].mxu0 }
 0x360   : > { %v6772_v27 = vpop.f32.mrb[249].mxu0 }
 0x361   : > { %v6773_v51 = vadd.f32 %v6772_v27, %v6771_v5  ;;  %v6774_v6 = vpop.f32.mrb[250].mxu0 }
 0x362   : > { %v6775_v46 = vpop.f32.mrb[251].mxu0 }
 0x363   : > { %v9423_v38 = vadd.f32 %v6773_v51, %v9332_v16  ;;  %v6776_v17 = vadd.f32 %v6775_v46, %v6774_v6 }
 0x365   : > { %v9426_v48 = vadd.f32 %v6776_v17, %v9334_v29 }
 0x367   : > { %v6777_v31 = vpop.f32.mrb[252].mxu0 }
 0x368   : > { %v6778_v43 = vpop.f32.mrb[253].mxu0 }
 0x369   : > { %v6779_v62 = vadd.f32 %v6778_v43, %v6777_v31  ;;  %v6780_v60 = vpop.f32.mrb[254].mxu0 }
 0x36a   : > { %v6781_v12 = vpop.f32.mrb[255].mxu0 }
 0x36b   : > { %v9429_v59 = vadd.f32 %v6779_v62, %v9336_v39  ;;  %v6782_v2 = vadd.f32 %v6781_v12, %v6780_v60 }
 0x36d   : > { %v9432_v22 = vadd.f32 %v6782_v2, %v9338_v37  ;;  %v6871_v24 = vpop.f32.mrb[128].mxu1 }
 0x36e   : > { %v6872_v16 = vpop.f32.mrb[129].mxu1 }
 0x36f   : > { %v6783_v55 = vpop.f32.mrb[0].mxu0  ;;  %v6873_v45 = vadd.f32 %v6872_v16, %v6871_v24  ;;  %v6874_v28 = vpop.f32.mrb[130].mxu1 }
 0x370   : > { %v6784_v61 = vpop.f32.mrb[1].mxu0  ;;  %v6875_v30 = vpop.f32.mrb[131].mxu1 }
 0x371   : > { %v6785_v29 = vadd.f32 %v6784_v61, %v6783_v55  ;;  %v6786_v58 = vpop.f32.mrb[2].mxu0  ;;  %v6876_v10 = vadd.f32 %v6875_v30, %v6874_v28  ;;  %v9435_v21 = vadd.f32 %v9386_v40, %v6873_v45 }
 0x372   : > { %v6787_v56 = vpop.f32.mrb[3].mxu0 }
 0x373   : > { %v9438_v39 = vadd.f32 %v6785_v29, %v9340_v18  ;;  %v6788_v13 = vadd.f32 %v6787_v56, %v6786_v58  ;;  %v9441_v37 = vadd.f32 %v9389_v50, %v6876_v10 }
 0x375   : > { %v9444_v3 = vadd.f32 %v6788_v13, %v9342_v63  ;;  %v6877_v57 = vpop.f32.mrb[132].mxu1 }
 0x376   : > { %v6878_v4 = vpop.f32.mrb[133].mxu1 }
 0x377   : > { %v6789_v47 = vpop.f32.mrb[4].mxu0  ;;  %v6879_v5 = vadd.f32 %v6878_v4, %v6877_v57  ;;  %v6880_v27 = vpop.f32.mrb[134].mxu1 }
 0x378   : > { %v6790_v9 = vpop.f32.mrb[5].mxu0  ;;  %v6881_v40 = vpop.f32.mrb[135].mxu1 }
 0x379   : > { %v6791_v51 = vadd.f32 %v6790_v9, %v6789_v47  ;;  %v6792_v6 = vpop.f32.mrb[6].mxu0  ;;  %v6882_v17 = vadd.f32 %v6881_v40, %v6880_v27  ;;  %v9447_v18 = vadd.f32 %v9392_v8, %v6879_v5 }
 0x37a   : > { %v6793_v46 = vpop.f32.mrb[7].mxu0 }
 0x37b   : > { %v9450_v50 = vadd.f32 %v6791_v51, %v9344_v34  ;;  %v6794_v31 = vadd.f32 %v6793_v46, %v6792_v6  ;;  %v9453_v63 = vadd.f32 %v9395_v49, %v6882_v17 }
 0x37d   : > { %v9456_v43 = vadd.f32 %v6794_v31, %v9346_v33  ;;  %v6883_v62 = vpop.f32.mrb[136].mxu1 }
 0x37e   : > { %v6884_v12 = vpop.f32.mrb[137].mxu1 }
 0x37f   : > { %v6795_v60 = vpop.f32.mrb[8].mxu0  ;;  %v6885_v24 = vadd.f32 %v6884_v12, %v6883_v62  ;;  %v6886_v55 = vpop.f32.mrb[138].mxu1 }
 0x380   : > { %v6796_v2 = vpop.f32.mrb[9].mxu0  ;;  %v6887_v8 = vpop.f32.mrb[139].mxu1 }
 0x381   : > { %v6797_v16 = vadd.f32 %v6796_v2, %v6795_v60  ;;  %v6798_v61 = vpop.f32.mrb[10].mxu0  ;;  %v6888_v28 = vadd.f32 %v6887_v8, %v6886_v55  ;;  %v9459_v34 = vadd.f32 %v9398_v25, %v6885_v24 }
 0x382   : > { %v6799_v45 = vpop.f32.mrb[11].mxu0 }
 0x383   : > { %v9462_v49 = vadd.f32 %v6797_v16, %v9349_v36  ;;  %v6800_v29 = vadd.f32 %v6799_v45, %v6798_v61  ;;  %v9465_v33 = vadd.f32 %v9401_v32, %v6888_v28 }
 0x385   : > { %v9468_v58 = vadd.f32 %v6800_v29, %v9351_v52  ;;  %v6889_v30 = vpop.f32.mrb[140].mxu1 }
 0x386   : > { %v6890_v10 = vpop.f32.mrb[141].mxu1 }
 0x387   : > { %v6801_v56 = vpop.f32.mrb[12].mxu0  ;;  %v6891_v57 = vadd.f32 %v6890_v10, %v6889_v30  ;;  %v6892_v47 = vpop.f32.mrb[142].mxu1 }
 0x388   : > { %v6802_v13 = vpop.f32.mrb[13].mxu0  ;;  %v6893_v25 = vpop.f32.mrb[143].mxu1 }
 0x389   : > { %v6803_v4 = vadd.f32 %v6802_v13, %v6801_v56  ;;  %v6804_v9 = vpop.f32.mrb[14].mxu0  ;;  %v6894_v27 = vadd.f32 %v6893_v25, %v6892_v47  ;;  %v9471_v36 = vadd.f32 %v9404_v44, %v6891_v57 }
 0x38a   : > { %v6805_v5 = vpop.f32.mrb[15].mxu0 }
 0x38b   : > { %v9474_v32 = vadd.f32 %v6803_v4, %v9355_v35  ;;  %v6806_v51 = vadd.f32 %v6805_v5, %v6804_v9  ;;  %v9477_v52 = vadd.f32 %v9407_v0, %v6894_v27 }
 0x38d   : > { %v9480_v6 = vadd.f32 %v6806_v51, %v9357_v20  ;;  %v6895_v40 = vpop.f32.mrb[144].mxu1 }
 0x38e   : > { %v6896_v17 = vpop.f32.mrb[145].mxu1 }
 0x38f   : > { %v6807_v46 = vpop.f32.mrb[16].mxu0  ;;  %v6897_v62 = vadd.f32 %v6896_v17, %v6895_v40  ;;  %v6898_v60 = vpop.f32.mrb[146].mxu1 }
 0x390   : > { %v6808_v31 = vpop.f32.mrb[17].mxu0  ;;  %v6899_v44 = vpop.f32.mrb[147].mxu1 }
 0x391   : > { %v6809_v12 = vadd.f32 %v6808_v31, %v6807_v46  ;;  %v6810_v2 = vpop.f32.mrb[18].mxu0  ;;  %v6900_v55 = vadd.f32 %v6899_v44, %v6898_v60  ;;  %v9483_v35 = vadd.f32 %v9410_v7, %v6897_v62 }
 0x392   : > { %v6811_v24 = vpop.f32.mrb[19].mxu0 }
 0x393   : > { %v9486_v0 = vadd.f32 %v6809_v12, %v9361_v19  ;;  %v6812_v16 = vadd.f32 %v6811_v24, %v6810_v2  ;;  %v9489_v20 = vadd.f32 %v9414_v41, %v6900_v55 }
 0x395   : > { %v9492_v61 = vadd.f32 %v6812_v16, %v9363_v14  ;;  %v6901_v8 = vpop.f32.mrb[148].mxu1 }
 0x396   : > { %v6902_v28 = vpop.f32.mrb[149].mxu1 }
 0x397   : > { %v6813_v45 = vpop.f32.mrb[20].mxu0  ;;  %v6903_v30 = vadd.f32 %v6902_v28, %v6901_v8  ;;  %v6904_v56 = vpop.f32.mrb[150].mxu1 }
 0x398   : > { %v6814_v29 = vpop.f32.mrb[21].mxu0  ;;  %v6905_v7 = vpop.f32.mrb[151].mxu1 }
 0x399   : > { %v6815_v10 = vadd.f32 %v6814_v29, %v6813_v45  ;;  %v6816_v13 = vpop.f32.mrb[22].mxu0  ;;  %v6906_v47 = vadd.f32 %v6905_v7, %v6904_v56  ;;  %v9495_v19 = vadd.f32 %v9417_v53, %v6903_v30 }
 0x39a   : > { %v6817_v57 = vpop.f32.mrb[23].mxu0 }
 0x39b   : > { %v9498_v41 = vadd.f32 %v6815_v10, %v9367_v11  ;;  %v6818_v4 = vadd.f32 %v6817_v57, %v6816_v13  ;;  %v9501_v14 = vadd.f32 %v9420_v15, %v6906_v47 }
 0x39d   : > { %v9504_v9 = vadd.f32 %v6818_v4, %v9369_v26  ;;  %v6907_v25 = vpop.f32.mrb[152].mxu1 }
 0x39e   : > { %v6908_v27 = vpop.f32.mrb[153].mxu1 }
 0x39f   : > { %v6819_v5 = vpop.f32.mrb[24].mxu0  ;;  %v6909_v40 = vadd.f32 %v6908_v27, %v6907_v25  ;;  %v6910_v46 = vpop.f32.mrb[154].mxu1 }
 0x3a0   : > { %v6820_v51 = vpop.f32.mrb[25].mxu0  ;;  %v6911_v53 = vpop.f32.mrb[155].mxu1 }
 0x3a1   : > { %v6821_v17 = vadd.f32 %v6820_v51, %v6819_v5  ;;  %v6822_v31 = vpop.f32.mrb[26].mxu0  ;;  %v6912_v60 = vadd.f32 %v6911_v53, %v6910_v46  ;;  %v9507_v11 = vadd.f32 %v9423_v38, %v6909_v40 }
 0x3a2   : > { %v6823_v62 = vpop.f32.mrb[27].mxu0 }
 0x3a3   : > { %v9510_v15 = vadd.f32 %v6821_v17, %v9373_v1  ;;  %v6824_v12 = vadd.f32 %v6823_v62, %v6822_v31  ;;  %v9513_v26 = vadd.f32 %v9426_v48, %v6912_v60 }
 0x3a5   : > { %v9516_v2 = vadd.f32 %v6824_v12, %v9375_v23  ;;  %v6913_v44 = vpop.f32.mrb[156].mxu1 }
 0x3a6   : > { %v6914_v55 = vpop.f32.mrb[157].mxu1 }
 0x3a7   : > { %v6825_v24 = vpop.f32.mrb[28].mxu0  ;;  %v6915_v8 = vadd.f32 %v6914_v55, %v6913_v44  ;;  %v6916_v45 = vpop.f32.mrb[158].mxu1 }
 0x3a8   : > { %v6826_v16 = vpop.f32.mrb[29].mxu0  ;;  %v6917_v38 = vpop.f32.mrb[159].mxu1 }
 0x3a9   : > { %v6827_v28 = vadd.f32 %v6826_v16, %v6825_v24  ;;  %v6828_v29 = vpop.f32.mrb[30].mxu0  ;;  %v6918_v56 = vadd.f32 %v6917_v38, %v6916_v45  ;;  %v9519_v1 = vadd.f32 %v9429_v59, %v6915_v8 }
 0x3aa   : > { %v6829_v30 = vpop.f32.mrb[31].mxu0 }
 0x3ab   : > { %v9522_v48 = vadd.f32 %v6827_v28, %v9379_v54  ;;  %v6830_v10 = vadd.f32 %v6829_v30, %v6828_v29  ;;  %v9525_v23 = vadd.f32 %v9432_v22, %v6918_v56 }
 0x3ad   : > { %v9528_v13 = vadd.f32 %v6830_v10, %v9381_v42  ;;  %v6919_v7 = vpop.f32.mrb[160].mxu1 }
 0x3ae   : > { %v6920_v57 = vpop.f32.mrb[161].mxu1 }
 0x3af   : > { %v6921_v47 = vadd.f32 %v6920_v57, %v6919_v7  ;;  %v6922_v4 = vpop.f32.mrb[162].mxu1 }
 0x3b0   : > { %v6923_v25 = vpop.f32.mrb[163].mxu1 }
 0x3b1   : > { %v6924_v5 = vadd.f32 %v6923_v25, %v6922_v4  ;;  %v9531_v27 = vadd.f32 %v9438_v39, %v6921_v47 }
 0x3b3   : > { %v9534_v59 = vadd.f32 %v9444_v3, %v6924_v5 }
 0x3b5   : > { %v6925_v54 = vpop.f32.mrb[164].mxu1 }
 0x3b6   : > { %v6926_v51 = vpop.f32.mrb[165].mxu1 }
 0x3b7   : > { %v6927_v40 = vadd.f32 %v6926_v51, %v6925_v54  ;;  %v6928_v22 = vpop.f32.mrb[166].mxu1 }
 0x3b8   : > { %v6929_v46 = vpop.f32.mrb[167].mxu1 }
 0x3b9   : > { %v6930_v17 = vadd.f32 %v6929_v46, %v6928_v22  ;;  %v9537_v42 = vadd.f32 %v9450_v50, %v6927_v40 }
 0x3bb   : > { %v9540_v31 = vadd.f32 %v9456_v43, %v6930_v17 }
 0x3bd   : > { %v6931_v53 = vpop.f32.mrb[168].mxu1 }
 0x3be   : > { %v6932_v62 = vpop.f32.mrb[169].mxu1 }
 0x3bf   : > { %v6933_v60 = vadd.f32 %v6932_v62, %v6931_v53  ;;  %v6934_v39 = vpop.f32.mrb[170].mxu1 }
 0x3c0   : > { %v6935_v12 = vpop.f32.mrb[171].mxu1 }
 0x3c1   : > { %v6936_v44 = vadd.f32 %v6935_v12, %v6934_v39  ;;  %v9543_v3 = vadd.f32 %v9462_v49, %v6933_v60 }
 0x3c3   : > { %v9546_v24 = vadd.f32 %v9468_v58, %v6936_v44 }
 0x3c5   : > { %v6937_v55 = vpop.f32.mrb[172].mxu1 }
 0x3c6   : > { %v6938_v16 = vpop.f32.mrb[173].mxu1 }
 0x3c7   : > { %v6939_v8 = vadd.f32 %v6938_v16, %v6937_v55  ;;  %v6940_v50 = vpop.f32.mrb[174].mxu1 }
 0x3c8   : > { %v6941_v45 = vpop.f32.mrb[175].mxu1 }
 0x3c9   : > { %v6942_v28 = vadd.f32 %v6941_v45, %v6940_v50  ;;  %v9549_v43 = vadd.f32 %v9474_v32, %v6939_v8  ;;  %v9587_v45 = vld [vmem:[%s9715_s6] ss:$0 sm:$0xff] }
 0x3cb   : > { %v9552_v29 = vadd.f32 %v9480_v6, %v6942_v28 }
 0x3cd   : > { %v6943_v38 = vpop.f32.mrb[176].mxu1 }
 0x3ce   : > { %v6944_v30 = vpop.f32.mrb[177].mxu1 }
 0x3cf   : > { %v6945_v56 = vadd.f32 %v6944_v30, %v6943_v38  ;;  %v6946_v49 = vpop.f32.mrb[178].mxu1 }
 0x3d0   : > { %v6947_v10 = vpop.f32.mrb[179].mxu1 }
 0x3d1   : > { %v6948_v7 = vadd.f32 %v6947_v10, %v6946_v49  ;;  %v9555_v58 = vadd.f32 %v9486_v0, %v6945_v56 }
 0x3d3   : > { %v9558_v57 = vadd.f32 %v9492_v61, %v6948_v7 }
 0x3d5   : > { %v6949_v47 = vpop.f32.mrb[180].mxu1 }
 0x3d6   : > { %v6950_v4 = vpop.f32.mrb[181].mxu1 }
 0x3d7   : > { %v6951_v25 = vadd.f32 %v6950_v4, %v6949_v47  ;;  %v6952_v32 = vpop.f32.mrb[182].mxu1 }
 0x3d8   : > { %v6953_v5 = vpop.f32.mrb[183].mxu1 }
 0x3d9   : > { %v6954_v54 = vadd.f32 %v6953_v5, %v6952_v32  ;;  %v9561_v6 = vadd.f32 %v9498_v41, %v6951_v25 }
 0x3db   : > { %v9564_v51 = vadd.f32 %v9504_v9, %v6954_v54 }
 0x3dd   : > { %v6955_v40 = vpop.f32.mrb[184].mxu1 }
 0x3de   : > { %v6956_v22 = vpop.f32.mrb[185].mxu1 }
 0x3df   : > { %v6957_v46 = vadd.f32 %v6956_v22, %v6955_v40  ;;  %v6958_v0 = vpop.f32.mrb[186].mxu1 }
 0x3e0   : > { %v6959_v17 = vpop.f32.mrb[187].mxu1 }
 0x3e1   : > { %v6960_v53 = vadd.f32 %v6959_v17, %v6958_v0  ;;  %v9567_v61 = vadd.f32 %v9510_v15, %v6957_v46  ;;  %v9581_v15 = vld [vmem:[%s9714_s5] ss:$0 sm:$0xff] }
 0x3e3   : > { %v9570_v62 = vadd.f32 %v9516_v2, %v6960_v53 }
 0x3e5   : > { %v6961_v60 = vpop.f32.mrb[188].mxu1 }
 0x3e6   : > { %v6962_v39 = vpop.f32.mrb[189].mxu1 }
 0x3e7   : > { %v6963_v12 = vadd.f32 %v6962_v39, %v6961_v60  ;;  %v6964_v41 = vpop.f32.mrb[190].mxu1 }
 0x3e8   : > { %v6965_v44 = vpop.f32.mrb[191].mxu1 }
 0x3e9   : > { %v6966_v55 = vadd.f32 %v6965_v44, %v6964_v41  ;;  %v9573_v9 = vadd.f32 %v9522_v48, %v6963_v12 }
 0x3eb   : > { %v9576_v16 = vadd.f32 %v9528_v13, %v6966_v55 }
 0x3ed   : > { %v7249_v8 = vpop.f32.mrb[96].mxu1 }
 0x3ee   : > { %v7409_v2 = vadd.f32 %v9447_v18, %v7249_v8  ;;  %v4909_v50 = vpop.f32.mrb[97].mxu1 }
 0x3ef   : > { %v7412_v48 = vadd.f32 %v9435_v21, %v4909_v50  ;;  %v7250_v28 = vpop.f32.mrb[98].mxu1 }
 0x3f0   : > { %v5077_v13 = vmul.f32 %v7409_v2, %v9581_v15  ;;  %v7415_v38 = vadd.f32 %v9453_v63, %v7250_v28  ;;  %v4912_v30 = vpop.f32.mrb[99].mxu1 }
 0x3f1   : > { %v5075_v56 = vmul.f32 %v7412_v48, %v9581_v15  ;;  %v7418_v49 = vadd.f32 %v9441_v37, %v4912_v30 }
 0x3f2   : > { %v5116_v18 = vadd.f32 %v9587_v45, %v5077_v13  ;;  %v5078_v10 = vmul.f32 %v7415_v38, %v9581_v15 }
 0x3f3   : > { %v5114_v7 = vadd.f32 %v9587_v45, %v5075_v56  ;;  %v5076_v47 = vmul.f32 %v7418_v49, %v9581_v15 }
 0x3f4   : > { %v5117_v21 = vadd.f32 %v9587_v45, %v5078_v10  ;;  %v5148_v63 = vmax.f32 %v5116_v18, 0.0 }
 0x3f5   : > { %v5115_v4 = vadd.f32 %v9587_v45, %v5076_v47  ;;  %v7253_v25 = vpop.f32.mrb[100].mxu1  ;;  %v5146_v37 = vmax.f32 %v5114_v7, 0.0 }
 0x3f6   : > { %v5149_v32 = vmax.f32 %v5117_v21, 0.0  ;;  %v7421_v5 = vadd.f32 %v9471_v36, %v7253_v25  ;;  %v4925_v54 = vpop.f32.mrb[101].mxu1 }
 0x3f7   : > { %v5147_v40 = vmax.f32 %v5115_v4, 0.0  ;;  %v7424_v22 = vadd.f32 %v9459_v34, %v4925_v54  ;;  %v7254_v46 = vpop.f32.mrb[102].mxu1 }
 0x3f8   : > { %v6088_v0 = vpack.c.bf16 %v5149_v32, %v5148_v63  ;;  %v5081_v17 = vmul.f32 %v7421_v5, %v9581_v15  ;;  %v7427_v53 = vadd.f32 %v9477_v52, %v7254_v46  ;;  %v4928_v60 = vpop.f32.mrb[103].mxu1 }
 0x3f9   : > { %v6083_v36 = vpack.c.bf16 %v5147_v40, %v5146_v37  ;;  %v5079_v39 = vmul.f32 %v7424_v22, %v9581_v15  ;;  %v7430_v12 = vadd.f32 %v9465_v33, %v4928_v60 }
 0x3fa   : > { %6160 = vst [vmem:[%s9605_s21 + $0x8] sm:$0xff] %v6088_v0   ;;  %v5120_v41 = vadd.f32 %v9587_v45, %v5081_v17  ;;  %v5082_v44 = vmul.f32 %v7427_v53, %v9581_v15 }
 0x3fb   : > { %6084 = vst [vmem:[%s9605_s21] sm:$0xff] %v6083_v36   ;;  %v5118_v34 = vadd.f32 %v9587_v45, %v5079_v39  ;;  %v5080_v55 = vmul.f32 %v7430_v12, %v9581_v15 }
 0x3fc   : > { %v5121_v8 = vadd.f32 %v9587_v45, %v5082_v44  ;;  %v5152_v50 = vmax.f32 %v5120_v41, 0.0 }
 0x3fd   : > { %v5119_v52 = vadd.f32 %v9587_v45, %v5080_v55  ;;  %v7257_v2 = vpop.f32.mrb[104].mxu1  ;;  %v5150_v13 = vmax.f32 %v5118_v34, 0.0 }
 0x3fe   : > { %v5153_v48 = vmax.f32 %v5121_v8, 0.0  ;;  %v7433_v33 = vadd.f32 %v9495_v19, %v7257_v2  ;;  %v4941_v28 = vpop.f32.mrb[105].mxu1 }
 0x3ff   : > { %v5151_v38 = vmax.f32 %v5119_v52, 0.0  ;;  %v7436_v30 = vadd.f32 %v9483_v35, %v4941_v28  ;;  %v7258_v56 = vpop.f32.mrb[106].mxu1 }
 0x400   : > { %v6098_v49 = vpack.c.bf16 %v5153_v48, %v5152_v50  ;;  %v5085_v18 = vmul.f32 %v7433_v33, %v9581_v15  ;;  %v7439_v10 = vadd.f32 %v9501_v14, %v7258_v56  ;;  %v4944_v7 = vpop.f32.mrb[107].mxu1 }
 0x401   : > { %v6093_v47 = vpack.c.bf16 %v5151_v38, %v5150_v13  ;;  %v5083_v21 = vmul.f32 %v7436_v30, %v9581_v15  ;;  %v7442_v4 = vadd.f32 %v9489_v20, %v4944_v7 }
 0x402   : > { %6162 = vst [vmem:[%s9605_s21 + $0x18] sm:$0xff] %v6098_v49   ;;  %v5124_v19 = vadd.f32 %v9587_v45, %v5085_v18  ;;  %v5086_v25 = vmul.f32 %v7439_v10, %v9581_v15 }
 0x403   : > { %6161 = vst [vmem:[%s9605_s21 + $0x10] sm:$0xff] %v6093_v47   ;;  %v5122_v35 = vadd.f32 %v9587_v45, %v5083_v21  ;;  %v5084_v63 = vmul.f32 %v7442_v4, %v9581_v15 }
 0x404   : > { %v5125_v32 = vadd.f32 %v9587_v45, %v5086_v25  ;;  %v5156_v54 = vmax.f32 %v5124_v19, 0.0 }
 0x405   : > { %v5123_v14 = vadd.f32 %v9587_v45, %v5084_v63  ;;  %v7261_v5 = vpop.f32.mrb[108].mxu1  ;;  %v5154_v22 = vmax.f32 %v5122_v35, 0.0 }
 0x406   : > { %v5157_v37 = vmax.f32 %v5125_v32, 0.0  ;;  %v7445_v20 = vadd.f32 %v9519_v1, %v7261_v5  ;;  %v4957_v40 = vpop.f32.mrb[109].mxu1 }
 0x407   : > { %v5155_v46 = vmax.f32 %v5123_v14, 0.0  ;;  %v7448_v0 = vadd.f32 %v9507_v11, %v4957_v40  ;;  %v7262_v17 = vpop.f32.mrb[110].mxu1 }
 0x408   : > { %v6108_v53 = vpack.c.bf16 %v5157_v37, %v5156_v54  ;;  %v5089_v60 = vmul.f32 %v7445_v20, %v9581_v15  ;;  %v7451_v36 = vadd.f32 %v9525_v23, %v7262_v17  ;;  %v4960_v39 = vpop.f32.mrb[111].mxu1 }
 0x409   : > { %v6103_v12 = vpack.c.bf16 %v5155_v46, %v5154_v22  ;;  %v5087_v41 = vmul.f32 %v7448_v0, %v9581_v15  ;;  %v7454_v44 = vadd.f32 %v9513_v26, %v4960_v39 }
 0x40a   : > { %6164 = vst [vmem:[%s9605_s21 + $0x28] sm:$0xff] %v6108_v53   ;;  %v5128_v1 = vadd.f32 %v9587_v45, %v5089_v60  ;;  %v5090_v34 = vmul.f32 %v7451_v36, %v9581_v15 }
 0x40b   : > { %6163 = vst [vmem:[%s9605_s21 + $0x20] sm:$0xff] %v6103_v12   ;;  %v5126_v11 = vadd.f32 %v9587_v45, %v5087_v41  ;;  %v5088_v55 = vmul.f32 %v7454_v44, %v9581_v15 }
 0x40c   : > { %v5129_v8 = vadd.f32 %v9587_v45, %v5090_v34  ;;  %v5160_v2 = vmax.f32 %v5128_v1, 0.0 }
 0x40d   : > { %v5127_v23 = vadd.f32 %v9587_v45, %v5088_v55  ;;  %v7265_v52 = vpop.f32.mrb[112].mxu1  ;;  %v5158_v33 = vmax.f32 %v5126_v11, 0.0 }
 0x40e   : > { %v5161_v50 = vmax.f32 %v5129_v8, 0.0  ;;  %v7457_v26 = vadd.f32 %v9537_v42, %v7265_v52  ;;  %v4973_v48 = vpop.f32.mrb[113].mxu1 }
 0x40f   : > { %v5159_v28 = vmax.f32 %v5127_v23, 0.0  ;;  %v7460_v13 = vadd.f32 %v9531_v27, %v4973_v48  ;;  %v7266_v38 = vpop.f32.mrb[114].mxu1 }
 0x410   : > { %v6118_v30 = vpack.c.bf16 %v5161_v50, %v5160_v2  ;;  %v5093_v56 = vmul.f32 %v7457_v26, %v9581_v15  ;;  %v7463_v49 = vadd.f32 %v9540_v31, %v7266_v38  ;;  %v4976_v18 = vpop.f32.mrb[115].mxu1 }
 0x411   : > { %v6113_v10 = vpack.c.bf16 %v5159_v28, %v5158_v33  ;;  %v5091_v7 = vmul.f32 %v7460_v13, %v9581_v15  ;;  %v7466_v47 = vadd.f32 %v9534_v59, %v4976_v18 }
 0x412   : > { %6166 = vst [vmem:[%s9605_s21 + $0x38] sm:$0xff] %v6118_v30   ;;  %v5132_v42 = vadd.f32 %v9587_v45, %v5093_v56  ;;  %v5094_v21 = vmul.f32 %v7463_v49, %v9581_v15 }
 0x413   : > { %6165 = vst [vmem:[%s9605_s21 + $0x30] sm:$0xff] %v6113_v10   ;;  %v5130_v27 = vadd.f32 %v9587_v45, %v5091_v7  ;;  %v5092_v4 = vmul.f32 %v7466_v47, %v9581_v15 }
 0x414   : > { %v5133_v19 = vadd.f32 %v9587_v45, %v5094_v21  ;;  %v5164_v35 = vmax.f32 %v5132_v42, 0.0 }
 0x415   : > { %v5131_v31 = vadd.f32 %v9587_v45, %v5092_v4  ;;  %v7269_v25 = vpop.f32.mrb[116].mxu1  ;;  %v5162_v14 = vmax.f32 %v5130_v27, 0.0 }
 0x416   : > { %v5165_v63 = vmax.f32 %v5133_v19, 0.0  ;;  %v7469_v59 = vadd.f32 %v9549_v43, %v7269_v25  ;;  %v4989_v32 = vpop.f32.mrb[117].mxu1 }
 0x417   : > { %v5163_v5 = vmax.f32 %v5131_v31, 0.0  ;;  %v7472_v54 = vadd.f32 %v9543_v3, %v4989_v32  ;;  %v7270_v37 = vpop.f32.mrb[118].mxu1 }
 0x418   : > { %v6128_v20 = vpack.c.bf16 %v5165_v63, %v5164_v35  ;;  %v5097_v40 = vmul.f32 %v7469_v59, %v9581_v15  ;;  %v7475_v22 = vadd.f32 %v9552_v29, %v7270_v37  ;;  %v4992_v46 = vpop.f32.mrb[119].mxu1 }
 0x419   : > { %v6123_v0 = vpack.c.bf16 %v5163_v5, %v5162_v14  ;;  %v5095_v17 = vmul.f32 %v7472_v54, %v9581_v15  ;;  %v7478_v53 = vadd.f32 %v9546_v24, %v4992_v46 }
 0x41a   : > { %6168 = vst [vmem:[%s9605_s21 + $0x48] sm:$0xff] %v6128_v20   ;;  %v5136_v43 = vadd.f32 %v9587_v45, %v5097_v40  ;;  %v5098_v60 = vmul.f32 %v7475_v22, %v9581_v15 }
 0x41b   : > { %6167 = vst [vmem:[%s9605_s21 + $0x40] sm:$0xff] %v6123_v0   ;;  %v5134_v3 = vadd.f32 %v9587_v45, %v5095_v17  ;;  %v5096_v36 = vmul.f32 %v7478_v53, %v9581_v15 }
 0x41c   : > { %v5137_v39 = vadd.f32 %v9587_v45, %v5098_v60  ;;  %v5168_v41 = vmax.f32 %v5136_v43, 0.0 }
 0x41d   : > { %v5135_v29 = vadd.f32 %v9587_v45, %v5096_v36  ;;  %v7273_v12 = vpop.f32.mrb[120].mxu1  ;;  %v5166_v34 = vmax.f32 %v5134_v3, 0.0 }
 0x41e   : > { %v5169_v44 = vmax.f32 %v5137_v39, 0.0  ;;  %v7481_v24 = vadd.f32 %v9561_v6, %v7273_v12  ;;  %v5005_v1 = vpop.f32.mrb[121].mxu1 }
 0x41f   : > { %v5167_v11 = vmax.f32 %v5135_v29, 0.0  ;;  %v7484_v55 = vadd.f32 %v9555_v58, %v5005_v1  ;;  %v7274_v8 = vpop.f32.mrb[122].mxu1 }
 0x420   : > { %v6138_v23 = vpack.c.bf16 %v5169_v44, %v5168_v41  ;;  %v5101_v52 = vmul.f32 %v7481_v24, %v9581_v15  ;;  %v7487_v2 = vadd.f32 %v9564_v51, %v7274_v8  ;;  %v5008_v50 = vpop.f32.mrb[123].mxu1 }
 0x421   : > { %v6133_v26 = vpack.c.bf16 %v5167_v11, %v5166_v34  ;;  %v5099_v48 = vmul.f32 %v7484_v55, %v9581_v15  ;;  %v7490_v33 = vadd.f32 %v9558_v57, %v5008_v50 }
 0x422   : > { %6170 = vst [vmem:[%s9605_s21 + $0x58] sm:$0xff] %v6138_v23   ;;  %v5140_v6 = vadd.f32 %v9587_v45, %v5101_v52  ;;  %v5102_v28 = vmul.f32 %v7487_v2, %v9581_v15 }
 0x423   : > { %6169 = vst [vmem:[%s9605_s21 + $0x50] sm:$0xff] %v6133_v26   ;;  %v5138_v58 = vadd.f32 %v9587_v45, %v5099_v48  ;;  %v5100_v13 = vmul.f32 %v7490_v33, %v9581_v15 }
 0x424   : > { %v5141_v38 = vadd.f32 %v9587_v45, %v5102_v28  ;;  %v5172_v56 = vmax.f32 %v5140_v6, 0.0 }
 0x425   : > { %v5139_v51 = vadd.f32 %v9587_v45, %v5100_v13  ;;  %v7277_v30 = vpop.f32.mrb[124].mxu1  ;;  %v5170_v10 = vmax.f32 %v5138_v58, 0.0 }
 0x426   : > { %v5173_v49 = vmax.f32 %v5141_v38, 0.0  ;;  %v7493_v57 = vadd.f32 %v9573_v9, %v7277_v30  ;;  %v5021_v18 = vpop.f32.mrb[125].mxu1 }
 0x427   : > { %v5171_v7 = vmax.f32 %v5139_v51, 0.0  ;;  %v7496_v47 = vadd.f32 %v9567_v61, %v5021_v18  ;;  %v7278_v42 = vpop.f32.mrb[126].mxu1 }
 0x428   : > { %v6148_v21 = vpack.c.bf16 %v5173_v49, %v5172_v56  ;;  %v5105_v27 = vmul.f32 %v7493_v57, %v9581_v15  ;;  %v7499_v4 = vadd.f32 %v9576_v16, %v7278_v42  ;;  %v5024_v19 = vpop.f32.mrb[127].mxu1 }
 0x429   : > { %v6143_v31 = vpack.c.bf16 %v5171_v7, %v5170_v10  ;;  %v5103_v25 = vmul.f32 %v7496_v47, %v9581_v15  ;;  %v7502_v35 = vadd.f32 %v9570_v62, %v5024_v19 }
 0x42a   : > { %6172 = vst [vmem:[%s9605_s21 + $0x68] sm:$0xff] %v6148_v21   ;;  %v5144_v9 = vadd.f32 %v9587_v45, %v5105_v27  ;;  %v5106_v63 = vmul.f32 %v7499_v4, %v9581_v15 }
 0x42b   : > { %6171 = vst [vmem:[%s9605_s21 + $0x60] sm:$0xff] %v6143_v31   ;;  %v5142_v61 = vadd.f32 %v9587_v45, %v5103_v25  ;;  %v5104_v59 = vmul.f32 %v7502_v35, %v9581_v15 }
 0x42c   : > { %v5145_v16 = vadd.f32 %v9587_v45, %v5106_v63  ;;  %v5176_v14 = vmax.f32 %v5144_v9, 0.0 }
 0x42d   : > { %v5143_v32 = vadd.f32 %v9587_v45, %v5104_v59  ;;  %v5174_v54 = vmax.f32 %v5142_v61, 0.0 }
 0x42e   : > { %v5177_v5 = vmax.f32 %v5145_v16, 0.0 }
 0x42f   : > { %v5175_v37 = vmax.f32 %v5143_v32, 0.0 }
 0x430   : > { %v6158_v62 = vpack.c.bf16 %v5177_v5, %v5176_v14 }
 0x431   : > { %v6153_v20 = vpack.c.bf16 %v5175_v37, %v5174_v54 }
 0x432   : > { %6174 = vst [vmem:[%s9605_s21 + $0x78] sm:$0xff] %v6158_v62  }
 0x433   : > { %6173 = vst [vmem:[%s9605_s21 + $0x70] sm:$0xff] %v6153_v20  }
 0x434 PF: > { %s17_s24 = sadd.s32 1, %s7880_s24  }
 0x435   : > { %p14_p4 = scmp.ge.s32.totalorder %s17_s24, 4  }
 0x437   :  { %16 = sbr.rel (!%p14_p4) target bundleno = 1 (0x1), region = 87 }

</bundles_post_ra>
